<compile_context>
chip_gen: v5e
topology: v5e:2x2
jax: 0.10.0
libtpu: 0.0.40
codegen_flags: <defaults>
</compile_context>

<pallas_src>
import jax
import jax.numpy as jnp
import numpy as np
from jax.experimental import pallas as pl
from jax.experimental.pallas import tpu as pltpu

# -------------------- config (consistent with the module) -------------------
IMG = 16
PATCH = 4
IN_CHANS = 3
EMBED = 64
DEPTH = 2
HEADS = 4
HEAD_DIM = EMBED // HEADS
NUM_CLASSES = 10
NUM_PATCHES = (IMG // PATCH) ** 2          # 16
N_TOK = NUM_PATCHES + 1                    # 17 real tokens
N_PAD = 24                                 # tokens padded to a sublane multiple
CLS_ROW = NUM_PATCHES                      # cls token stored at row 16 (aligned)
RBF_K = 11                                 # mlp_hidden_dim = int(11)
RBF_KP = EMBED                             # RBF centers padded 11 -> 64 lanes
PATCH_DIM = IN_CHANS * PATCH * PATCH       # 48
HEAD_PAD = 128                             # lane-dense logits buffer
EPS = 1e-5                                 # nn.LayerNorm default eps


def _layer_norm(x, w_row, b_row):
    mu = jnp.mean(x, axis=-1, keepdims=True)
    var = jnp.mean((x - mu) ** 2, axis=-1, keepdims=True)
    return (x - mu) * jax.lax.rsqrt(var + EPS) * w_row + b_row


# ------------------------------ fused kernel --------------------------------
def _fused_vit_kernel(p_ref, xinit_ref, wpat_ref, w5_ref, wproj_ref,
                      wrbf_ref, wfc_ref, vec_ref, hw_ref, hb_ref, o_ref):
    f32 = jnp.float32
    bf16 = jnp.bfloat16

    # ---- patch embed (Conv2d stride=p) ; patch bias / cls / pos folded into xinit
    p = p_ref[0].astype(bf16)                                       # (NP, PD)
    emb = jnp.dot(p, wpat_ref[...], preferred_element_type=f32)     # (NP, E)
    x = xinit_ref[...] + jnp.concatenate(
        [emb, jnp.zeros((N_PAD - NUM_PATCHES, EMBED), f32)], axis=0)  # (N_PAD, E)

    # additive key mask for padded tokens (cols >= N_TOK)
    col = jax.lax.broadcasted_iota(jnp.int32, (1, N_PAD), 1)
    kmask = jnp.where(col < N_TOK, 0.0, -1e30).astype(f32)          # (1, N_PAD)

    for d in range(DEPTH):
        vec = vec_ref[d]                                            # (8, E) f32
        ln1w, ln1b = vec[0:1], vec[1:2]
        ln2w, ln2b = vec[2:3], vec[3:4]
        bproj, bfc = vec[4:5], vec[5:6]
        beta, cmc = vec[6:7], vec[7:8]

        # ---- Hyper_Attention (M and scale already folded into w5) ----
        xn = _layer_norm(x, ln1w, ln1b).astype(bf16)
        qkv5 = jnp.dot(xn, w5_ref[d], preferred_element_type=f32)   # (N, 5E)
        heads = []
        for h in range(HEADS):
            lo, hi = h * HEAD_DIM, (h + 1) * HEAD_DIM
            q = qkv5[:, 0 * EMBED + lo:0 * EMBED + hi]
            k = qkv5[:, 1 * EMBED + lo:1 * EMBED + hi]
            v = qkv5[:, 2 * EMBED + lo:2 * EMBED + hi]
            qm = qkv5[:, 3 * EMBED + lo:3 * EMBED + hi]             # q @ (s*M)
            km = qkv5[:, 4 * EMBED + lo:4 * EMBED + hi]             # k @ (s*M)
            qmq = jnp.sum(q * qm, axis=-1, keepdims=True)           # (N, 1)
            kmk = jnp.sum(k * km, axis=-1, keepdims=True)           # (N, 1)
            qmk = jax.lax.dot_general(
                qm.astype(bf16), k.astype(bf16),
                (((1,), (1,)), ((), ())), preferred_element_type=f32)  # (N, N)
            logits = -(qmq + kmk.T - 2.0 * qmk) + kmask
            logits = logits - jnp.max(logits, axis=-1, keepdims=True)
            pexp = jnp.exp(logits)
            denom = jnp.sum(pexp, axis=-1, keepdims=True)
            attn = pexp * pl.reciprocal(denom, approx=True)
            heads.append(jnp.dot(attn.astype(bf16), v.astype(bf16),
                                 preferred_element_type=f32))       # (N, hd)
        yh = jnp.concatenate(heads, axis=-1).astype(bf16)           # (N, E)
        x = x + jnp.dot(yh, wproj_ref[d], preferred_element_type=f32) + bproj

        # ---- RBFNetwork MLP (radial_function_ma + fc) ----
        xn2 = _layer_norm(x, ln2w, ln2b)
        cat = jnp.dot(xn2.astype(bf16), wrbf_ref[d],
                      preferred_element_type=f32)                   # (N, E+KP)
        xM = cat[:, :EMBED]                                         # xn2 @ M_RBF
        xMc = cat[:, EMBED:]                                        # xn2 @ M_RBF @ C^T
        xMx = jnp.sum(xn2 * xM, axis=-1, keepdims=True)             # (N, 1)
        dist = xMx + cmc - 2.0 * xMc                                # (N, KP)
        rbf = jnp.exp(-beta * dist)                                 # pad cols -> 1
        x = x + jnp.dot(rbf.astype(bf16), wfc_ref[d],
                        preferred_element_type=f32) + bfc           # zero pad rows

    # ---- final norm + head on cls row (affine + bias folded into hw/hb) ----
    cls = x[CLS_ROW:CLS_ROW + 1, :]                                 # (1, E)
    mu = jnp.mean(cls, axis=-1, keepdims=True)
    var = jnp.mean((cls - mu) ** 2, axis=-1, keepdims=True)
    cls_n = (cls - mu) * jax.lax.rsqrt(var + EPS)
    o_ref[0] = (jnp.dot(cls_n.astype(bf16), hw_ref[...],
                        preferred_element_type=f32) + hb_ref[...])  # (1, 128)


# ------------------------------ wrappers -------------------------------------
def _extract_patches(x_nchw):
    """(B, C, H, W) -> (B, NUM_PATCHES, C*p*p), matching Conv2d(stride=p)."""
    B, C, H, W = x_nchw.shape
    x = x_nchw.reshape(B, C, H // PATCH, PATCH, W // PATCH, PATCH)
    x = x.transpose(0, 2, 4, 1, 3, 5)           # (B, Hp, Wp, C, ph, pw)
    return x.reshape(B, NUM_PATCHES, PATCH_DIM)


def pack_params(P):
    """Fold / pad / stack the module params into the fused-kernel layout."""
    f32, bf16 = jnp.float32, jnp.bfloat16
    K = {}
    K['patch_w'] = P['patch_w'].astype(bf16)                          # (PD, E)

    # token-init: rows 0..15 = pos[1:] + patch_b, row 16 = cls + pos[0], pad = 0
    xinit = jnp.zeros((N_PAD, EMBED), f32)
    xinit = xinit.at[:NUM_PATCHES].set(P['pos_embed'][0, 1:] + P['patch_b'])
    xinit = xinit.at[CLS_ROW].set(P['pos_embed'][0, 0] + P['cls_token'][0, 0])
    K['xinit'] = xinit

    w5s, wprojs, wrbfs, wfcs, vecs = [], [], [], [], []
    for blk in P['blocks']:
        C = EMBED
        wq = blk['w_qkv_t'][:, :C]
        wk = blk['w_qkv_t'][:, C:2 * C]
        mbd = jnp.kron(jnp.eye(HEADS, dtype=f32), blk['M']) * blk['scale'][0, 0]
        w5s.append(jnp.concatenate([blk['w_qkv_t'], wq @ mbd, wk @ mbd], axis=1))
        wprojs.append(blk['w_proj_t'])

        mct = blk['m_rbf'] @ blk['centers'].T                         # (C, K)
        mct_pad = jnp.zeros((C, RBF_KP), f32).at[:, :RBF_K].set(mct)
        wrbfs.append(jnp.concatenate([blk['m_rbf'], mct_pad], axis=1))  # (C, C+KP)
        wfcs.append(jnp.zeros((RBF_KP, C), f32).at[:RBF_K].set(blk['w_fc_t']))

        c_m = blk['centers'] @ blk['m_rbf']
        cmc = jnp.sum(blk['centers'] * c_m, axis=-1)                  # (K,)
        beta_pad = jnp.zeros((C,), f32).at[:RBF_K].set(blk['beta'][0])
        cmc_pad = jnp.zeros((C,), f32).at[:RBF_K].set(cmc)
        vecs.append(jnp.stack([blk['ln1_w'][0], blk['ln1_b'][0],
                               blk['ln2_w'][0], blk['ln2_b'][0],
                               blk['b_proj'][0], blk['b_fc'][0],
                               beta_pad, cmc_pad], axis=0))           # (8, C)

    K['w5'] = jnp.stack(w5s).astype(bf16)            # (D, E, 5E)
    K['wproj'] = jnp.stack(wprojs).astype(bf16)      # (D, E, E)
    K['wrbf'] = jnp.stack(wrbfs).astype(bf16)        # (D, E, E+KP)
    K['wfc'] = jnp.stack(wfcs).astype(bf16)          # (D, KP, E)
    K['vec'] = jnp.stack(vecs).astype(f32)           # (D, 8, E)

    hw = P['norm_w'][0][:, None] * P['head_w_t']                      # (E, NC)
    hb = P['norm_b'][0] @ P['head_w_t'] + P['head_b'][0]              # (NC,)
    K['head_w'] = (jnp.zeros((EMBED, HEAD_PAD), f32)
                   .at[:, :NUM_CLASSES].set(hw).astype(bf16))
    K['head_b'] = jnp.zeros((1, HEAD_PAD), f32).at[0, :NUM_CLASSES].set(hb)
    return K


@jax.jit
def hyper_vit_forward(x_nchw, K):
    B = x_nchw.shape[0]
    patches = _extract_patches(x_nchw)                    # (B, NP, PD) f32

    out = pl.pallas_call(
        _fused_vit_kernel,
        grid=(B,),
        in_specs=[
            pl.BlockSpec((1, NUM_PATCHES, PATCH_DIM), lambda b: (b, 0, 0)),
            pl.BlockSpec((N_PAD, EMBED), lambda b: (0, 0)),
            pl.BlockSpec((PATCH_DIM, EMBED), lambda b: (0, 0)),
            pl.BlockSpec((DEPTH, EMBED, 5 * EMBED), lambda b: (0, 0, 0)),
            pl.BlockSpec((DEPTH, EMBED, EMBED), lambda b: (0, 0, 0)),
            pl.BlockSpec((DEPTH, EMBED, EMBED + RBF_KP), lambda b: (0, 0, 0)),
            pl.BlockSpec((DEPTH, RBF_KP, EMBED), lambda b: (0, 0, 0)),
            pl.BlockSpec((DEPTH, 8, EMBED), lambda b: (0, 0, 0)),
            pl.BlockSpec((EMBED, HEAD_PAD), lambda b: (0, 0)),
            pl.BlockSpec((1, HEAD_PAD), lambda b: (0, 0)),
        ],
        out_specs=pl.BlockSpec((1, 1, HEAD_PAD), lambda b: (b, 0, 0)),
        out_shape=jax.ShapeDtypeStruct((B, 1, HEAD_PAD), jnp.float32),
        compiler_params=pltpu.CompilerParams(dimension_semantics=("parallel",)),
    )(patches, K['xinit'], K['patch_w'], K['w5'], K['wproj'], K['wrbf'],
      K['wfc'], K['vec'], K['head_w'], K['head_b'])

    return out[:, 0, :NUM_CLASSES]


# ------------------------------ pure-JAX reference ---------------------------
def ref_forward(x_nchw, P):
    with jax.default_matmul_precision('float32'):
        B = x_nchw.shape[0]
        patches = _extract_patches(x_nchw)
        x = patches @ P['patch_w'] + P['patch_b']
        cls = jnp.broadcast_to(P['cls_token'], (B, 1, EMBED))
        x = jnp.concatenate([cls, x], axis=1) + P['pos_embed']
        for blk in P['blocks']:
            xn = _layer_norm(x, blk['ln1_w'], blk['ln1_b'])
            qkv = xn @ blk['w_qkv_t']
            qkv = qkv.reshape(B, N_TOK, 3, HEADS, HEAD_DIM).transpose(2, 0, 3, 1, 4)
            q, k, v = qkv[0], qkv[1], qkv[2]
            qM = q @ blk['M']
            kM = k @ blk['M']
            qMq = jnp.sum(q * qM, axis=-1, keepdims=True)
            kMk = jnp.swapaxes(jnp.sum(k * kM, axis=-1, keepdims=True), -2, -1)
            qMk = qM @ jnp.swapaxes(k, -2, -1)
            dists = qMq + kMk - 2.0 * qMk
            attn = jax.nn.softmax(-dists * blk['scale'][0, 0], axis=-1)
            y = (attn @ v).transpose(0, 2, 1, 3).reshape(B, N_TOK, EMBED)
            y = y @ blk['w_proj_t'] + blk['b_proj']
            x = x + y
            xn2 = _layer_norm(x, blk['ln2_w'], blk['ln2_b'])
            xM = xn2 @ blk['m_rbf']
            xMx = jnp.sum(xn2 * xM, axis=-1, keepdims=True)
            cM = blk['centers'] @ blk['m_rbf']
            cMc = jnp.sum(blk['centers'] * cM, axis=-1)
            xMc = xM @ blk['centers'].T
            dist = xMx + cMc - 2.0 * xMc
            rbf = jnp.exp(-blk['beta'] * dist)
            x = x + (rbf @ blk['w_fc_t'] + blk['b_fc'])
        xn = _layer_norm(x, P['norm_w'], P['norm_b'])
        return xn[:, 0] @ P['head_w_t'] + P['head_b']


# ------------------------------ parameter init --------------------------------
def init_params(key):
    keys = jax.random.split(key, 4 + DEPTH * 4 + 2)
    it = iter(keys)
    nxt = lambda: next(it)

    P = {}
    conv_w = 0.02 * jax.random.normal(nxt(), (EMBED, IN_CHANS, PATCH, PATCH),
                                      jnp.float32)
    P['patch_w'] = conv_w.reshape(EMBED, PATCH_DIM).T          # (PD, E)
    P['patch_b'] = jnp.zeros((1, EMBED), jnp.float32)
    P['cls_token'] = 0.02 * jax.random.normal(nxt(), (1, 1, EMBED), jnp.float32)
    P['pos_embed'] = 0.02 * jax.random.normal(nxt(), (1, N_TOK, EMBED),
                                              jnp.float32)
    blocks = []
    for _ in range(DEPTH):
        blk = {}
        blk['ln1_w'] = jnp.ones((1, EMBED), jnp.float32)
        blk['ln1_b'] = jnp.zeros((1, EMBED), jnp.float32)
        w_qkv = 0.02 * jax.random.normal(nxt(), (3 * EMBED, EMBED), jnp.float32)
        blk['w_qkv_t'] = w_qkv.T                               # (C, 3C)
        blk['M'] = jnp.eye(HEAD_DIM, dtype=jnp.float32)
        blk['scale'] = jnp.full((1, 1), HEAD_DIM ** (-0.5), jnp.float32)
        w_proj = 0.02 * jax.random.normal(nxt(), (EMBED, EMBED), jnp.float32)
        blk['w_proj_t'] = w_proj.T
        blk['b_proj'] = jnp.zeros((1, EMBED), jnp.float32)
        blk['ln2_w'] = jnp.ones((1, EMBED), jnp.float32)
        blk['ln2_b'] = jnp.zeros((1, EMBED), jnp.float32)
        blk['m_rbf'] = jnp.eye(EMBED, dtype=jnp.float32)       # M_RBF
        blk['centers'] = jax.random.normal(nxt(), (RBF_K, EMBED), jnp.float32)
        blk['beta'] = jnp.full((1, RBF_K), 0.1, jnp.float32)
        w_fc = 0.02 * jax.random.normal(nxt(), (EMBED, RBF_K), jnp.float32)
        blk['w_fc_t'] = w_fc.T                                 # (K, C)
        blk['b_fc'] = jnp.zeros((1, EMBED), jnp.float32)
        blocks.append(blk)
    P['blocks'] = blocks
    P['norm_w'] = jnp.ones((1, EMBED), jnp.float32)
    P['norm_b'] = jnp.zeros((1, EMBED), jnp.float32)
    w_head = 0.02 * jax.random.normal(nxt(), (NUM_CLASSES, EMBED), jnp.float32)
    P['head_w_t'] = w_head.T
    P['head_b'] = jnp.zeros((1, NUM_CLASSES), jnp.float32)
    return P


# ----------------------------------- main --------------------------------------
if __name__ == "__main__":
    key = jax.random.PRNGKey(0)
    pkey, xkey = jax.random.split(key)
    params = init_params(pkey)
    packed = pack_params(params)
    x = jax.random.normal(xkey, (2, IN_CHANS, IMG, IMG), jnp.float32)

    out = jax.block_until_ready(hyper_vit_forward(x, packed))
    ref = jax.block_until_ready(ref_forward(x, params))
    if not np.allclose(np.asarray(out), np.asarray(ref), rtol=2e-2, atol=2e-2):
        raise AssertionError("Pallas output does not match JAX reference")

    print("KERNEL_OK")
</pallas_src>

<mosaic_0001>
module attributes {stable_mosaic.version = 11 : i64} {
  func.func @_fused_vit_kernel(%arg0: i32, %arg1: memref<1x16x48xf32, #tpu.memory_space<vmem>>, %arg2: memref<24x64xf32, #tpu.memory_space<vmem>>, %arg3: memref<48x64xbf16, #tpu.memory_space<vmem>>, %arg4: memref<2x64x320xbf16, #tpu.memory_space<vmem>>, %arg5: memref<2x64x64xbf16, #tpu.memory_space<vmem>>, %arg6: memref<2x64x128xbf16, #tpu.memory_space<vmem>>, %arg7: memref<2x64x64xbf16, #tpu.memory_space<vmem>>, %arg8: memref<2x8x64xf32, #tpu.memory_space<vmem>>, %arg9: memref<64x128xbf16, #tpu.memory_space<vmem>>, %arg10: memref<1x128xf32, #tpu.memory_space<vmem>>, %arg11: memref<1x1x128xf32, #tpu.memory_space<vmem>>) attributes {dimension_semantics = [#tpu.dimension_semantics<parallel>], iteration_bounds = array<i64: 2>, scalar_prefetch = 0 : i64, scratch_operands = 0 : i64, tpu.core_type = #tpu.core_type<tc>, window_params = [{transform_indices = @transform_0, window_bounds = array<i64: 1, 16, 48>}, {pipeline_mode = #tpu.pipeline_mode<synchronous>, transform_indices = @transform_1, window_bounds = array<i64: 24, 64>}, {pipeline_mode = #tpu.pipeline_mode<synchronous>, transform_indices = @transform_2, window_bounds = array<i64: 48, 64>}, {pipeline_mode = #tpu.pipeline_mode<synchronous>, transform_indices = @transform_3, window_bounds = array<i64: 2, 64, 320>}, {pipeline_mode = #tpu.pipeline_mode<synchronous>, transform_indices = @transform_4, window_bounds = array<i64: 2, 64, 64>}, {pipeline_mode = #tpu.pipeline_mode<synchronous>, transform_indices = @transform_5, window_bounds = array<i64: 2, 64, 128>}, {pipeline_mode = #tpu.pipeline_mode<synchronous>, transform_indices = @transform_6, window_bounds = array<i64: 2, 64, 64>}, {pipeline_mode = #tpu.pipeline_mode<synchronous>, transform_indices = @transform_7, window_bounds = array<i64: 2, 8, 64>}, {pipeline_mode = #tpu.pipeline_mode<synchronous>, transform_indices = @transform_8, window_bounds = array<i64: 64, 128>}, {pipeline_mode = #tpu.pipeline_mode<synchronous>, transform_indices = @transform_9, window_bounds = array<i64: 1, 128>}, {transform_indices = @transform_10, window_bounds = array<i64: 1, 1, 128>}]} {
    %c0 = arith.constant 0 : index
    %c0_0 = arith.constant 0 : index
    %c0_1 = arith.constant 0 : index
    %0 = vector.load %arg1[%c0, %c0_0, %c0_1] : memref<1x16x48xf32, #tpu.memory_space<vmem>>, vector<1x16x48xf32>
    %1 = vector.shape_cast %0 : vector<1x16x48xf32> to vector<16x48xf32>
    %2 = arith.truncf %1 : vector<16x48xf32> to vector<16x48xbf16>
    %c0_2 = arith.constant 0 : index
    %c0_3 = arith.constant 0 : index
    %3 = vector.load %arg3[%c0_2, %c0_3] : memref<48x64xbf16, #tpu.memory_space<vmem>>, vector<48x64xbf16>
    %cst = arith.constant dense<0.000000e+00> : vector<16x64xf32>
    %4 = tpu.matmul %2, %3, %cst {dimension_numbers = #tpu.dot_dimension_numbers<[1], [0], [0], [1], [0, 0, 1, 1], [], []>} : vector<16x48xbf16>, vector<48x64xbf16>, vector<16x64xf32> -> vector<16x64xf32>
    %c0_4 = arith.constant 0 : index
    %c0_5 = arith.constant 0 : index
    %5 = vector.load %arg2[%c0_4, %c0_5] : memref<24x64xf32, #tpu.memory_space<vmem>>, vector<24x64xf32>
    %cst_6 = arith.constant 0.000000e+00 : f32
    %6 = vector.broadcast %cst_6 : f32 to vector<8x64xf32>
    %7 = tpu.concatenate %4, %6 in 0 : vector<16x64xf32>, vector<8x64xf32> -> vector<24x64xf32>
    %8 = arith.addf %5, %7 : vector<24x64xf32>
    %9 = tpu.iota {dimensions = array<i32: 1>} : vector<1x24xi32>
    %c17_i32 = arith.constant 17 : i32
    %10 = vector.broadcast %c17_i32 : i32 to vector<1x24xi32>
    %11 = arith.cmpi slt, %9, %10 : vector<1x24xi32>
    %cst_7 = arith.constant 0.000000e+00 : f32
    %cst_8 = arith.constant -1.000000e+30 : f32
    %12 = vector.broadcast %cst_7 : f32 to vector<1x24xf32>
    %13 = vector.broadcast %cst_8 : f32 to vector<1x24xf32>
    %14 = arith.select %11, %12, %13 : vector<1x24xi1>, vector<1x24xf32>
    %c0_9 = arith.constant 0 : index
    %c0_10 = arith.constant 0 : index
    %c0_11 = arith.constant 0 : index
    %15 = vector.load %arg8[%c0_9, %c0_10, %c0_11] : memref<2x8x64xf32, #tpu.memory_space<vmem>>, vector<1x8x64xf32>
    %16 = vector.shape_cast %15 : vector<1x8x64xf32> to vector<8x64xf32>
    %17 = vector.extract_strided_slice %16 {offsets = [0, 0], sizes = [1, 64], strides = [1, 1]} : vector<8x64xf32> to vector<1x64xf32>
    %18 = vector.extract_strided_slice %16 {offsets = [1, 0], sizes = [1, 64], strides = [1, 1]} : vector<8x64xf32> to vector<1x64xf32>
    %19 = vector.extract_strided_slice %16 {offsets = [2, 0], sizes = [1, 64], strides = [1, 1]} : vector<8x64xf32> to vector<1x64xf32>
    %20 = vector.extract_strided_slice %16 {offsets = [3, 0], sizes = [1, 64], strides = [1, 1]} : vector<8x64xf32> to vector<1x64xf32>
    %21 = vector.extract_strided_slice %16 {offsets = [4, 0], sizes = [1, 64], strides = [1, 1]} : vector<8x64xf32> to vector<1x64xf32>
    %22 = vector.extract_strided_slice %16 {offsets = [5, 0], sizes = [1, 64], strides = [1, 1]} : vector<8x64xf32> to vector<1x64xf32>
    %23 = vector.extract_strided_slice %16 {offsets = [6, 0], sizes = [1, 64], strides = [1, 1]} : vector<8x64xf32> to vector<1x64xf32>
    %24 = vector.extract_strided_slice %16 {offsets = [7, 0], sizes = [1, 64], strides = [1, 1]} : vector<8x64xf32> to vector<1x64xf32>
    %cst_12 = arith.constant dense<0.000000e+00> : vector<24xf32>
    %25 = vector.multi_reduction <add>, %8, %cst_12 [1] : vector<24x64xf32> to vector<24xf32>
    %26 = vector.shape_cast %25 : vector<24xf32> to vector<24x1xf32>
    %cst_13 = arith.constant 6.400000e+01 : f32
    %27 = vector.broadcast %cst_13 : f32 to vector<24x1xf32>
    %28 = arith.divf %26, %27 : vector<24x1xf32>
    %29 = vector.broadcast %28 : vector<24x1xf32> to vector<24x64xf32>
    %30 = arith.subf %8, %29 : vector<24x64xf32>
    %31 = arith.mulf %30, %30 : vector<24x64xf32>
    %cst_14 = arith.constant dense<0.000000e+00> : vector<24xf32>
    %32 = vector.multi_reduction <add>, %31, %cst_14 [1] : vector<24x64xf32> to vector<24xf32>
    %33 = vector.shape_cast %32 : vector<24xf32> to vector<24x1xf32>
    %cst_15 = arith.constant 6.400000e+01 : f32
    %34 = vector.broadcast %cst_15 : f32 to vector<24x1xf32>
    %35 = arith.divf %33, %34 : vector<24x1xf32>
    %36 = vector.broadcast %28 : vector<24x1xf32> to vector<24x64xf32>
    %37 = arith.subf %8, %36 : vector<24x64xf32>
    %cst_16 = arith.constant 9.99999974E-6 : f32
    %38 = vector.broadcast %cst_16 : f32 to vector<24x1xf32>
    %39 = arith.addf %35, %38 : vector<24x1xf32>
    %40 = math.rsqrt %39 : vector<24x1xf32>
    %41 = vector.broadcast %40 : vector<24x1xf32> to vector<24x64xf32>
    %42 = arith.mulf %37, %41 : vector<24x64xf32>
    %43 = vector.broadcast %17 : vector<1x64xf32> to vector<24x64xf32>
    %44 = arith.mulf %42, %43 : vector<24x64xf32>
    %45 = vector.broadcast %18 : vector<1x64xf32> to vector<24x64xf32>
    %46 = arith.addf %44, %45 : vector<24x64xf32>
    %47 = arith.truncf %46 : vector<24x64xf32> to vector<24x64xbf16>
    %c0_17 = arith.constant 0 : index
    %c0_18 = arith.constant 0 : index
    %c0_19 = arith.constant 0 : index
    %48 = vector.load %arg4[%c0_17, %c0_18, %c0_19] : memref<2x64x320xbf16, #tpu.memory_space<vmem>>, vector<1x64x320xbf16>
    %49 = vector.shape_cast %48 : vector<1x64x320xbf16> to vector<64x320xbf16>
    %cst_20 = arith.constant dense<0.000000e+00> : vector<24x320xf32>
    %50 = tpu.matmul %47, %49, %cst_20 {dimension_numbers = #tpu.dot_dimension_numbers<[1], [0], [0], [1], [0, 0, 1, 1], [], []>} : vector<24x64xbf16>, vector<64x320xbf16>, vector<24x320xf32> -> vector<24x320xf32>
    %51 = vector.extract_strided_slice %50 {offsets = [0, 0], sizes = [24, 16], strides = [1, 1]} : vector<24x320xf32> to vector<24x16xf32>
    %52 = vector.extract_strided_slice %50 {offsets = [0, 64], sizes = [24, 16], strides = [1, 1]} : vector<24x320xf32> to vector<24x16xf32>
    %53 = vector.extract_strided_slice %50 {offsets = [0, 128], sizes = [24, 16], strides = [1, 1]} : vector<24x320xf32> to vector<24x16xf32>
    %54 = vector.extract_strided_slice %50 {offsets = [0, 192], sizes = [24, 16], strides = [1, 1]} : vector<24x320xf32> to vector<24x16xf32>
    %55 = vector.extract_strided_slice %50 {offsets = [0, 256], sizes = [24, 16], strides = [1, 1]} : vector<24x320xf32> to vector<24x16xf32>
    %56 = arith.mulf %51, %54 : vector<24x16xf32>
    %cst_21 = arith.constant dense<0.000000e+00> : vector<24xf32>
    %57 = vector.multi_reduction <add>, %56, %cst_21 [1] : vector<24x16xf32> to vector<24xf32>
    %58 = vector.shape_cast %57 : vector<24xf32> to vector<24x1xf32>
    %59 = arith.mulf %52, %55 : vector<24x16xf32>
    %cst_22 = arith.constant dense<0.000000e+00> : vector<24xf32>
    %60 = vector.multi_reduction <add>, %59, %cst_22 [1] : vector<24x16xf32> to vector<24xf32>
    %61 = vector.shape_cast %60 : vector<24xf32> to vector<24x1xf32>
    %62 = arith.truncf %54 : vector<24x16xf32> to vector<24x16xbf16>
    %63 = arith.truncf %52 : vector<24x16xf32> to vector<24x16xbf16>
    %cst_23 = arith.constant dense<0.000000e+00> : vector<24x24xf32>
    %64 = tpu.matmul %62, %63, %cst_23 {dimension_numbers = #tpu.dot_dimension_numbers<[1], [1], [0], [0], [0, 0, 1, 0], [], []>} : vector<24x16xbf16>, vector<24x16xbf16>, vector<24x24xf32> -> vector<24x24xf32>
    %65 = tpu.transpose %61, [1, 0] : vector<24x1xf32> -> vector<1x24xf32>
    %66 = vector.broadcast %58 : vector<24x1xf32> to vector<24x24xf32>
    %67 = vector.broadcast %65 : vector<1x24xf32> to vector<24x24xf32>
    %68 = arith.addf %66, %67 : vector<24x24xf32>
    %cst_24 = arith.constant 2.000000e+00 : f32
    %69 = vector.broadcast %cst_24 : f32 to vector<24x24xf32>
    %70 = arith.mulf %69, %64 : vector<24x24xf32>
    %71 = arith.subf %68, %70 : vector<24x24xf32>
    %cst_25 = arith.constant 0.000000e+00 : f32
    %72 = vector.broadcast %cst_25 : f32 to vector<24x24xf32>
    %73 = arith.subf %72, %71 : vector<24x24xf32>
    %74 = vector.broadcast %14 : vector<1x24xf32> to vector<24x24xf32>
    %75 = arith.addf %73, %74 : vector<24x24xf32>
    %cst_26 = arith.constant dense<0xFF800000> : vector<24xf32>
    %76 = vector.multi_reduction <maximumf>, %75, %cst_26 [1] : vector<24x24xf32> to vector<24xf32>
    %77 = vector.shape_cast %76 : vector<24xf32> to vector<24x1xf32>
    %78 = vector.broadcast %77 : vector<24x1xf32> to vector<24x24xf32>
    %79 = arith.subf %75, %78 : vector<24x24xf32>
    %80 = math.exp %79 : vector<24x24xf32>
    %cst_27 = arith.constant dense<0.000000e+00> : vector<24xf32>
    %81 = vector.multi_reduction <add>, %80, %cst_27 [1] : vector<24x24xf32> to vector<24xf32>
    %82 = vector.shape_cast %81 : vector<24xf32> to vector<24x1xf32>
    %83 = tpu.reciprocal %82 {approx = true} : vector<24x1xf32> -> vector<24x1xf32>
    %84 = vector.broadcast %83 : vector<24x1xf32> to vector<24x24xf32>
    %85 = arith.mulf %80, %84 : vector<24x24xf32>
    %86 = arith.truncf %85 : vector<24x24xf32> to vector<24x24xbf16>
    %87 = arith.truncf %53 : vector<24x16xf32> to vector<24x16xbf16>
    %cst_28 = arith.constant dense<0.000000e+00> : vector<24x16xf32>
    %88 = tpu.matmul %86, %87, %cst_28 {dimension_numbers = #tpu.dot_dimension_numbers<[1], [0], [0], [1], [0, 0, 1, 1], [], []>} : vector<24x24xbf16>, vector<24x16xbf16>, vector<24x16xf32> -> vector<24x16xf32>
    %89 = vector.extract_strided_slice %50 {offsets = [0, 16], sizes = [24, 16], strides = [1, 1]} : vector<24x320xf32> to vector<24x16xf32>
    %90 = vector.extract_strided_slice %50 {offsets = [0, 80], sizes = [24, 16], strides = [1, 1]} : vector<24x320xf32> to vector<24x16xf32>
    %91 = vector.extract_strided_slice %50 {offsets = [0, 144], sizes = [24, 16], strides = [1, 1]} : vector<24x320xf32> to vector<24x16xf32>
    %92 = vector.extract_strided_slice %50 {offsets = [0, 208], sizes = [24, 16], strides = [1, 1]} : vector<24x320xf32> to vector<24x16xf32>
    %93 = vector.extract_strided_slice %50 {offsets = [0, 272], sizes = [24, 16], strides = [1, 1]} : vector<24x320xf32> to vector<24x16xf32>
    %94 = arith.mulf %89, %92 : vector<24x16xf32>
    %cst_29 = arith.constant dense<0.000000e+00> : vector<24xf32>
    %95 = vector.multi_reduction <add>, %94, %cst_29 [1] : vector<24x16xf32> to vector<24xf32>
    %96 = vector.shape_cast %95 : vector<24xf32> to vector<24x1xf32>
    %97 = arith.mulf %90, %93 : vector<24x16xf32>
    %cst_30 = arith.constant dense<0.000000e+00> : vector<24xf32>
    %98 = vector.multi_reduction <add>, %97, %cst_30 [1] : vector<24x16xf32> to vector<24xf32>
    %99 = vector.shape_cast %98 : vector<24xf32> to vector<24x1xf32>
    %100 = arith.truncf %92 : vector<24x16xf32> to vector<24x16xbf16>
    %101 = arith.truncf %90 : vector<24x16xf32> to vector<24x16xbf16>
    %cst_31 = arith.constant dense<0.000000e+00> : vector<24x24xf32>
    %102 = tpu.matmul %100, %101, %cst_31 {dimension_numbers = #tpu.dot_dimension_numbers<[1], [1], [0], [0], [0, 0, 1, 0], [], []>} : vector<24x16xbf16>, vector<24x16xbf16>, vector<24x24xf32> -> vector<24x24xf32>
    %103 = tpu.transpose %99, [1, 0] : vector<24x1xf32> -> vector<1x24xf32>
    %104 = vector.broadcast %96 : vector<24x1xf32> to vector<24x24xf32>
    %105 = vector.broadcast %103 : vector<1x24xf32> to vector<24x24xf32>
    %106 = arith.addf %104, %105 : vector<24x24xf32>
    %cst_32 = arith.constant 2.000000e+00 : f32
    %107 = vector.broadcast %cst_32 : f32 to vector<24x24xf32>
    %108 = arith.mulf %107, %102 : vector<24x24xf32>
    %109 = arith.subf %106, %108 : vector<24x24xf32>
    %cst_33 = arith.constant 0.000000e+00 : f32
    %110 = vector.broadcast %cst_33 : f32 to vector<24x24xf32>
    %111 = arith.subf %110, %109 : vector<24x24xf32>
    %112 = vector.broadcast %14 : vector<1x24xf32> to vector<24x24xf32>
    %113 = arith.addf %111, %112 : vector<24x24xf32>
    %cst_34 = arith.constant dense<0xFF800000> : vector<24xf32>
    %114 = vector.multi_reduction <maximumf>, %113, %cst_34 [1] : vector<24x24xf32> to vector<24xf32>
    %115 = vector.shape_cast %114 : vector<24xf32> to vector<24x1xf32>
    %116 = vector.broadcast %115 : vector<24x1xf32> to vector<24x24xf32>
    %117 = arith.subf %113, %116 : vector<24x24xf32>
    %118 = math.exp %117 : vector<24x24xf32>
    %cst_35 = arith.constant dense<0.000000e+00> : vector<24xf32>
    %119 = vector.multi_reduction <add>, %118, %cst_35 [1] : vector<24x24xf32> to vector<24xf32>
    %120 = vector.shape_cast %119 : vector<24xf32> to vector<24x1xf32>
    %121 = tpu.reciprocal %120 {approx = true} : vector<24x1xf32> -> vector<24x1xf32>
    %122 = vector.broadcast %121 : vector<24x1xf32> to vector<24x24xf32>
    %123 = arith.mulf %118, %122 : vector<24x24xf32>
    %124 = arith.truncf %123 : vector<24x24xf32> to vector<24x24xbf16>
    %125 = arith.truncf %91 : vector<24x16xf32> to vector<24x16xbf16>
    %cst_36 = arith.constant dense<0.000000e+00> : vector<24x16xf32>
    %126 = tpu.matmul %124, %125, %cst_36 {dimension_numbers = #tpu.dot_dimension_numbers<[1], [0], [0], [1], [0, 0, 1, 1], [], []>} : vector<24x24xbf16>, vector<24x16xbf16>, vector<24x16xf32> -> vector<24x16xf32>
    %127 = vector.extract_strided_slice %50 {offsets = [0, 32], sizes = [24, 16], strides = [1, 1]} : vector<24x320xf32> to vector<24x16xf32>
    %128 = vector.extract_strided_slice %50 {offsets = [0, 96], sizes = [24, 16], strides = [1, 1]} : vector<24x320xf32> to vector<24x16xf32>
    %129 = vector.extract_strided_slice %50 {offsets = [0, 160], sizes = [24, 16], strides = [1, 1]} : vector<24x320xf32> to vector<24x16xf32>
    %130 = vector.extract_strided_slice %50 {offsets = [0, 224], sizes = [24, 16], strides = [1, 1]} : vector<24x320xf32> to vector<24x16xf32>
    %131 = vector.extract_strided_slice %50 {offsets = [0, 288], sizes = [24, 16], strides = [1, 1]} : vector<24x320xf32> to vector<24x16xf32>
    %132 = arith.mulf %127, %130 : vector<24x16xf32>
    %cst_37 = arith.constant dense<0.000000e+00> : vector<24xf32>
    %133 = vector.multi_reduction <add>, %132, %cst_37 [1] : vector<24x16xf32> to vector<24xf32>
    %134 = vector.shape_cast %133 : vector<24xf32> to vector<24x1xf32>
    %135 = arith.mulf %128, %131 : vector<24x16xf32>
    %cst_38 = arith.constant dense<0.000000e+00> : vector<24xf32>
    %136 = vector.multi_reduction <add>, %135, %cst_38 [1] : vector<24x16xf32> to vector<24xf32>
    %137 = vector.shape_cast %136 : vector<24xf32> to vector<24x1xf32>
    %138 = arith.truncf %130 : vector<24x16xf32> to vector<24x16xbf16>
    %139 = arith.truncf %128 : vector<24x16xf32> to vector<24x16xbf16>
    %cst_39 = arith.constant dense<0.000000e+00> : vector<24x24xf32>
    %140 = tpu.matmul %138, %139, %cst_39 {dimension_numbers = #tpu.dot_dimension_numbers<[1], [1], [0], [0], [0, 0, 1, 0], [], []>} : vector<24x16xbf16>, vector<24x16xbf16>, vector<24x24xf32> -> vector<24x24xf32>
    %141 = tpu.transpose %137, [1, 0] : vector<24x1xf32> -> vector<1x24xf32>
    %142 = vector.broadcast %134 : vector<24x1xf32> to vector<24x24xf32>
    %143 = vector.broadcast %141 : vector<1x24xf32> to vector<24x24xf32>
    %144 = arith.addf %142, %143 : vector<24x24xf32>
    %cst_40 = arith.constant 2.000000e+00 : f32
    %145 = vector.broadcast %cst_40 : f32 to vector<24x24xf32>
    %146 = arith.mulf %145, %140 : vector<24x24xf32>
    %147 = arith.subf %144, %146 : vector<24x24xf32>
    %cst_41 = arith.constant 0.000000e+00 : f32
    %148 = vector.broadcast %cst_41 : f32 to vector<24x24xf32>
    %149 = arith.subf %148, %147 : vector<24x24xf32>
    %150 = vector.broadcast %14 : vector<1x24xf32> to vector<24x24xf32>
    %151 = arith.addf %149, %150 : vector<24x24xf32>
    %cst_42 = arith.constant dense<0xFF800000> : vector<24xf32>
    %152 = vector.multi_reduction <maximumf>, %151, %cst_42 [1] : vector<24x24xf32> to vector<24xf32>
    %153 = vector.shape_cast %152 : vector<24xf32> to vector<24x1xf32>
    %154 = vector.broadcast %153 : vector<24x1xf32> to vector<24x24xf32>
    %155 = arith.subf %151, %154 : vector<24x24xf32>
    %156 = math.exp %155 : vector<24x24xf32>
    %cst_43 = arith.constant dense<0.000000e+00> : vector<24xf32>
    %157 = vector.multi_reduction <add>, %156, %cst_43 [1] : vector<24x24xf32> to vector<24xf32>
    %158 = vector.shape_cast %157 : vector<24xf32> to vector<24x1xf32>
    %159 = tpu.reciprocal %158 {approx = true} : vector<24x1xf32> -> vector<24x1xf32>
    %160 = vector.broadcast %159 : vector<24x1xf32> to vector<24x24xf32>
    %161 = arith.mulf %156, %160 : vector<24x24xf32>
    %162 = arith.truncf %161 : vector<24x24xf32> to vector<24x24xbf16>
    %163 = arith.truncf %129 : vector<24x16xf32> to vector<24x16xbf16>
    %cst_44 = arith.constant dense<0.000000e+00> : vector<24x16xf32>
    %164 = tpu.matmul %162, %163, %cst_44 {dimension_numbers = #tpu.dot_dimension_numbers<[1], [0], [0], [1], [0, 0, 1, 1], [], []>} : vector<24x24xbf16>, vector<24x16xbf16>, vector<24x16xf32> -> vector<24x16xf32>
    %165 = vector.extract_strided_slice %50 {offsets = [0, 48], sizes = [24, 16], strides = [1, 1]} : vector<24x320xf32> to vector<24x16xf32>
    %166 = vector.extract_strided_slice %50 {offsets = [0, 112], sizes = [24, 16], strides = [1, 1]} : vector<24x320xf32> to vector<24x16xf32>
    %167 = vector.extract_strided_slice %50 {offsets = [0, 176], sizes = [24, 16], strides = [1, 1]} : vector<24x320xf32> to vector<24x16xf32>
    %168 = vector.extract_strided_slice %50 {offsets = [0, 240], sizes = [24, 16], strides = [1, 1]} : vector<24x320xf32> to vector<24x16xf32>
    %169 = vector.extract_strided_slice %50 {offsets = [0, 304], sizes = [24, 16], strides = [1, 1]} : vector<24x320xf32> to vector<24x16xf32>
    %170 = arith.mulf %165, %168 : vector<24x16xf32>
    %cst_45 = arith.constant dense<0.000000e+00> : vector<24xf32>
    %171 = vector.multi_reduction <add>, %170, %cst_45 [1] : vector<24x16xf32> to vector<24xf32>
    %172 = vector.shape_cast %171 : vector<24xf32> to vector<24x1xf32>
    %173 = arith.mulf %166, %169 : vector<24x16xf32>
    %cst_46 = arith.constant dense<0.000000e+00> : vector<24xf32>
    %174 = vector.multi_reduction <add>, %173, %cst_46 [1] : vector<24x16xf32> to vector<24xf32>
    %175 = vector.shape_cast %174 : vector<24xf32> to vector<24x1xf32>
    %176 = arith.truncf %168 : vector<24x16xf32> to vector<24x16xbf16>
    %177 = arith.truncf %166 : vector<24x16xf32> to vector<24x16xbf16>
    %cst_47 = arith.constant dense<0.000000e+00> : vector<24x24xf32>
    %178 = tpu.matmul %176, %177, %cst_47 {dimension_numbers = #tpu.dot_dimension_numbers<[1], [1], [0], [0], [0, 0, 1, 0], [], []>} : vector<24x16xbf16>, vector<24x16xbf16>, vector<24x24xf32> -> vector<24x24xf32>
    %179 = tpu.transpose %175, [1, 0] : vector<24x1xf32> -> vector<1x24xf32>
    %180 = vector.broadcast %172 : vector<24x1xf32> to vector<24x24xf32>
    %181 = vector.broadcast %179 : vector<1x24xf32> to vector<24x24xf32>
    %182 = arith.addf %180, %181 : vector<24x24xf32>
    %cst_48 = arith.constant 2.000000e+00 : f32
    %183 = vector.broadcast %cst_48 : f32 to vector<24x24xf32>
    %184 = arith.mulf %183, %178 : vector<24x24xf32>
    %185 = arith.subf %182, %184 : vector<24x24xf32>
    %cst_49 = arith.constant 0.000000e+00 : f32
    %186 = vector.broadcast %cst_49 : f32 to vector<24x24xf32>
    %187 = arith.subf %186, %185 : vector<24x24xf32>
    %188 = vector.broadcast %14 : vector<1x24xf32> to vector<24x24xf32>
    %189 = arith.addf %187, %188 : vector<24x24xf32>
    %cst_50 = arith.constant dense<0xFF800000> : vector<24xf32>
    %190 = vector.multi_reduction <maximumf>, %189, %cst_50 [1] : vector<24x24xf32> to vector<24xf32>
    %191 = vector.shape_cast %190 : vector<24xf32> to vector<24x1xf32>
    %192 = vector.broadcast %191 : vector<24x1xf32> to vector<24x24xf32>
    %193 = arith.subf %189, %192 : vector<24x24xf32>
    %194 = math.exp %193 : vector<24x24xf32>
    %cst_51 = arith.constant dense<0.000000e+00> : vector<24xf32>
    %195 = vector.multi_reduction <add>, %194, %cst_51 [1] : vector<24x24xf32> to vector<24xf32>
    %196 = vector.shape_cast %195 : vector<24xf32> to vector<24x1xf32>
    %197 = tpu.reciprocal %196 {approx = true} : vector<24x1xf32> -> vector<24x1xf32>
    %198 = vector.broadcast %197 : vector<24x1xf32> to vector<24x24xf32>
    %199 = arith.mulf %194, %198 : vector<24x24xf32>
    %200 = arith.truncf %199 : vector<24x24xf32> to vector<24x24xbf16>
    %201 = arith.truncf %167 : vector<24x16xf32> to vector<24x16xbf16>
    %cst_52 = arith.constant dense<0.000000e+00> : vector<24x16xf32>
    %202 = tpu.matmul %200, %201, %cst_52 {dimension_numbers = #tpu.dot_dimension_numbers<[1], [0], [0], [1], [0, 0, 1, 1], [], []>} : vector<24x24xbf16>, vector<24x16xbf16>, vector<24x16xf32> -> vector<24x16xf32>
    %203 = tpu.concatenate %88, %126, %164, %202 in 1 : vector<24x16xf32>, vector<24x16xf32>, vector<24x16xf32>, vector<24x16xf32> -> vector<24x64xf32>
    %204 = arith.truncf %203 : vector<24x64xf32> to vector<24x64xbf16>
    %c0_53 = arith.constant 0 : index
    %c0_54 = arith.constant 0 : index
    %c0_55 = arith.constant 0 : index
    %205 = vector.load %arg5[%c0_53, %c0_54, %c0_55] : memref<2x64x64xbf16, #tpu.memory_space<vmem>>, vector<1x64x64xbf16>
    %206 = vector.shape_cast %205 : vector<1x64x64xbf16> to vector<64x64xbf16>
    %cst_56 = arith.constant dense<0.000000e+00> : vector<24x64xf32>
    %207 = tpu.matmul %204, %206, %cst_56 {dimension_numbers = #tpu.dot_dimension_numbers<[1], [0], [0], [1], [0, 0, 1, 1], [], []>} : vector<24x64xbf16>, vector<64x64xbf16>, vector<24x64xf32> -> vector<24x64xf32>
    %208 = arith.addf %8, %207 : vector<24x64xf32>
    %209 = vector.broadcast %21 : vector<1x64xf32> to vector<24x64xf32>
    %210 = arith.addf %208, %209 : vector<24x64xf32>
    %cst_57 = arith.constant dense<0.000000e+00> : vector<24xf32>
    %211 = vector.multi_reduction <add>, %210, %cst_57 [1] : vector<24x64xf32> to vector<24xf32>
    %212 = vector.shape_cast %211 : vector<24xf32> to vector<24x1xf32>
    %cst_58 = arith.constant 6.400000e+01 : f32
    %213 = vector.broadcast %cst_58 : f32 to vector<24x1xf32>
    %214 = arith.divf %212, %213 : vector<24x1xf32>
    %215 = vector.broadcast %214 : vector<24x1xf32> to vector<24x64xf32>
    %216 = arith.subf %210, %215 : vector<24x64xf32>
    %217 = arith.mulf %216, %216 : vector<24x64xf32>
    %cst_59 = arith.constant dense<0.000000e+00> : vector<24xf32>
    %218 = vector.multi_reduction <add>, %217, %cst_59 [1] : vector<24x64xf32> to vector<24xf32>
    %219 = vector.shape_cast %218 : vector<24xf32> to vector<24x1xf32>
    %cst_60 = arith.constant 6.400000e+01 : f32
    %220 = vector.broadcast %cst_60 : f32 to vector<24x1xf32>
    %221 = arith.divf %219, %220 : vector<24x1xf32>
    %222 = vector.broadcast %214 : vector<24x1xf32> to vector<24x64xf32>
    %223 = arith.subf %210, %222 : vector<24x64xf32>
    %cst_61 = arith.constant 9.99999974E-6 : f32
    %224 = vector.broadcast %cst_61 : f32 to vector<24x1xf32>
    %225 = arith.addf %221, %224 : vector<24x1xf32>
    %226 = math.rsqrt %225 : vector<24x1xf32>
    %227 = vector.broadcast %226 : vector<24x1xf32> to vector<24x64xf32>
    %228 = arith.mulf %223, %227 : vector<24x64xf32>
    %229 = vector.broadcast %19 : vector<1x64xf32> to vector<24x64xf32>
    %230 = arith.mulf %228, %229 : vector<24x64xf32>
    %231 = vector.broadcast %20 : vector<1x64xf32> to vector<24x64xf32>
    %232 = arith.addf %230, %231 : vector<24x64xf32>
    %233 = arith.truncf %232 : vector<24x64xf32> to vector<24x64xbf16>
    %c0_62 = arith.constant 0 : index
    %c0_63 = arith.constant 0 : index
    %c0_64 = arith.constant 0 : index
    %234 = vector.load %arg6[%c0_62, %c0_63, %c0_64] : memref<2x64x128xbf16, #tpu.memory_space<vmem>>, vector<1x64x128xbf16>
    %235 = vector.shape_cast %234 : vector<1x64x128xbf16> to vector<64x128xbf16>
    %cst_65 = arith.constant dense<0.000000e+00> : vector<24x128xf32>
    %236 = tpu.matmul %233, %235, %cst_65 {dimension_numbers = #tpu.dot_dimension_numbers<[1], [0], [0], [1], [0, 0, 1, 1], [], []>} : vector<24x64xbf16>, vector<64x128xbf16>, vector<24x128xf32> -> vector<24x128xf32>
    %237 = vector.extract_strided_slice %236 {offsets = [0, 0], sizes = [24, 64], strides = [1, 1]} : vector<24x128xf32> to vector<24x64xf32>
    %238 = vector.extract_strided_slice %236 {offsets = [0, 64], sizes = [24, 64], strides = [1, 1]} : vector<24x128xf32> to vector<24x64xf32>
    %239 = arith.mulf %232, %237 : vector<24x64xf32>
    %cst_66 = arith.constant dense<0.000000e+00> : vector<24xf32>
    %240 = vector.multi_reduction <add>, %239, %cst_66 [1] : vector<24x64xf32> to vector<24xf32>
    %241 = vector.shape_cast %240 : vector<24xf32> to vector<24x1xf32>
    %242 = vector.broadcast %241 : vector<24x1xf32> to vector<24x64xf32>
    %243 = vector.broadcast %24 : vector<1x64xf32> to vector<24x64xf32>
    %244 = arith.addf %242, %243 : vector<24x64xf32>
    %cst_67 = arith.constant 2.000000e+00 : f32
    %245 = vector.broadcast %cst_67 : f32 to vector<24x64xf32>
    %246 = arith.mulf %245, %238 : vector<24x64xf32>
    %247 = arith.subf %244, %246 : vector<24x64xf32>
    %cst_68 = arith.constant 0.000000e+00 : f32
    %248 = vector.broadcast %cst_68 : f32 to vector<1x64xf32>
    %249 = arith.subf %248, %23 : vector<1x64xf32>
    %250 = vector.broadcast %249 : vector<1x64xf32> to vector<24x64xf32>
    %251 = arith.mulf %250, %247 : vector<24x64xf32>
    %252 = math.exp %251 : vector<24x64xf32>
    %253 = arith.truncf %252 : vector<24x64xf32> to vector<24x64xbf16>
    %c0_69 = arith.constant 0 : index
    %c0_70 = arith.constant 0 : index
    %c0_71 = arith.constant 0 : index
    %254 = vector.load %arg7[%c0_69, %c0_70, %c0_71] : memref<2x64x64xbf16, #tpu.memory_space<vmem>>, vector<1x64x64xbf16>
    %255 = vector.shape_cast %254 : vector<1x64x64xbf16> to vector<64x64xbf16>
    %cst_72 = arith.constant dense<0.000000e+00> : vector<24x64xf32>
    %256 = tpu.matmul %253, %255, %cst_72 {dimension_numbers = #tpu.dot_dimension_numbers<[1], [0], [0], [1], [0, 0, 1, 1], [], []>} : vector<24x64xbf16>, vector<64x64xbf16>, vector<24x64xf32> -> vector<24x64xf32>
    %257 = arith.addf %210, %256 : vector<24x64xf32>
    %258 = vector.broadcast %22 : vector<1x64xf32> to vector<24x64xf32>
    %259 = arith.addf %257, %258 : vector<24x64xf32>
    %c1 = arith.constant 1 : index
    %c0_73 = arith.constant 0 : index
    %c0_74 = arith.constant 0 : index
    %260 = vector.load %arg8[%c1, %c0_73, %c0_74] : memref<2x8x64xf32, #tpu.memory_space<vmem>>, vector<1x8x64xf32>
    %261 = vector.shape_cast %260 : vector<1x8x64xf32> to vector<8x64xf32>
    %262 = vector.extract_strided_slice %261 {offsets = [0, 0], sizes = [1, 64], strides = [1, 1]} : vector<8x64xf32> to vector<1x64xf32>
    %263 = vector.extract_strided_slice %261 {offsets = [1, 0], sizes = [1, 64], strides = [1, 1]} : vector<8x64xf32> to vector<1x64xf32>
    %264 = vector.extract_strided_slice %261 {offsets = [2, 0], sizes = [1, 64], strides = [1, 1]} : vector<8x64xf32> to vector<1x64xf32>
    %265 = vector.extract_strided_slice %261 {offsets = [3, 0], sizes = [1, 64], strides = [1, 1]} : vector<8x64xf32> to vector<1x64xf32>
    %266 = vector.extract_strided_slice %261 {offsets = [4, 0], sizes = [1, 64], strides = [1, 1]} : vector<8x64xf32> to vector<1x64xf32>
    %267 = vector.extract_strided_slice %261 {offsets = [5, 0], sizes = [1, 64], strides = [1, 1]} : vector<8x64xf32> to vector<1x64xf32>
    %268 = vector.extract_strided_slice %261 {offsets = [6, 0], sizes = [1, 64], strides = [1, 1]} : vector<8x64xf32> to vector<1x64xf32>
    %269 = vector.extract_strided_slice %261 {offsets = [7, 0], sizes = [1, 64], strides = [1, 1]} : vector<8x64xf32> to vector<1x64xf32>
    %cst_75 = arith.constant dense<0.000000e+00> : vector<24xf32>
    %270 = vector.multi_reduction <add>, %259, %cst_75 [1] : vector<24x64xf32> to vector<24xf32>
    %271 = vector.shape_cast %270 : vector<24xf32> to vector<24x1xf32>
    %cst_76 = arith.constant 6.400000e+01 : f32
    %272 = vector.broadcast %cst_76 : f32 to vector<24x1xf32>
    %273 = arith.divf %271, %272 : vector<24x1xf32>
    %274 = vector.broadcast %273 : vector<24x1xf32> to vector<24x64xf32>
    %275 = arith.subf %259, %274 : vector<24x64xf32>
    %276 = arith.mulf %275, %275 : vector<24x64xf32>
    %cst_77 = arith.constant dense<0.000000e+00> : vector<24xf32>
    %277 = vector.multi_reduction <add>, %276, %cst_77 [1] : vector<24x64xf32> to vector<24xf32>
    %278 = vector.shape_cast %277 : vector<24xf32> to vector<24x1xf32>
    %cst_78 = arith.constant 6.400000e+01 : f32
    %279 = vector.broadcast %cst_78 : f32 to vector<24x1xf32>
    %280 = arith.divf %278, %279 : vector<24x1xf32>
    %281 = vector.broadcast %273 : vector<24x1xf32> to vector<24x64xf32>
    %282 = arith.subf %259, %281 : vector<24x64xf32>
    %cst_79 = arith.constant 9.99999974E-6 : f32
    %283 = vector.broadcast %cst_79 : f32 to vector<24x1xf32>
    %284 = arith.addf %280, %283 : vector<24x1xf32>
    %285 = math.rsqrt %284 : vector<24x1xf32>
    %286 = vector.broadcast %285 : vector<24x1xf32> to vector<24x64xf32>
    %287 = arith.mulf %282, %286 : vector<24x64xf32>
    %288 = vector.broadcast %262 : vector<1x64xf32> to vector<24x64xf32>
    %289 = arith.mulf %287, %288 : vector<24x64xf32>
    %290 = vector.broadcast %263 : vector<1x64xf32> to vector<24x64xf32>
    %291 = arith.addf %289, %290 : vector<24x64xf32>
    %292 = arith.truncf %291 : vector<24x64xf32> to vector<24x64xbf16>
    %c1_80 = arith.constant 1 : index
    %c0_81 = arith.constant 0 : index
    %c0_82 = arith.constant 0 : index
    %293 = vector.load %arg4[%c1_80, %c0_81, %c0_82] : memref<2x64x320xbf16, #tpu.memory_space<vmem>>, vector<1x64x320xbf16>
    %294 = vector.shape_cast %293 : vector<1x64x320xbf16> to vector<64x320xbf16>
    %cst_83 = arith.constant dense<0.000000e+00> : vector<24x320xf32>
    %295 = tpu.matmul %292, %294, %cst_83 {dimension_numbers = #tpu.dot_dimension_numbers<[1], [0], [0], [1], [0, 0, 1, 1], [], []>} : vector<24x64xbf16>, vector<64x320xbf16>, vector<24x320xf32> -> vector<24x320xf32>
    %296 = vector.extract_strided_slice %295 {offsets = [0, 0], sizes = [24, 16], strides = [1, 1]} : vector<24x320xf32> to vector<24x16xf32>
    %297 = vector.extract_strided_slice %295 {offsets = [0, 64], sizes = [24, 16], strides = [1, 1]} : vector<24x320xf32> to vector<24x16xf32>
    %298 = vector.extract_strided_slice %295 {offsets = [0, 128], sizes = [24, 16], strides = [1, 1]} : vector<24x320xf32> to vector<24x16xf32>
    %299 = vector.extract_strided_slice %295 {offsets = [0, 192], sizes = [24, 16], strides = [1, 1]} : vector<24x320xf32> to vector<24x16xf32>
    %300 = vector.extract_strided_slice %295 {offsets = [0, 256], sizes = [24, 16], strides = [1, 1]} : vector<24x320xf32> to vector<24x16xf32>
    %301 = arith.mulf %296, %299 : vector<24x16xf32>
    %cst_84 = arith.constant dense<0.000000e+00> : vector<24xf32>
    %302 = vector.multi_reduction <add>, %301, %cst_84 [1] : vector<24x16xf32> to vector<24xf32>
    %303 = vector.shape_cast %302 : vector<24xf32> to vector<24x1xf32>
    %304 = arith.mulf %297, %300 : vector<24x16xf32>
    %cst_85 = arith.constant dense<0.000000e+00> : vector<24xf32>
    %305 = vector.multi_reduction <add>, %304, %cst_85 [1] : vector<24x16xf32> to vector<24xf32>
    %306 = vector.shape_cast %305 : vector<24xf32> to vector<24x1xf32>
    %307 = arith.truncf %299 : vector<24x16xf32> to vector<24x16xbf16>
    %308 = arith.truncf %297 : vector<24x16xf32> to vector<24x16xbf16>
    %cst_86 = arith.constant dense<0.000000e+00> : vector<24x24xf32>
    %309 = tpu.matmul %307, %308, %cst_86 {dimension_numbers = #tpu.dot_dimension_numbers<[1], [1], [0], [0], [0, 0, 1, 0], [], []>} : vector<24x16xbf16>, vector<24x16xbf16>, vector<24x24xf32> -> vector<24x24xf32>
    %310 = tpu.transpose %306, [1, 0] : vector<24x1xf32> -> vector<1x24xf32>
    %311 = vector.broadcast %303 : vector<24x1xf32> to vector<24x24xf32>
    %312 = vector.broadcast %310 : vector<1x24xf32> to vector<24x24xf32>
    %313 = arith.addf %311, %312 : vector<24x24xf32>
    %cst_87 = arith.constant 2.000000e+00 : f32
    %314 = vector.broadcast %cst_87 : f32 to vector<24x24xf32>
    %315 = arith.mulf %314, %309 : vector<24x24xf32>
    %316 = arith.subf %313, %315 : vector<24x24xf32>
    %cst_88 = arith.constant 0.000000e+00 : f32
    %317 = vector.broadcast %cst_88 : f32 to vector<24x24xf32>
    %318 = arith.subf %317, %316 : vector<24x24xf32>
    %319 = vector.broadcast %14 : vector<1x24xf32> to vector<24x24xf32>
    %320 = arith.addf %318, %319 : vector<24x24xf32>
    %cst_89 = arith.constant dense<0xFF800000> : vector<24xf32>
    %321 = vector.multi_reduction <maximumf>, %320, %cst_89 [1] : vector<24x24xf32> to vector<24xf32>
    %322 = vector.shape_cast %321 : vector<24xf32> to vector<24x1xf32>
    %323 = vector.broadcast %322 : vector<24x1xf32> to vector<24x24xf32>
    %324 = arith.subf %320, %323 : vector<24x24xf32>
    %325 = math.exp %324 : vector<24x24xf32>
    %cst_90 = arith.constant dense<0.000000e+00> : vector<24xf32>
    %326 = vector.multi_reduction <add>, %325, %cst_90 [1] : vector<24x24xf32> to vector<24xf32>
    %327 = vector.shape_cast %326 : vector<24xf32> to vector<24x1xf32>
    %328 = tpu.reciprocal %327 {approx = true} : vector<24x1xf32> -> vector<24x1xf32>
    %329 = vector.broadcast %328 : vector<24x1xf32> to vector<24x24xf32>
    %330 = arith.mulf %325, %329 : vector<24x24xf32>
    %331 = arith.truncf %330 : vector<24x24xf32> to vector<24x24xbf16>
    %332 = arith.truncf %298 : vector<24x16xf32> to vector<24x16xbf16>
    %cst_91 = arith.constant dense<0.000000e+00> : vector<24x16xf32>
    %333 = tpu.matmul %331, %332, %cst_91 {dimension_numbers = #tpu.dot_dimension_numbers<[1], [0], [0], [1], [0, 0, 1, 1], [], []>} : vector<24x24xbf16>, vector<24x16xbf16>, vector<24x16xf32> -> vector<24x16xf32>
    %334 = vector.extract_strided_slice %295 {offsets = [0, 16], sizes = [24, 16], strides = [1, 1]} : vector<24x320xf32> to vector<24x16xf32>
    %335 = vector.extract_strided_slice %295 {offsets = [0, 80], sizes = [24, 16], strides = [1, 1]} : vector<24x320xf32> to vector<24x16xf32>
    %336 = vector.extract_strided_slice %295 {offsets = [0, 144], sizes = [24, 16], strides = [1, 1]} : vector<24x320xf32> to vector<24x16xf32>
    %337 = vector.extract_strided_slice %295 {offsets = [0, 208], sizes = [24, 16], strides = [1, 1]} : vector<24x320xf32> to vector<24x16xf32>
    %338 = vector.extract_strided_slice %295 {offsets = [0, 272], sizes = [24, 16], strides = [1, 1]} : vector<24x320xf32> to vector<24x16xf32>
    %339 = arith.mulf %334, %337 : vector<24x16xf32>
    %cst_92 = arith.constant dense<0.000000e+00> : vector<24xf32>
    %340 = vector.multi_reduction <add>, %339, %cst_92 [1] : vector<24x16xf32> to vector<24xf32>
    %341 = vector.shape_cast %340 : vector<24xf32> to vector<24x1xf32>
    %342 = arith.mulf %335, %338 : vector<24x16xf32>
    %cst_93 = arith.constant dense<0.000000e+00> : vector<24xf32>
    %343 = vector.multi_reduction <add>, %342, %cst_93 [1] : vector<24x16xf32> to vector<24xf32>
    %344 = vector.shape_cast %343 : vector<24xf32> to vector<24x1xf32>
    %345 = arith.truncf %337 : vector<24x16xf32> to vector<24x16xbf16>
    %346 = arith.truncf %335 : vector<24x16xf32> to vector<24x16xbf16>
    %cst_94 = arith.constant dense<0.000000e+00> : vector<24x24xf32>
    %347 = tpu.matmul %345, %346, %cst_94 {dimension_numbers = #tpu.dot_dimension_numbers<[1], [1], [0], [0], [0, 0, 1, 0], [], []>} : vector<24x16xbf16>, vector<24x16xbf16>, vector<24x24xf32> -> vector<24x24xf32>
    %348 = tpu.transpose %344, [1, 0] : vector<24x1xf32> -> vector<1x24xf32>
    %349 = vector.broadcast %341 : vector<24x1xf32> to vector<24x24xf32>
    %350 = vector.broadcast %348 : vector<1x24xf32> to vector<24x24xf32>
    %351 = arith.addf %349, %350 : vector<24x24xf32>
    %cst_95 = arith.constant 2.000000e+00 : f32
    %352 = vector.broadcast %cst_95 : f32 to vector<24x24xf32>
    %353 = arith.mulf %352, %347 : vector<24x24xf32>
    %354 = arith.subf %351, %353 : vector<24x24xf32>
    %cst_96 = arith.constant 0.000000e+00 : f32
    %355 = vector.broadcast %cst_96 : f32 to vector<24x24xf32>
    %356 = arith.subf %355, %354 : vector<24x24xf32>
    %357 = vector.broadcast %14 : vector<1x24xf32> to vector<24x24xf32>
    %358 = arith.addf %356, %357 : vector<24x24xf32>
    %cst_97 = arith.constant dense<0xFF800000> : vector<24xf32>
    %359 = vector.multi_reduction <maximumf>, %358, %cst_97 [1] : vector<24x24xf32> to vector<24xf32>
    %360 = vector.shape_cast %359 : vector<24xf32> to vector<24x1xf32>
    %361 = vector.broadcast %360 : vector<24x1xf32> to vector<24x24xf32>
    %362 = arith.subf %358, %361 : vector<24x24xf32>
    %363 = math.exp %362 : vector<24x24xf32>
    %cst_98 = arith.constant dense<0.000000e+00> : vector<24xf32>
    %364 = vector.multi_reduction <add>, %363, %cst_98 [1] : vector<24x24xf32> to vector<24xf32>
    %365 = vector.shape_cast %364 : vector<24xf32> to vector<24x1xf32>
    %366 = tpu.reciprocal %365 {approx = true} : vector<24x1xf32> -> vector<24x1xf32>
    %367 = vector.broadcast %366 : vector<24x1xf32> to vector<24x24xf32>
    %368 = arith.mulf %363, %367 : vector<24x24xf32>
    %369 = arith.truncf %368 : vector<24x24xf32> to vector<24x24xbf16>
    %370 = arith.truncf %336 : vector<24x16xf32> to vector<24x16xbf16>
    %cst_99 = arith.constant dense<0.000000e+00> : vector<24x16xf32>
    %371 = tpu.matmul %369, %370, %cst_99 {dimension_numbers = #tpu.dot_dimension_numbers<[1], [0], [0], [1], [0, 0, 1, 1], [], []>} : vector<24x24xbf16>, vector<24x16xbf16>, vector<24x16xf32> -> vector<24x16xf32>
    %372 = vector.extract_strided_slice %295 {offsets = [0, 32], sizes = [24, 16], strides = [1, 1]} : vector<24x320xf32> to vector<24x16xf32>
    %373 = vector.extract_strided_slice %295 {offsets = [0, 96], sizes = [24, 16], strides = [1, 1]} : vector<24x320xf32> to vector<24x16xf32>
    %374 = vector.extract_strided_slice %295 {offsets = [0, 160], sizes = [24, 16], strides = [1, 1]} : vector<24x320xf32> to vector<24x16xf32>
    %375 = vector.extract_strided_slice %295 {offsets = [0, 224], sizes = [24, 16], strides = [1, 1]} : vector<24x320xf32> to vector<24x16xf32>
    %376 = vector.extract_strided_slice %295 {offsets = [0, 288], sizes = [24, 16], strides = [1, 1]} : vector<24x320xf32> to vector<24x16xf32>
    %377 = arith.mulf %372, %375 : vector<24x16xf32>
    %cst_100 = arith.constant dense<0.000000e+00> : vector<24xf32>
    %378 = vector.multi_reduction <add>, %377, %cst_100 [1] : vector<24x16xf32> to vector<24xf32>
    %379 = vector.shape_cast %378 : vector<24xf32> to vector<24x1xf32>
    %380 = arith.mulf %373, %376 : vector<24x16xf32>
    %cst_101 = arith.constant dense<0.000000e+00> : vector<24xf32>
    %381 = vector.multi_reduction <add>, %380, %cst_101 [1] : vector<24x16xf32> to vector<24xf32>
    %382 = vector.shape_cast %381 : vector<24xf32> to vector<24x1xf32>
    %383 = arith.truncf %375 : vector<24x16xf32> to vector<24x16xbf16>
    %384 = arith.truncf %373 : vector<24x16xf32> to vector<24x16xbf16>
    %cst_102 = arith.constant dense<0.000000e+00> : vector<24x24xf32>
    %385 = tpu.matmul %383, %384, %cst_102 {dimension_numbers = #tpu.dot_dimension_numbers<[1], [1], [0], [0], [0, 0, 1, 0], [], []>} : vector<24x16xbf16>, vector<24x16xbf16>, vector<24x24xf32> -> vector<24x24xf32>
    %386 = tpu.transpose %382, [1, 0] : vector<24x1xf32> -> vector<1x24xf32>
    %387 = vector.broadcast %379 : vector<24x1xf32> to vector<24x24xf32>
    %388 = vector.broadcast %386 : vector<1x24xf32> to vector<24x24xf32>
    %389 = arith.addf %387, %388 : vector<24x24xf32>
    %cst_103 = arith.constant 2.000000e+00 : f32
    %390 = vector.broadcast %cst_103 : f32 to vector<24x24xf32>
    %391 = arith.mulf %390, %385 : vector<24x24xf32>
    %392 = arith.subf %389, %391 : vector<24x24xf32>
    %cst_104 = arith.constant 0.000000e+00 : f32
    %393 = vector.broadcast %cst_104 : f32 to vector<24x24xf32>
    %394 = arith.subf %393, %392 : vector<24x24xf32>
    %395 = vector.broadcast %14 : vector<1x24xf32> to vector<24x24xf32>
    %396 = arith.addf %394, %395 : vector<24x24xf32>
    %cst_105 = arith.constant dense<0xFF800000> : vector<24xf32>
    %397 = vector.multi_reduction <maximumf>, %396, %cst_105 [1] : vector<24x24xf32> to vector<24xf32>
    %398 = vector.shape_cast %397 : vector<24xf32> to vector<24x1xf32>
    %399 = vector.broadcast %398 : vector<24x1xf32> to vector<24x24xf32>
    %400 = arith.subf %396, %399 : vector<24x24xf32>
    %401 = math.exp %400 : vector<24x24xf32>
    %cst_106 = arith.constant dense<0.000000e+00> : vector<24xf32>
    %402 = vector.multi_reduction <add>, %401, %cst_106 [1] : vector<24x24xf32> to vector<24xf32>
    %403 = vector.shape_cast %402 : vector<24xf32> to vector<24x1xf32>
    %404 = tpu.reciprocal %403 {approx = true} : vector<24x1xf32> -> vector<24x1xf32>
    %405 = vector.broadcast %404 : vector<24x1xf32> to vector<24x24xf32>
    %406 = arith.mulf %401, %405 : vector<24x24xf32>
    %407 = arith.truncf %406 : vector<24x24xf32> to vector<24x24xbf16>
    %408 = arith.truncf %374 : vector<24x16xf32> to vector<24x16xbf16>
    %cst_107 = arith.constant dense<0.000000e+00> : vector<24x16xf32>
    %409 = tpu.matmul %407, %408, %cst_107 {dimension_numbers = #tpu.dot_dimension_numbers<[1], [0], [0], [1], [0, 0, 1, 1], [], []>} : vector<24x24xbf16>, vector<24x16xbf16>, vector<24x16xf32> -> vector<24x16xf32>
    %410 = vector.extract_strided_slice %295 {offsets = [0, 48], sizes = [24, 16], strides = [1, 1]} : vector<24x320xf32> to vector<24x16xf32>
    %411 = vector.extract_strided_slice %295 {offsets = [0, 112], sizes = [24, 16], strides = [1, 1]} : vector<24x320xf32> to vector<24x16xf32>
    %412 = vector.extract_strided_slice %295 {offsets = [0, 176], sizes = [24, 16], strides = [1, 1]} : vector<24x320xf32> to vector<24x16xf32>
    %413 = vector.extract_strided_slice %295 {offsets = [0, 240], sizes = [24, 16], strides = [1, 1]} : vector<24x320xf32> to vector<24x16xf32>
    %414 = vector.extract_strided_slice %295 {offsets = [0, 304], sizes = [24, 16], strides = [1, 1]} : vector<24x320xf32> to vector<24x16xf32>
    %415 = arith.mulf %410, %413 : vector<24x16xf32>
    %cst_108 = arith.constant dense<0.000000e+00> : vector<24xf32>
    %416 = vector.multi_reduction <add>, %415, %cst_108 [1] : vector<24x16xf32> to vector<24xf32>
    %417 = vector.shape_cast %416 : vector<24xf32> to vector<24x1xf32>
    %418 = arith.mulf %411, %414 : vector<24x16xf32>
    %cst_109 = arith.constant dense<0.000000e+00> : vector<24xf32>
    %419 = vector.multi_reduction <add>, %418, %cst_109 [1] : vector<24x16xf32> to vector<24xf32>
    %420 = vector.shape_cast %419 : vector<24xf32> to vector<24x1xf32>
    %421 = arith.truncf %413 : vector<24x16xf32> to vector<24x16xbf16>
    %422 = arith.truncf %411 : vector<24x16xf32> to vector<24x16xbf16>
    %cst_110 = arith.constant dense<0.000000e+00> : vector<24x24xf32>
    %423 = tpu.matmul %421, %422, %cst_110 {dimension_numbers = #tpu.dot_dimension_numbers<[1], [1], [0], [0], [0, 0, 1, 0], [], []>} : vector<24x16xbf16>, vector<24x16xbf16>, vector<24x24xf32> -> vector<24x24xf32>
    %424 = tpu.transpose %420, [1, 0] : vector<24x1xf32> -> vector<1x24xf32>
    %425 = vector.broadcast %417 : vector<24x1xf32> to vector<24x24xf32>
    %426 = vector.broadcast %424 : vector<1x24xf32> to vector<24x24xf32>
    %427 = arith.addf %425, %426 : vector<24x24xf32>
    %cst_111 = arith.constant 2.000000e+00 : f32
    %428 = vector.broadcast %cst_111 : f32 to vector<24x24xf32>
    %429 = arith.mulf %428, %423 : vector<24x24xf32>
    %430 = arith.subf %427, %429 : vector<24x24xf32>
    %cst_112 = arith.constant 0.000000e+00 : f32
    %431 = vector.broadcast %cst_112 : f32 to vector<24x24xf32>
    %432 = arith.subf %431, %430 : vector<24x24xf32>
    %433 = vector.broadcast %14 : vector<1x24xf32> to vector<24x24xf32>
    %434 = arith.addf %432, %433 : vector<24x24xf32>
    %cst_113 = arith.constant dense<0xFF800000> : vector<24xf32>
    %435 = vector.multi_reduction <maximumf>, %434, %cst_113 [1] : vector<24x24xf32> to vector<24xf32>
    %436 = vector.shape_cast %435 : vector<24xf32> to vector<24x1xf32>
    %437 = vector.broadcast %436 : vector<24x1xf32> to vector<24x24xf32>
    %438 = arith.subf %434, %437 : vector<24x24xf32>
    %439 = math.exp %438 : vector<24x24xf32>
    %cst_114 = arith.constant dense<0.000000e+00> : vector<24xf32>
    %440 = vector.multi_reduction <add>, %439, %cst_114 [1] : vector<24x24xf32> to vector<24xf32>
    %441 = vector.shape_cast %440 : vector<24xf32> to vector<24x1xf32>
    %442 = tpu.reciprocal %441 {approx = true} : vector<24x1xf32> -> vector<24x1xf32>
    %443 = vector.broadcast %442 : vector<24x1xf32> to vector<24x24xf32>
    %444 = arith.mulf %439, %443 : vector<24x24xf32>
    %445 = arith.truncf %444 : vector<24x24xf32> to vector<24x24xbf16>
    %446 = arith.truncf %412 : vector<24x16xf32> to vector<24x16xbf16>
    %cst_115 = arith.constant dense<0.000000e+00> : vector<24x16xf32>
    %447 = tpu.matmul %445, %446, %cst_115 {dimension_numbers = #tpu.dot_dimension_numbers<[1], [0], [0], [1], [0, 0, 1, 1], [], []>} : vector<24x24xbf16>, vector<24x16xbf16>, vector<24x16xf32> -> vector<24x16xf32>
    %448 = tpu.concatenate %333, %371, %409, %447 in 1 : vector<24x16xf32>, vector<24x16xf32>, vector<24x16xf32>, vector<24x16xf32> -> vector<24x64xf32>
    %449 = arith.truncf %448 : vector<24x64xf32> to vector<24x64xbf16>
    %c1_116 = arith.constant 1 : index
    %c0_117 = arith.constant 0 : index
    %c0_118 = arith.constant 0 : index
    %450 = vector.load %arg5[%c1_116, %c0_117, %c0_118] : memref<2x64x64xbf16, #tpu.memory_space<vmem>>, vector<1x64x64xbf16>
    %451 = vector.shape_cast %450 : vector<1x64x64xbf16> to vector<64x64xbf16>
    %cst_119 = arith.constant dense<0.000000e+00> : vector<24x64xf32>
    %452 = tpu.matmul %449, %451, %cst_119 {dimension_numbers = #tpu.dot_dimension_numbers<[1], [0], [0], [1], [0, 0, 1, 1], [], []>} : vector<24x64xbf16>, vector<64x64xbf16>, vector<24x64xf32> -> vector<24x64xf32>
    %453 = arith.addf %259, %452 : vector<24x64xf32>
    %454 = vector.broadcast %266 : vector<1x64xf32> to vector<24x64xf32>
    %455 = arith.addf %453, %454 : vector<24x64xf32>
    %cst_120 = arith.constant dense<0.000000e+00> : vector<24xf32>
    %456 = vector.multi_reduction <add>, %455, %cst_120 [1] : vector<24x64xf32> to vector<24xf32>
    %457 = vector.shape_cast %456 : vector<24xf32> to vector<24x1xf32>
    %cst_121 = arith.constant 6.400000e+01 : f32
    %458 = vector.broadcast %cst_121 : f32 to vector<24x1xf32>
    %459 = arith.divf %457, %458 : vector<24x1xf32>
    %460 = vector.broadcast %459 : vector<24x1xf32> to vector<24x64xf32>
    %461 = arith.subf %455, %460 : vector<24x64xf32>
    %462 = arith.mulf %461, %461 : vector<24x64xf32>
    %cst_122 = arith.constant dense<0.000000e+00> : vector<24xf32>
    %463 = vector.multi_reduction <add>, %462, %cst_122 [1] : vector<24x64xf32> to vector<24xf32>
    %464 = vector.shape_cast %463 : vector<24xf32> to vector<24x1xf32>
    %cst_123 = arith.constant 6.400000e+01 : f32
    %465 = vector.broadcast %cst_123 : f32 to vector<24x1xf32>
    %466 = arith.divf %464, %465 : vector<24x1xf32>
    %467 = vector.broadcast %459 : vector<24x1xf32> to vector<24x64xf32>
    %468 = arith.subf %455, %467 : vector<24x64xf32>
    %cst_124 = arith.constant 9.99999974E-6 : f32
    %469 = vector.broadcast %cst_124 : f32 to vector<24x1xf32>
    %470 = arith.addf %466, %469 : vector<24x1xf32>
    %471 = math.rsqrt %470 : vector<24x1xf32>
    %472 = vector.broadcast %471 : vector<24x1xf32> to vector<24x64xf32>
    %473 = arith.mulf %468, %472 : vector<24x64xf32>
    %474 = vector.broadcast %264 : vector<1x64xf32> to vector<24x64xf32>
    %475 = arith.mulf %473, %474 : vector<24x64xf32>
    %476 = vector.broadcast %265 : vector<1x64xf32> to vector<24x64xf32>
    %477 = arith.addf %475, %476 : vector<24x64xf32>
    %478 = arith.truncf %477 : vector<24x64xf32> to vector<24x64xbf16>
    %c1_125 = arith.constant 1 : index
    %c0_126 = arith.constant 0 : index
    %c0_127 = arith.constant 0 : index
    %479 = vector.load %arg6[%c1_125, %c0_126, %c0_127] : memref<2x64x128xbf16, #tpu.memory_space<vmem>>, vector<1x64x128xbf16>
    %480 = vector.shape_cast %479 : vector<1x64x128xbf16> to vector<64x128xbf16>
    %cst_128 = arith.constant dense<0.000000e+00> : vector<24x128xf32>
    %481 = tpu.matmul %478, %480, %cst_128 {dimension_numbers = #tpu.dot_dimension_numbers<[1], [0], [0], [1], [0, 0, 1, 1], [], []>} : vector<24x64xbf16>, vector<64x128xbf16>, vector<24x128xf32> -> vector<24x128xf32>
    %482 = vector.extract_strided_slice %481 {offsets = [0, 0], sizes = [24, 64], strides = [1, 1]} : vector<24x128xf32> to vector<24x64xf32>
    %483 = vector.extract_strided_slice %481 {offsets = [0, 64], sizes = [24, 64], strides = [1, 1]} : vector<24x128xf32> to vector<24x64xf32>
    %484 = arith.mulf %477, %482 : vector<24x64xf32>
    %cst_129 = arith.constant dense<0.000000e+00> : vector<24xf32>
    %485 = vector.multi_reduction <add>, %484, %cst_129 [1] : vector<24x64xf32> to vector<24xf32>
    %486 = vector.shape_cast %485 : vector<24xf32> to vector<24x1xf32>
    %487 = vector.broadcast %486 : vector<24x1xf32> to vector<24x64xf32>
    %488 = vector.broadcast %269 : vector<1x64xf32> to vector<24x64xf32>
    %489 = arith.addf %487, %488 : vector<24x64xf32>
    %cst_130 = arith.constant 2.000000e+00 : f32
    %490 = vector.broadcast %cst_130 : f32 to vector<24x64xf32>
    %491 = arith.mulf %490, %483 : vector<24x64xf32>
    %492 = arith.subf %489, %491 : vector<24x64xf32>
    %cst_131 = arith.constant 0.000000e+00 : f32
    %493 = vector.broadcast %cst_131 : f32 to vector<1x64xf32>
    %494 = arith.subf %493, %268 : vector<1x64xf32>
    %495 = vector.broadcast %494 : vector<1x64xf32> to vector<24x64xf32>
    %496 = arith.mulf %495, %492 : vector<24x64xf32>
    %497 = math.exp %496 : vector<24x64xf32>
    %498 = arith.truncf %497 : vector<24x64xf32> to vector<24x64xbf16>
    %c1_132 = arith.constant 1 : index
    %c0_133 = arith.constant 0 : index
    %c0_134 = arith.constant 0 : index
    %499 = vector.load %arg7[%c1_132, %c0_133, %c0_134] : memref<2x64x64xbf16, #tpu.memory_space<vmem>>, vector<1x64x64xbf16>
    %500 = vector.shape_cast %499 : vector<1x64x64xbf16> to vector<64x64xbf16>
    %cst_135 = arith.constant dense<0.000000e+00> : vector<24x64xf32>
    %501 = tpu.matmul %498, %500, %cst_135 {dimension_numbers = #tpu.dot_dimension_numbers<[1], [0], [0], [1], [0, 0, 1, 1], [], []>} : vector<24x64xbf16>, vector<64x64xbf16>, vector<24x64xf32> -> vector<24x64xf32>
    %502 = arith.addf %455, %501 : vector<24x64xf32>
    %503 = vector.broadcast %267 : vector<1x64xf32> to vector<24x64xf32>
    %504 = arith.addf %502, %503 : vector<24x64xf32>
    %505 = vector.extract_strided_slice %504 {offsets = [16, 0], sizes = [1, 64], strides = [1, 1]} : vector<24x64xf32> to vector<1x64xf32>
    %cst_136 = arith.constant dense<0.000000e+00> : vector<1xf32>
    %506 = vector.multi_reduction <add>, %505, %cst_136 [1] : vector<1x64xf32> to vector<1xf32>
    %507 = vector.shape_cast %506 : vector<1xf32> to vector<1x1xf32>
    %cst_137 = arith.constant 6.400000e+01 : f32
    %508 = vector.broadcast %cst_137 : f32 to vector<1x1xf32>
    %509 = arith.divf %507, %508 : vector<1x1xf32>
    %510 = vector.broadcast %509 : vector<1x1xf32> to vector<1x64xf32>
    %511 = arith.subf %505, %510 : vector<1x64xf32>
    %512 = arith.mulf %511, %511 : vector<1x64xf32>
    %cst_138 = arith.constant dense<0.000000e+00> : vector<1xf32>
    %513 = vector.multi_reduction <add>, %512, %cst_138 [1] : vector<1x64xf32> to vector<1xf32>
    %514 = vector.shape_cast %513 : vector<1xf32> to vector<1x1xf32>
    %cst_139 = arith.constant 6.400000e+01 : f32
    %515 = vector.broadcast %cst_139 : f32 to vector<1x1xf32>
    %516 = arith.divf %514, %515 : vector<1x1xf32>
    %517 = vector.broadcast %509 : vector<1x1xf32> to vector<1x64xf32>
    %518 = arith.subf %505, %517 : vector<1x64xf32>
    %cst_140 = arith.constant 9.99999974E-6 : f32
    %519 = vector.broadcast %cst_140 : f32 to vector<1x1xf32>
    %520 = arith.addf %516, %519 : vector<1x1xf32>
    %521 = math.rsqrt %520 : vector<1x1xf32>
    %522 = vector.broadcast %521 : vector<1x1xf32> to vector<1x64xf32>
    %523 = arith.mulf %518, %522 : vector<1x64xf32>
    %524 = arith.truncf %523 : vector<1x64xf32> to vector<1x64xbf16>
    %c0_141 = arith.constant 0 : index
    %c0_142 = arith.constant 0 : index
    %525 = vector.load %arg9[%c0_141, %c0_142] : memref<64x128xbf16, #tpu.memory_space<vmem>>, vector<64x128xbf16>
    %cst_143 = arith.constant dense<0.000000e+00> : vector<1x128xf32>
    %526 = tpu.matmul %524, %525, %cst_143 {dimension_numbers = #tpu.dot_dimension_numbers<[1], [0], [0], [1], [0, 0, 1, 1], [], []>} : vector<1x64xbf16>, vector<64x128xbf16>, vector<1x128xf32> -> vector<1x128xf32>
    %c0_144 = arith.constant 0 : index
    %c0_145 = arith.constant 0 : index
    %527 = vector.load %arg10[%c0_144, %c0_145] : memref<1x128xf32, #tpu.memory_space<vmem>>, vector<1x128xf32>
    %528 = arith.addf %526, %527 : vector<1x128xf32>
    %c0_146 = arith.constant 0 : index
    %c0_147 = arith.constant 0 : index
    %c0_148 = arith.constant 0 : index
    %529 = vector.load %arg11[%c0_146, %c0_147, %c0_148] : memref<1x1x128xf32, #tpu.memory_space<vmem>>, vector<1x1x128xf32>
    %530 = vector.shape_cast %529 : vector<1x1x128xf32> to vector<1x128xf32>
    %531 = vector.shape_cast %528 : vector<1x128xf32> to vector<1x1x128xf32>
    tpu.vector_store %arg11[%c0_146, %c0_147, %c0_148], %531 {strides = array<i32>} : memref<1x1x128xf32, #tpu.memory_space<vmem>>, vector<1x1x128xf32>,
    return
  }
  func.func @transform_0(%arg0: i32) -> (i32, i32, i32) {
    %c0_i32 = arith.constant 0 : i32
    %c0_i32_0 = arith.constant 0 : i32
    %c0_i32_1 = arith.constant 0 : i32
    return %arg0, %c0_i32, %c0_i32_0 : i32, i32, i32
  }
  func.func @transform_1(%arg0: i32) -> (i32, i32) {
    %c0_i32 = arith.constant 0 : i32
    %c0_i32_0 = arith.constant 0 : i32
    %c0_i32_1 = arith.constant 0 : i32
    return %c0_i32, %c0_i32_0 : i32, i32
  }
  func.func @transform_2(%arg0: i32) -> (i32, i32) {
    %c0_i32 = arith.constant 0 : i32
    %c0_i32_0 = arith.constant 0 : i32
    %c0_i32_1 = arith.constant 0 : i32
    return %c0_i32, %c0_i32_0 : i32, i32
  }
  func.func @transform_3(%arg0: i32) -> (i32, i32, i32) {
    %c0_i32 = arith.constant 0 : i32
    %c0_i32_0 = arith.constant 0 : i32
    %c0_i32_1 = arith.constant 0 : i32
    %c0_i32_2 = arith.constant 0 : i32
    return %c0_i32, %c0_i32_0, %c0_i32_1 : i32, i32, i32
  }
  func.func @transform_4(%arg0: i32) -> (i32, i32, i32) {
    %c0_i32 = arith.constant 0 : i32
    %c0_i32_0 = arith.constant 0 : i32
    %c0_i32_1 = arith.constant 0 : i32
    %c0_i32_2 = arith.constant 0 : i32
    return %c0_i32, %c0_i32_0, %c0_i32_1 : i32, i32, i32
  }
  func.func @transform_5(%arg0: i32) -> (i32, i32, i32) {
    %c0_i32 = arith.constant 0 : i32
    %c0_i32_0 = arith.constant 0 : i32
    %c0_i32_1 = arith.constant 0 : i32
    %c0_i32_2 = arith.constant 0 : i32
    return %c0_i32, %c0_i32_0, %c0_i32_1 : i32, i32, i32
  }
  func.func @transform_6(%arg0: i32) -> (i32, i32, i32) {
    %c0_i32 = arith.constant 0 : i32
    %c0_i32_0 = arith.constant 0 : i32
    %c0_i32_1 = arith.constant 0 : i32
    %c0_i32_2 = arith.constant 0 : i32
    return %c0_i32, %c0_i32_0, %c0_i32_1 : i32, i32, i32
  }
  func.func @transform_7(%arg0: i32) -> (i32, i32, i32) {
    %c0_i32 = arith.constant 0 : i32
    %c0_i32_0 = arith.constant 0 : i32
    %c0_i32_1 = arith.constant 0 : i32
    %c0_i32_2 = arith.constant 0 : i32
    return %c0_i32, %c0_i32_0, %c0_i32_1 : i32, i32, i32
  }
  func.func @transform_8(%arg0: i32) -> (i32, i32) {
    %c0_i32 = arith.constant 0 : i32
    %c0_i32_0 = arith.constant 0 : i32
    %c0_i32_1 = arith.constant 0 : i32
    return %c0_i32, %c0_i32_0 : i32, i32
  }
  func.func @transform_9(%arg0: i32) -> (i32, i32) {
    %c0_i32 = arith.constant 0 : i32
    %c0_i32_0 = arith.constant 0 : i32
    %c0_i32_1 = arith.constant 0 : i32
    return %c0_i32, %c0_i32_0 : i32, i32
  }
  func.func @transform_10(%arg0: i32) -> (i32, i32, i32) {
    %c0_i32 = arith.constant 0 : i32
    %c0_i32_0 = arith.constant 0 : i32
    %c0_i32_1 = arith.constant 0 : i32
    return %arg0, %c0_i32, %c0_i32_0 : i32, i32, i32
  }
}

</mosaic_0001>

<bundles_post_ra>
// kernel: hyper_vit_forward.1
= control target key start
LH: loop header
LB: loop body
LE: loop exit
PB: predicated region body
PF: predicated region fallthrough
CT: control target
= control target key end

     0   :  { %s5181_s0 = inlined_call_operand.vmem [shape: f32[2,16,48], index: 0, kind: input, shape index: {}]   ;;  %s5182_s1 = inlined_call_operand.vmem [shape: f32[24,64], index: 1, kind: input, shape index: {}]   ;;  %s5183_s2 = inlined_call_operand.vmem [shape: bf16[48,64], index: 2, kind: input, shape index: {}]   ;;  %s5184_s3 = inlined_call_operand.vmem [shape: bf16[2,64,320], index: 3, kind: input, shape index: {}]   ;;  %s5185_s4 = inlined_call_operand.vmem [shape: bf16[2,64,64], index: 4, kind: input, shape index: {}]   ;;  %s5186_s5 = inlined_call_operand.vmem [shape: bf16[2,64,128], index: 5, kind: input, shape index: {}]   ;;  %s5187_s6 = inlined_call_operand.vmem [shape: bf16[2,64,64], index: 6, kind: input, shape index: {}]   ;;  %s5188_s7 = inlined_call_operand.vmem [shape: f32[2,8,64], index: 7, kind: input, shape index: {}]   ;;  %s5189_s8 = inlined_call_operand.vmem [shape: bf16[64,128], index: 8, kind: input, shape index: {}]   ;;  %s5190_s9 = inlined_call_operand.vmem [shape: f32[1,128], index: 9, kind: input, shape index: {}]   ;;  %s5191_s10 = inlined_call_operand.hbm [shape: f32[2,1,128], index: 10, kind: output, shape index: {}]  }
   0x1   :  { %5206 = sst [smem:[#allocation5_spill]] %s5181_s0 }
   0x2   :  { %15 = vsyncpa [#allocation3], 0 }
   0x3   :  { %17 = vsyncpa [#allocation3 + $0x1], 0  ;;  %s4005_s13 = smov 0   ;;  %s4007_s14 = smov 0  }
   0x4   :  { %s4009_s15 = smov 0   ;;  %s4011_s16 = smov 0  }
   0x5 LB: > { %s4026_s17 = sadd.s32 4294967295, %s3939_s16   ;;  %s3276_s18 = sadd.s32 4294967294, %s3939_s16   ;;  %s3939_s16 = sphi %s4011_s16, %s5220_s16   ;;  %s3935_s15 = sphi %s4009_s15, %s5219_s15   ;;  %s3931_s14 = sphi %s4007_s14, %s5218_s14   ;;  %s3927_s13 = sphi %s4005_s13, %s5217_s13  }
   0x6   : > { %s4030_s19 = sadd.s32 1, %s3939_s16   ;;  %s245_s20 = sadd.s32 1, %s3935_s15 }
   0x7   : > { %s242_s21 = ssub.s32 %s3939_s16, %s4030_s19  ;;  %p255_p0 = scmp.ne.s32.totalorder %s3935_s15, %s3931_s14 }
   0x8   : > { %p243_p1 = scmp.eq.s32.totalorder %s242_s21, 0  ;;  %p256_p2 = scmp.eq.s32.totalorder %s4026_s17, 1 }
   0x9   : > { %p261_p3 = scmp.ne.s32.totalorder %s3931_s14, %s3927_s13  ;;  %p262_p4 = scmp.eq.s32.totalorder %s3276_s18, 1 }
   0xa   : > { %s4041_s22 = scalar_select %p243_p1, %s3935_s15, %s245_s20  }
   0xb   : > { %p4043_p5 = por %p256_p2, %p255_p0  ;;  %p4047_p6 = por %p262_p4, %p261_p3 }
   0xc   : > { %p3279_p7 = scmp.ge.s32.totalorder %s3939_s16, 1  ;;  %p315_p8 = scmp.lt.s32.totalorder %s3939_s16, 3 }
   0xe   : > { %p316_p9 = pnand %p3279_p7, %p315_p8 }
   0xf   : > { %p352_p10 = scmp.lt.s32.totalorder (!%p316_p9), %s4026_s17, 1  ;;  %s5209_s0 = sld [smem:[#allocation5_spill]] (!%p316_p9) }
  0x10   : > { %319 = sbr.rel (%p316_p9) target bundleno = 5584 (0x15d0), region = 60  ;;  %s5204_s26 = smov (!%p316_p9), 64  }
  0x11   : > { %s5202_s27 = smov (!%p316_p9), 48   ;;  %s5198_s28 = smov (!%p316_p9), 32  }
  0x12   : > { %s5200_s29 = smov (!%p316_p9), 16   ;;  %s5194_s30 = smov (!%p316_p9), 112  }
  0x13   : > { %s5214_s25 = smov (!%p316_p9), 80  }
  0x15   : > { %v405_v0 = vld [vmem:[%s5182_s1 + $0x10] sm:$0xff]  ;;  %vm414_vm0 = vcmask 523264   ;;  %v3605_v3 = vld [vmem:[%s5183_s2 + $0x8] sm:$0xff]  ;;  %s353_s11 = scalar_select %p352_p10, %s4026_s17, 1  ;;  %v3604_v4 = vld [vmem:[%s5183_s2] sm:$0xff]  ;;  %vm385_vm1 = vcmask 392192  }
  0x16   : > { %v3606_v1 = vld [vmem:[%s5183_s2 + $0x10] sm:$0xff]  ;;  %v421_v2 = vsel %vm414_vm0, %v405_v0, 0.0  ;;  %v3941_v8 = vmov 64.0   ;;  %v403_v20 = vld [vmem:[%s5182_s1] sm:$0xff]  ;;  %v404_v24 = vld [vmem:[%s5182_s1 + $0x8] sm:$0xff]  ;;  %vm835_vm12 = vcmask 1043456  }
  0x17   : > { %422 = vadd.xlane.f32.xlu1 %v421_v2  ;;  %394 = vmatpush.bf16.msra.mxu0 %v3606_v1  ;;  %s3603_s12 = sshll.u32 %s353_s11, 4  ;;  %3738 = vrcp.f32 %v3941_v8  ;;  %v3333_v38 = vld [vmem:[%s5184_s3 + $0x48] sm:$0xf]  ;;  %v3617_v39 = vld [vmem:[%s5184_s3 + $0x50] sm:$0xf0]  ;;  %vm653_vm13 = vcmask 130048  }
  0x18   : > { %s356_s21 = scalar_lea.vmem %s5209_s0, %s3603_s12  ;;  %v3616_v40 = vld [vmem:[%s5184_s3 + $0x4c] sm:$0xf]  ;;  %v3334_v41 = vor.u32 %v3617_v39, %v3333_v38  ;;  %v3335_v42 = vld [vmem:[%s5184_s3 + $0x54] sm:$0xf0]  ;;  %v3341_v43 = vld [vmem:[%s5184_s3 + $0x50] sm:$0xf] }
  0x19   : > { %v358_v5 = vld [vmem:[%s356_s21] sm:$0xff]  ;;  %v359_v6 = vld [vmem:[%s356_s21 + $0x8] sm:$0xff]  ;;  %v3618_v44 = vld [vmem:[%s5184_s3 + $0x58] sm:$0xf0]  ;;  %v3338_v45 = vor.u32 %v3616_v40, %v3335_v42  ;;  %s5196_s11 = smov 80   ;;  %s5192_s12 = smov 96  }
  0x1a   : > { %v360_v7 = vpack.c.bf16 %v359_v6, %v358_v5  ;;  %v3342_v46 = vor.u32 %v3618_v44, %v3341_v43  ;;  %588 = vmatpush.bf16.msra.mxu1 %v3334_v41  ;;  %v3321_v47 = vld [vmem:[%s5184_s3 + $0x30] sm:$0xf]  ;;  %v3614_v48 = vld [vmem:[%s5184_s3 + $0x38] sm:$0xf0]  ;;  %v3613_v49 = vld [vmem:[%s5184_s3 + $0x34] sm:$0xf] }
  0x1b   : > { %395 = vmatpush.bf16.msra.mxu0 %v3605_v3  ;;  %606 = vmatpush.bf16.msra.mxu2 %v3338_v45  ;;  %v3322_v50 = vor.u32 %v3614_v48, %v3321_v47  ;;  %v3323_v51 = vld [vmem:[%s5184_s3 + $0x3c] sm:$0xf0]  ;;  %v3329_v52 = vld [vmem:[%s5184_s3 + $0x38] sm:$0xf]  ;;  %v3615_v53 = vld [vmem:[%s5184_s3 + $0x40] sm:$0xf0] }
  0x1c   : > { %624 = vmatpush.bf16.msra.mxu3 %v3342_v46  ;;  %v3326_v54 = vor.u32 %v3613_v49, %v3323_v51  ;;  %v3330_v55 = vor.u32 %v3615_v53, %v3329_v52  ;;  %v3309_v57 = vld [vmem:[%s5184_s3 + $0x18] sm:$0xf]  ;;  %v3611_v58 = vld [vmem:[%s5184_s3 + $0x20] sm:$0xf0]  ;;  %v3610_v59 = vld [vmem:[%s5184_s3 + $0x1c] sm:$0xf] }
  0x1d   : > { %v3739_v9 = vpop.eup %3738  ;;  %v3310_v60 = vor.u32 %v3611_v58, %v3309_v57  ;;  %v3311_v61 = vld [vmem:[%s5184_s3 + $0x24] sm:$0xf0]  ;;  %v3317_v62 = vld [vmem:[%s5184_s3 + $0x20] sm:$0xf]  ;;  %v3612_v63 = vld [vmem:[%s5184_s3 + $0x28] sm:$0xf0] }
  0x1e   : > { %v425_v10 = vmul.f32 64.0, %v3739_v9  ;;  %vm429_vm2 = vweird.f32 %v3739_v9  ;;  %589 = vmatpush.bf16.msra.mxu1 %v3322_v50  ;;  %v3318_v1 = vor.u32 %v3612_v63, %v3317_v62  ;;  %v3297_v2 = vld [vmem:[%s5184_s3] sm:$0xf]  ;;  %v3608_v3 = vld [vmem:[%s5184_s3 + $0x8] sm:$0xf0]  ;;  %vm793_vm15 = vcmask 195584  }
  0x1f   : > { %396 = vmatpush.bf16.msra.mxu0 %v3604_v4  ;;  %607 = vmatpush.bf16.msra.mxu2 %v3326_v54  ;;  %v3607_v4 = vld [vmem:[%s5184_s3 + $0x4] sm:$0xf]  ;;  %v3299_v8 = vld [vmem:[%s5184_s3 + $0xc] sm:$0xf0]  ;;  %s5213_s21 = smov 32  }
  0x20   : > { %v426_v11 = vsub.f32 1.0, %v425_v10  ;;  %625 = vmatpush.bf16.msra.mxu3 %v3330_v55  ;;  %v3609_v10 = vld [vmem:[%s5184_s3 + $0x10] sm:$0xf0]  ;;  %v413_v41 = vld [vmem:[%s5188_s7] sm:$0xff] }
  0x21   : > { %v488_v44 = vperm.slane %v413_v41, 0  ;;  %v492_v50 = vperm.slane %v413_v41, 1 }
  0x22   : > { %3294 = vmatmul.msk.bf16.vlgmr.msra.gmra.mxu0 %vm385_vm1, %v360_v7  ;;  %v427_v12 = vmul.f32 %v3739_v9, %v426_v11  ;;  %590 = vmatpush.bf16.msra.mxu1 %v3310_v60  ;;  %v3298_v7 = vor.u32 %v3608_v3, %v3297_v2 }
  0x24   : > { %v428_v13 = vadd.f32 %v3739_v9, %v427_v12  ;;  %626 = vmatpush.bf16.msra.mxu3 %v3318_v1  ;;  %v3302_v12 = vor.u32 %v3607_v4, %v3299_v8 }
  0x26   : > { %v4072_v14 = vsel %vm429_vm2, %v3739_v9, %v428_v13  ;;  %v3305_v9 = vld [vmem:[%s5184_s3 + $0x8] sm:$0xf]  ;;  %591 = vmatpush.bf16.msra.mxu1 %v3298_v7  ;;  %vm1466_vm2 = vcmask 261120  }
  0x27   : > { %v3306_v13 = vor.u32 %v3609_v10, %v3305_v9 }
  0x29   : > { %627 = vmatpush.bf16.msra.mxu3 %v3306_v13 }
  0x8a   : > { %v423_v15 = vpop.xlane.xlu1 %422 }
  0x8b   : > { %v433_v16 = vmul.f32 %v4072_v14, %v423_v15 }
  0x8d   : > { %v4075_v17 = vsub.f32 %v405_v0, %v433_v16  ;;  %v3314_v0 = vor.u32 %v3610_v59, %v3311_v61 }
  0x8f   : > { %v439_v18 = vmul.f32 %v4075_v17, %v4075_v17  ;;  %608 = vmatpush.bf16.msra.mxu2 %v3314_v0 }
  0x91   : > { %v446_v19 = vsel %vm414_vm0, %v439_v18, 0.0 }
  0x92   : > { %447 = vadd.xlane.f32.xlu2 %v446_v19 }
  0x93   : > { %609 = vmatpush.bf16.msra.mxu2 %v3302_v12 }
  0x9f   : > { %v398_v21 = vpop.f32.mrf.mxu0 }
  0xa0   : > { %v4083_v22 = vadd.f32 %v403_v20, %v398_v21 }
  0xa2   : > { %v415_v23 = vsel %vm414_vm0, %v4083_v22, 0.0 }
  0xa3   : > { %416 = vadd.xlane.f32.xlu0 %v415_v23 }
  0xa7   : > { %v400_v25 = vpop.f32.mrf.mxu0 }
  0xa8   : > { %v4090_v26 = vadd.f32 %v404_v24, %v400_v25 }
  0xaa   : > { %v418_v27 = vsel %vm414_vm0, %v4090_v26, 0.0 }
  0xab   : > { %419 = vadd.xlane.f32.xlu0 %v418_v27 }
 0x105   : > { %v448_v56 = vpop.xlane.xlu2 %447 }
 0x106   : > { %v451_v5 = vmul.f32 %v448_v56, %v4072_v14 }
 0x108   : > { %v454_v16 = vadd.f32 1e-05, %v451_v5 }
 0x10a   : > { %vm481_vm9 = vweird.f32 %v454_v16 }
 0x116   : > { %v417_v28 = vpop.xlane.xlu0 %416 }
 0x117   : > { %v431_v29 = vmul.f32 %v4072_v14, %v417_v28 }
 0x119   : > { %v4096_v30 = vsub.f32 %v4083_v22, %v431_v29 }
 0x11b   : > { %v437_v31 = vmul.f32 %v4096_v30, %v4096_v30 }
 0x11d   : > { %v440_v32 = vsel %vm414_vm0, %v437_v31, 0.0 }
 0x11e   : > { %441 = vadd.xlane.f32.xlu1 %v440_v32  ;;  %v420_v33 = vpop.xlane.xlu0 %419 }
 0x11f   : > { %v432_v34 = vmul.f32 %v4072_v14, %v420_v33 }
 0x121   : > { %v4103_v35 = vsub.f32 %v4090_v26, %v432_v34 }
 0x123   : > { %v438_v36 = vmul.f32 %v4103_v35, %v4103_v35 }
 0x125   : > { %v443_v37 = vsel %vm414_vm0, %v438_v36, 0.0 }
 0x126   : > { %444 = vadd.xlane.f32.xlu2 %v443_v37 }
 0x191   : > { %v442_v6 = vpop.xlane.xlu1 %441 }
 0x192   : > { %v449_v11 = vmul.f32 %v442_v6, %v4072_v14 }
 0x194   : > { %v452_v15 = vadd.f32 1e-05, %v449_v11 }
 0x196   : > { %3740 = vrsqrt.f32 %v452_v15  ;;  %vm461_vm4 = vweird.f32 %v452_v15 }
 0x197   : > { %3742 = vrsqrt.f32 %v454_v16 }
 0x199   : > { %v445_v18 = vpop.xlane.xlu2 %444 }
 0x19a   : > { %v450_v19 = vmul.f32 %v445_v18, %v4072_v14 }
 0x19c   : > { %v3741_v20 = vpop.eup %3740  ;;  %v453_v21 = vadd.f32 1e-05, %v450_v19 }
 0x19d   : > { %v456_v23 = vmul.f32 %v3741_v20, %v452_v15  ;;  %v3743_v25 = vpop.eup %3742  ;;  %vm462_vm3 = vweird.f32 %v3741_v20 }
 0x19e   : > { %3744 = vrsqrt.f32 %v453_v21  ;;  %v476_v28 = vmul.f32 %v3743_v25, %v454_v16  ;;  %vm463_vm5 = vmor %vm461_vm4, %vm462_vm3  ;;  %vm471_vm7 = vweird.f32 %v453_v21  ;;  %vm482_vm10 = vweird.f32 %v3743_v25 }
 0x19f   : > { %v457_v24 = vmul.f32 %v3741_v20, %v456_v23  ;;  %vm483_vm11 = vmor %vm481_vm9, %vm482_vm10 }
 0x1a0   : > { %v477_v34 = vmul.f32 %v3743_v25, %v476_v28 }
 0x1a1   : > { %v458_v27 = vmul.f32 0.5, %v457_v24 }
 0x1a2   : > { %v478_v39 = vmul.f32 0.5, %v477_v34 }
 0x1a3   : > { %v459_v29 = vsub.f32 1.5, %v458_v27 }
 0x1a4   : > { %v3745_v31 = vpop.eup %3744  ;;  %v479_v45 = vsub.f32 1.5, %v478_v39 }
 0x1a5   : > { %v460_v32 = vmul.f32 %v3741_v20, %v459_v29  ;;  %v466_v33 = vmul.f32 %v3745_v31, %v453_v21  ;;  %vm472_vm6 = vweird.f32 %v3745_v31 }
 0x1a6   : > { %vm473_vm8 = vmor %vm471_vm7, %vm472_vm6  ;;  %v480_v51 = vmul.f32 %v3743_v25, %v479_v45 }
 0x1a7   : > { %v467_v36 = vmul.f32 %v3745_v31, %v466_v33  ;;  %v464_v37 = vsel %vm463_vm5, %v3741_v20, %v460_v32 }
 0x1a8   : > { %v485_v42 = vmul.f32 %v464_v37, %v4096_v30  ;;  %v484_v55 = vsel %vm483_vm11, %v3743_v25, %v480_v51 }
 0x1a9   : > { %v468_v38 = vmul.f32 0.5, %v467_v36  ;;  %v487_v30 = vmul.f32 %v484_v55, %v4075_v17 }
 0x1aa   : > { %v489_v48 = vmul.f32 %v488_v44, %v485_v42 }
 0x1ab   : > { %v469_v40 = vsub.f32 1.5, %v468_v38 }
 0x1ac   : > { %v493_v52 = vadd.f32 %v492_v50, %v489_v48 }
 0x1ad   : > { %v470_v43 = vmul.f32 %v3745_v31, %v469_v40 }
 0x1af   : > { %v474_v46 = vsel %vm473_vm8, %v3745_v31, %v470_v43 }
 0x1b0   : > { %v486_v47 = vmul.f32 %v474_v46, %v4103_v35  ;;  %v491_v35 = vmul.f32 %v488_v44, %v487_v30 }
 0x1b2   : > { %v490_v49 = vmul.f32 %v488_v44, %v486_v47  ;;  %v495_v56 = vadd.f32 %v492_v50, %v491_v35 }
 0x1b4   : > { %v494_v53 = vadd.f32 %v492_v50, %v490_v49  ;;  %v497_v57 = vpack.c.bf16 %v495_v56, %v495_v56 }
 0x1b6   : > { %v496_v54 = vpack.c.bf16 %v494_v53, %v493_v52 }
 0x1b8   : > { %3343 = vmatmul.msk.bf16.vlgmr.msra.gmra.mxu1 %vm414_vm0, %v496_v54  ;;  %3345 = vmatmul.msk.bf16.vlgmr.msra.gmra.mxu2 %vm414_vm0, %v496_v54 }
 0x1b9   : > { %3347 = vmatmul.msk.bf16.vlgmr.msra.gmra.mxu3 %vm414_vm0, %v496_v54 }
 0x1c8   : > { %3344 = vmatmul.msk.bf16.gmra.mxu1 %vm414_vm0, %v497_v57  ;;  %3346 = vmatmul.msk.bf16.gmra.mxu2 %vm414_vm0, %v497_v57 }
 0x1c9   : > { %3348 = vmatmul.msk.bf16.gmra.mxu3 %vm414_vm0, %v497_v57 }
 0x235   : > { %v593_v58 = vpop.f32.mrf.mxu1 }
 0x23b   : > { %v611_v59 = vpop.f32.mrf.mxu2 }
 0x23c   : > { %v629_v60 = vpop.f32.mrf.mxu3  ;;  %641 = vrot.lane.b32.xlu1 %v611_v59, %s5204_s26 }
 0x23d   : > { %666 = vrot.lane.b32.xlu0 %v629_v60, %s5204_s26  ;;  %v4197_v61 = vpop.f32.mrf.mxu1 }
 0x23e   : > { %v701_v17 = vpack.c.bf16 %v4197_v61, %v593_v58 }
 0x240   : > { %711 = vrot.lane.b32.xlu2 %v701_v17, %s5204_s26 }
 0x243   : > { %v613_v62 = vpop.f32.mrf.mxu2 }
 0x244   : > { %v631_v63 = vpop.f32.mrf.mxu3  ;;  %900 = vrot.lane.b32.xlu1 %v701_v17, %s5202_s27  ;;  %v4206_v1 = vpack.c.bf16 %v613_v62, %v611_v59 }
 0x245   : > { %643 = vrot.lane.b32.xlu0 %v613_v62, %s5204_s26  ;;  %v4203_v0 = vpop.f32.mrf.mxu1 }
 0x246   : > { %v702_v7 = vpack.c.bf16 %v4203_v0, %v4203_v0 }
 0x248   : > { %1089 = vrot.lane.b32.xlu2 %v701_v17, %s5198_s28 }
 0x24b   : > { %v616_v2 = vpop.f32.mrf.mxu2 }
 0x24c   : > { %v4208_v3 = vpack.c.bf16 %v616_v2, %v616_v2  ;;  %v634_v4 = vpop.f32.mrf.mxu3  ;;  %1278 = vrot.lane.b32.xlu1 %v701_v17, %s5200_s29 }
 0x24d   : > { %896 = vrot.lane.b32.xlu0 %v4206_v1, %s5202_s27  ;;  %v600_v5 = vpop.f32.mrf.mxu1 }
 0x24e   : > { %v837_v6 = vsel %vm835_vm12, %v4208_v3, 0 }
 0x24f   : > { %845 = vmatpush.bf16.msrb.mxu1 %v837_v6 }
 0x250   : > { %1085 = vrot.lane.b32.xlu2 %v4206_v1, %s5198_s28 }
 0x253   : > { %v618_v8 = vpop.f32.mrf.mxu2  ;;  %846 = vmatpush.bf16.msrb.mxu1 %v4206_v1 }
 0x254   : > { %v636_v9 = vpop.f32.mrf.mxu3  ;;  %668 = vrot.lane.b32.xlu1 %v631_v63, %s5204_s26 }
 0x255   : > { %902 = vrot.lane.b32.xlu0 %v702_v7, %s5202_s27 }
 0x258   : > { %713 = vrot.lane.b32.xlu2 %v702_v7, %s5204_s26 }
 0x25c   : > { %705 = vrot.lane.b32.xlu1 %v4206_v1, %s5204_s26 }
 0x25d   : > { %670 = vrot.lane.b32.xlu0 %v634_v4, %s5204_s26 }
 0x260   : > { %1280 = vrot.lane.b32.xlu2 %v702_v7, %s5200_s29 }
 0x264   : > { %1274 = vrot.lane.b32.xlu1 %v4206_v1, %s5200_s29 }
 0x265   : > { %898 = vrot.lane.b32.xlu0 %v4208_v3, %s5202_s27 }
 0x268   : > { %1091 = vrot.lane.b32.xlu2 %v702_v7, %s5198_s28 }
 0x26c   : > { %1276 = vrot.lane.b32.xlu1 %v4208_v3, %s5200_s29 }
 0x26d   : > { %707 = vrot.lane.b32.xlu0 %v4208_v3, %s5204_s26 }
 0x270   : > { %645 = vrot.lane.b32.xlu2 %v616_v2, %s5204_s26 }
 0x274   : > { %1087 = vrot.lane.b32.xlu1 %v4208_v3, %s5198_s28 }
 0x27c   : > { %1019 = vrot.lane.b32.xlu1 %v4208_v3, %s5194_s30 }
 0x29a   : > { %v712_v10 = vpop.permute.xlu2 %711 }
 0x29b   : > { %v722_v25 = vsel %vm653_vm13, %v712_v10, 0 }
 0x2a2   : > { %v1090_v11 = vpop.permute.xlu2 %1089 }
 0x2a3   : > { %v1100_v38 = vsel %vm653_vm13, %v1090_v11, 0 }
 0x2aa   : > { %v4241_v12 = vpop.permute.xlu2 %1085 }
 0x2ae   : > { %v642_v13 = vpop.permute.xlu1 %641 }
 0x2af   : > { %v667_v15 = vpop.permute.xlu0 %666  ;;  %v650_v16 = vmul.f32 %v642_v13, %v593_v58 }
 0x2b0   : > { %v675_v18 = vmul.f32 %v667_v15, %v593_v58 }
 0x2b1   : > { %860 = vrot.lane.b32.xlu0 %v650_v16, %s5194_s30  ;;  %v654_v49 = vsel %vm653_vm13, %v650_v16, 0.0 }
 0x2b2   : > { %878 = vrot.lane.b32.xlu1 %v675_v18, %s5202_s27  ;;  %681 = vrot.lane.b32.xlu2 %v675_v18, %s5204_s26  ;;  %v714_v19 = vpop.permute.xlu2 %713 }
 0x2b3   : > { %v725_v20 = vsel %vm653_vm13, %v714_v19, 0 }
 0x2b4   : > { %733 = vmatpush.bf16.xpose.msrb.mxu0 %v725_v20 }
 0x2b6   : > { %v901_v21 = vpop.permute.xlu1 %900 }
 0x2b7   : > { %v644_v23 = vpop.permute.xlu0 %643  ;;  %v911_v42 = vsel %vm653_vm13, %v901_v21, 0 }
 0x2b8   : > { %v651_v29 = vmul.f32 %v644_v23, %v4197_v61 }
 0x2b9   : > { %1256 = vrot.lane.b32.xlu0 %v675_v18, %s5200_s29 }
 0x2ba   : > { %1067 = vrot.lane.b32.xlu1 %v675_v18, %s5198_s28  ;;  %1238 = vrot.lane.b32.xlu2 %v650_v16, %s5196_s11  ;;  %v1281_v24 = vpop.permute.xlu2 %1280  ;;  %v657_v53 = vsel %vm653_vm13, %v651_v29, 0.0 }
 0x2bb   : > { %v1292_v43 = vsel %vm653_vm13, %v1281_v24, 0 }
 0x2bc   : > { %734 = vmatpush.bf16.xpose.msrb.mxu0 %v722_v25 }
 0x2be   : > { %v1279_v27 = vpop.permute.xlu1 %1278 }
 0x2bf   : > { %v897_v28 = vpop.permute.xlu0 %896  ;;  %v1289_v46 = vsel %vm653_vm13, %v1279_v27, 0 }
 0x2c1   : > { %1049 = vrot.lane.b32.xlu0 %v650_v16, %s5192_s12 }
 0x2c2   : > { %1240 = vrot.lane.b32.xlu1 %v651_v29, %s5196_s11  ;;  %v1092_v31 = vpop.permute.xlu2 %1091 }
 0x2c3   : > { %v1103_v32 = vsel %vm653_vm13, %v1092_v31, 0 }
 0x2c4   : > { %1111 = vmatpush.bf16.xpose.msra.mxu0 %v1103_v32 }
 0x2c6   : > { %v669_v33 = vpop.permute.xlu1 %668 }
 0x2c7   : > { %v676_v34 = vmul.f32 %v669_v33, %v4197_v61  ;;  %v903_v36 = vpop.permute.xlu0 %902 }
 0x2c8   : > { %v914_v37 = vsel %vm653_vm13, %v903_v36, 0 }
 0x2c9   : > { %922 = vmatpush.bf16.xpose.msrb.mxu2 %v914_v37  ;;  %880 = vrot.lane.b32.xlu0 %v676_v34, %s5202_s27 }
 0x2ca   : > { %v646_v54 = vpop.permute.xlu2 %645 }
 0x2cb   : > { %v652_v55 = vmul.f32 %v646_v54, %v4203_v0 }
 0x2cc   : > { %1112 = vmatpush.bf16.xpose.msra.mxu0 %v1100_v38 }
 0x2cd   : > { %v660_v61 = vsel %vm653_vm13, %v652_v55, 0.0 }
 0x2ce   : > { %v706_v39 = vpop.permute.xlu1 %705 }
 0x2cf   : > { %v671_v40 = vpop.permute.xlu0 %670  ;;  %3349 = vmatmul.msk.bf16.vlgmr.msrb.gmra.mxu0 %vm653_vm13, %v706_v39 }
 0x2d0   : > { %v677_v41 = vmul.f32 %v671_v40, %v4203_v0 }
 0x2d1   : > { %923 = vmatpush.bf16.xpose.msrb.mxu2 %v911_v42  ;;  %683 = vrot.lane.b32.xlu0 %v676_v34, %s5204_s26 }
 0x2d2   : > { %882 = vrot.lane.b32.xlu1 %v677_v41, %s5202_s27 }
 0x2d6   : > { %v1275_v44 = vpop.permute.xlu1 %1274 }
 0x2d7   : > { %v899_v45 = vpop.permute.xlu0 %898 }
 0x2d8   : > { %3353 = vmatmul.msk.bf16.vlgmr.msrb.gmra.mxu2 %vm653_vm13, %v897_v28 }
 0x2d9   : > { %1300 = vmatpush.bf16.xpose.msra.mxu2 %v1292_v43  ;;  %1069 = vrot.lane.b32.xlu0 %v676_v34, %s5198_s28 }
 0x2de   : > { %v1277_v47 = vpop.permute.xlu1 %1276 }
 0x2df   : > { %v708_v48 = vpop.permute.xlu0 %707 }
 0x2e0   : > { %3350 = vmatmul.msk.bf16.gmra.mxu0 %vm653_vm13, %v708_v48 }
 0x2e1   : > { %1301 = vmatpush.bf16.xpose.msra.mxu2 %v1289_v46 }
 0x2e3   : > { %655 = vadd.xlane.f32.xlu2 %v654_v49 }
 0x2e6   : > { %v1088_v50 = vpop.permute.xlu1 %1087 }
 0x2e8   : > { %3354 = vmatmul.msk.bf16.gmra.mxu2 %vm653_vm13, %v899_v45 }
 0x2ee   : > { %v1020_v51 = vpop.permute.xlu1 %1019 }
 0x2ef   : > { %v1029_v52 = vsel %vm835_vm12, %v1020_v51, 0 }
 0x2f0   : > { %3357 = vmatmul.msk.bf16.vlgmr.msra.gmra.mxu0 %vm653_vm13, %v4241_v12  ;;  %1037 = vmatpush.bf16.msrb.mxu3 %v1029_v52 }
 0x2f8   : > { %3361 = vmatmul.msk.bf16.vlgmr.msra.gmra.mxu2 %vm653_vm13, %v1275_v44 }
 0x2fb   : > { %862 = vrot.lane.b32.xlu2 %v651_v29, %s5194_s30 }
 0x300   : > { %3358 = vmatmul.msk.bf16.gmra.mxu0 %vm653_vm13, %v1088_v50 }
 0x303   : > { %1258 = vrot.lane.b32.xlu2 %v676_v34, %s5200_s29  ;;  %658 = vadd.xlane.f32.xlu0 %v657_v53 }
 0x308   : > { %3362 = vmatmul.msk.bf16.gmra.mxu2 %vm653_vm13, %v1277_v47 }
 0x30b   : > { %1051 = vrot.lane.b32.xlu2 %v651_v29, %s5192_s12 }
 0x30c   : > { %v682_v59 = vpop.permute.xlu2 %681 }
 0x30d   : > { %v690_v63 = vsel %vm653_vm13, %v682_v59, 0.0 }
 0x313   : > { %685 = vrot.lane.b32.xlu2 %v677_v41, %s5204_s26 }
 0x314   : > { %v1239_v62 = vpop.permute.xlu2 %1238 }
 0x315   : > { %v1247_v4 = vsel %vm653_vm13, %v1239_v62, 0.0 }
 0x317   : > { %1260 = vrot.lane.b32.xlu0 %v677_v41, %s5200_s29 }
 0x31b   : > { %864 = vrot.lane.b32.xlu2 %v652_v55, %s5194_s30 }
 0x31f   : > { %1071 = vrot.lane.b32.xlu0 %v677_v41, %s5198_s28 }
 0x323   : > { %1242 = vrot.lane.b32.xlu2 %v652_v55, %s5196_s11  ;;  %v861_v30 = vpop.permute.xlu0 %860 }
 0x324   : > { %v879_v35 = vpop.permute.xlu1 %878  ;;  %v869_v7 = vsel %vm653_vm13, %v861_v30, 0.0 }
 0x325   : > { %v887_v56 = vsel %vm653_vm13, %v879_v35, 0.0 }
 0x326   : > { %888 = vadd.xlane.f32.xlu1 %v887_v56 }
 0x327   : > { %1053 = vrot.lane.b32.xlu0 %v652_v55, %s5192_s12 }
 0x32b   : > { %v1257_v57 = vpop.permute.xlu0 %1256 }
 0x32c   : > { %v1265_v58 = vsel %vm653_vm13, %v1257_v57, 0.0  ;;  %v1068_v2 = vpop.permute.xlu1 %1067 }
 0x32d   : > { %v1076_v16 = vsel %vm653_vm13, %v1068_v2, 0.0 }
 0x32e   : > { %1266 = vadd.xlane.f32.xlu1 %v1265_v58 }
 0x333   : > { %v1050_v60 = vpop.permute.xlu0 %1049 }
 0x334   : > { %v1058_v10 = vsel %vm653_vm13, %v1050_v60, 0.0  ;;  %v1241_v11 = vpop.permute.xlu1 %1240 }
 0x335   : > { %v1250_v40 = vsel %vm653_vm13, %v1241_v11, 0.0 }
 0x33b   : > { %v881_v0 = vpop.permute.xlu0 %880 }
 0x33c   : > { %v890_v19 = vsel %vm653_vm13, %v881_v0, 0.0 }
 0x343   : > { %v684_v8 = vpop.permute.xlu0 %683 }
 0x344   : > { %v883_v20 = vpop.permute.xlu1 %882  ;;  %v693_v29 = vsel %vm653_vm13, %v684_v8, 0.0 }
 0x345   : > { %v893_v25 = vsel %vm653_vm13, %v883_v20, 0.0 }
 0x34b   : > { %v1070_v21 = vpop.permute.xlu0 %1069 }
 0x34c   : > { %661 = vadd.xlane.f32.xlu2 %v660_v61  ;;  %v4291_v17 = vpop.f32.mrf.mxu0  ;;  %v1079_v27 = vsel %vm653_vm13, %v1070_v21, 0.0  ;;  %v409_v21 = vlaneseq }
 0x351   : > { %691 = vadd.xlane.f32.xlu0 %v690_v63 }
 0x354   : > { %1248 = vadd.xlane.f32.xlu2 %v1247_v4  ;;  %v4295_v5 = vpop.f32.mrf.mxu0 }
 0x356   : > { %v4297_v6 = vpop.xlane.xlu2 %655 }
 0x359   : > { %870 = vadd.xlane.f32.xlu0 %v869_v7 }
 0x35b   : > { %v4300_v9 = vpop.f32.mrf.mxu2 }
 0x35c   : > { %1059 = vadd.xlane.f32.xlu2 %v1058_v10 }
 0x35d   : > { %v4303_v12 = vpop.f32.mrf.mxu0 }
 0x35e   : > { %v863_v13 = vpop.permute.xlu2 %862 }
 0x35f   : > { %v872_v15 = vsel %vm653_vm13, %v863_v13, 0.0 }
 0x360   : > { %873 = vadd.xlane.f32.xlu1 %v872_v15 }
 0x361   : > { %1077 = vadd.xlane.f32.xlu0 %v1076_v16 }
 0x363   : > { %v4307_v18 = vpop.f32.mrf.mxu2 }
 0x364   : > { %891 = vadd.xlane.f32.xlu2 %v890_v19 }
 0x365   : > { %v743_v23 = vpop.f32.mrf.mxu0 }
 0x366   : > { %v1259_v24 = vpop.permute.xlu2 %1258  ;;  %v410_v23 = vand.u32 127, %v409_v21 }
 0x367   : > { %v1268_v34 = vsel %vm653_vm13, %v1259_v24, 0.0 }
 0x368   : > { %894 = vadd.xlane.f32.xlu1 %v893_v25  ;;  %vm411_vm14 = vcmp.lt.s32.totalorder %v410_v23, 17 }
 0x369   : > { %1080 = vadd.xlane.f32.xlu0 %v1079_v27  ;;  %v970_v27 = vmul.f32 2.0, %v4300_v9 }
 0x36b   : > { %v4312_v28 = vpop.f32.mrf.mxu2 }
 0x36c   : > { %694 = vadd.xlane.f32.xlu2 %v693_v29  ;;  %v971_v29 = vmul.f32 2.0, %v4307_v18 }
 0x36d   : > { %v4315_v31 = vpop.f32.mrf.mxu0 }
 0x36e   : > { %v1052_v32 = vpop.permute.xlu2 %1051 }
 0x36f   : > { %v1061_v44 = vsel %vm653_vm13, %v1052_v32, 0.0 }
 0x373   : > { %v932_v33 = vpop.f32.mrf.mxu2 }
 0x374   : > { %1269 = vadd.xlane.f32.xlu2 %v1268_v34 }
 0x375   : > { %v4318_v36 = vpop.f32.mrf.mxu0 }
 0x376   : > { %v686_v37 = vpop.permute.xlu2 %685  ;;  %v4326_v42 = vpop.xlane.xlu0 %658 }
 0x377   : > { %v696_v38 = vsel %vm653_vm13, %v686_v37, 0.0 }
 0x378   : > { %697 = vadd.xlane.f32.xlu1 %v696_v38  ;;  %v972_v38 = vmul.f32 2.0, %v4312_v28 }
 0x37b   : > { %v4321_v39 = vpop.f32.mrf.mxu2 }
 0x37c   : > { %1251 = vadd.xlane.f32.xlu2 %v1250_v40 }
 0x37d   : > { %v4324_v41 = vpop.f32.mrf.mxu0 }
 0x37e   : > { %v865_v46 = vpop.permute.xlu2 %864 }
 0x37f   : > { %v875_v50 = vsel %vm653_vm13, %v865_v46, 0.0  ;;  %v3949_v46 = vmov -1e+30  }
 0x383   : > { %v4328_v43 = vpop.f32.mrf.mxu2 }
 0x384   : > { %1062 = vadd.xlane.f32.xlu2 %v1061_v44 }
 0x385   : > { %v1121_v45 = vpop.f32.mrf.mxu0 }
 0x386   : > { %v1243_v54 = vpop.permute.xlu2 %1242 }
 0x387   : > { %v1253_v30 = vsel %vm653_vm13, %v1243_v54, 0.0 }
 0x389   : > { %v1261_v47 = vpop.permute.xlu0 %1260 }
 0x38a   : > { %v1271_v48 = vsel %vm653_vm13, %v1261_v47, 0.0  ;;  %v4351_v47 = vsel %vm411_vm14, 0.0, %v3949_v46 }
 0x38b   : > { %v4332_v49 = vpop.f32.mrf.mxu2  ;;  %1272 = vadd.xlane.f32.xlu1 %v1271_v48 }
 0x38c   : > { %876 = vadd.xlane.f32.xlu2 %v875_v50 }
 0x391   : > { %v1072_v51 = vpop.permute.xlu0 %1071 }
 0x392   : > { %v1082_v52 = vsel %vm653_vm13, %v1072_v51, 0.0 }
 0x393   : > { %v1310_v53 = vpop.f32.mrf.mxu2  ;;  %1083 = vadd.xlane.f32.xlu1 %v1082_v52 }
 0x399   : > { %v889_v55 = vpop.xlane.xlu1 %888  ;;  %v1054_v35 = vpop.permute.xlu0 %1053 }
 0x39a   : > { %934 = vxpose.xlu0.b32.start [1/3] (short) (narrow) %v889_v55, 8  ;;  %v1064_v56 = vsel %vm653_vm13, %v1054_v35, 0.0  ;;  %v781_v35 = vmul.f32 2.0, %v4291_v17 }
 0x39b   : > { %1254 = vadd.xlane.f32.xlu1 %v1253_v30 }
 0x3a1   : > { %v1267_v57 = vpop.xlane.xlu1 %1266 }
 0x3a3   : > { %1065 = vadd.xlane.f32.xlu1 %v1064_v56 }
 0x3b5   : > { %1312 = vxpose.xlu2.b32.start [1/3] (short) (narrow) %v1267_v57, 8 }
 0x3bf   : > { %v4338_v58 = vpop.xlane.xlu2 %661 }
 0x3c4   : > { %v692_v61 = vpop.xlane.xlu0 %691 }
 0x3c7   : > { %v4340_v59 = vpop.xlane.xlu2 %1248 }
 0x3cc   : > { %v871_v0 = vpop.xlane.xlu0 %870 }
 0x3cf   : > { %v4342_v60 = vpop.xlane.xlu2 %1059 }
 0x3d3   : > { %v874_v62 = vpop.xlane.xlu1 %873 }
 0x3d4   : > { %v1078_v7 = vpop.xlane.xlu0 %1077 }
 0x3d7   : > { %v892_v63 = vpop.xlane.xlu2 %891 }
 0x3d8   : > { %935 = vxpose.xlu0.b32.cont [2/3] (short) (narrow) %v892_v63, 8 }
 0x3db   : > { %v895_v2 = vpop.xlane.xlu1 %894 }
 0x3dc   : > { %v1081_v11 = vpop.xlane.xlu0 %1080 }
 0x3dd   : > { %745 = vxpose.xlu1.b32.start [1/3] (short) (narrow) %v692_v61, 8  ;;  %v782_v61 = vmul.f32 2.0, %v4295_v5 }
 0x3df   : > { %v695_v4 = vpop.xlane.xlu2 %694 }
 0x3e0   : > { %936 = vxpose.xlu0.b32.end [3/3] (short) (narrow) %v895_v2, 8 }
 0x3e5   : > { %746 = vxpose.xlu1.b32.cont [2/3] (short) (narrow) %v695_v4, 8 }
 0x3e7   : > { %v1270_v8 = vpop.xlane.xlu2 %1269 }
 0x3e8   : > { %1313 = vxpose.xlu2.b32.cont [2/3] (short) (narrow) %v1270_v8, 8  ;;  %1123 = vxpose.xlu0.b32.start [1/3] (short) (narrow) %v1078_v7, 8 }
 0x3eb   : > { %v698_v10 = vpop.xlane.xlu1 %697 }
 0x3ed   : > { %747 = vxpose.xlu1.b32.end [3/3] (short) (narrow) %v698_v10, 8 }
 0x3ef   : > { %v4344_v16 = vpop.xlane.xlu2 %1251 }
 0x3f0   : > { %1124 = vxpose.xlu0.b32.cont [2/3] (short) (narrow) %v1081_v11, 8 }
 0x3f7   : > { %v1063_v19 = vpop.xlane.xlu2 %1062 }
 0x3fe   : > { %v1273_v13 = vpop.xlane.xlu1 %1272 }
 0x3ff   : > { %1314 = vxpose.xlu2.b32.end [3/3] (short) (narrow) %v1273_v13, 8  ;;  %v877_v32 = vpop.xlane.xlu2 %876 }
 0x406   : > { %v1084_v15 = vpop.xlane.xlu1 %1083 }
 0x407   : > { %1125 = vxpose.xlu0.b32.end [3/3] (short) (narrow) %v1084_v15, 8 }
 0x40e   : > { %v4346_v20 = vpop.xlane.xlu1 %1254 }
 0x416   : > { %v1066_v40 = vpop.xlane.xlu1 %1065 }
 0x474   : > { %v950_v24 = vpop.trf.xlu0 }
 0x475   : > { %v966_v25 = vperm.slane %v950_v24, 0 }
 0x477   : > { %v967_v33 = vadd.f32 %v966_v25, %v871_v0  ;;  %v968_v34 = vadd.f32 %v966_v25, %v874_v62  ;;  %v969_v37 = vadd.f32 %v966_v25, %v877_v32  ;;  %v1161_v25 = vmul.f32 2.0, %v4324_v41 }
 0x479   : > { %v974_v44 = vsub.f32 %v968_v34, %v971_v29  ;;  %v973_v45 = vsub.f32 %v967_v33, %v970_v27  ;;  %v975_v51 = vsub.f32 %v969_v37, %v972_v38 }
 0x47b   : > { %v977_v48 = vsub.f32 0.0, %v974_v44  ;;  %v976_v50 = vsub.f32 0.0, %v973_v45  ;;  %v978_v53 = vsub.f32 0.0, %v975_v51  ;;  %v1348_v44 = vmul.f32 2.0, %v4321_v39 }
 0x47d   : > { %v4354_v9 = vadd.f32 %v977_v48, %v4351_v47  ;;  %v4357_v18 = vadd.f32 %v976_v50, %v4351_v47  ;;  %v4364_v30 = vadd.f32 %v978_v53, %v4351_v47  ;;  %v1349_v50 = vmul.f32 2.0, %v4328_v43 }
 0x47f   : > { %v985_v52 = vsel %vm793_vm15, %v4354_v9, -inf  ;;  %v982_v28 = vsel %vm793_vm15, %v4357_v18, -inf  ;;  %v988_v63 = vsel %vm793_vm15, %v4364_v30, -inf }
 0x480   : > { %986 = vmax.xlane.f32.xlu1 %v985_v52  ;;  %983 = vmax.xlane.f32.xlu2 %v982_v28 }
 0x481   : > { %v761_v54 = vpop.trf.xlu1 }
 0x482   : > { %v777_v55 = vperm.slane %v761_v54, 0 }
 0x484   : > { %v778_v56 = vadd.f32 %v777_v55, %v4297_v6  ;;  %v779_v57 = vadd.f32 %v777_v55, %v4326_v42  ;;  %v780_v7 = vadd.f32 %v777_v55, %v4338_v58  ;;  %v783_v42 = vmul.f32 2.0, %v4303_v12 }
 0x485   : > { %v1160_v12 = vmul.f32 2.0, %v4318_v36 }
 0x486   : > { %v784_v62 = vsub.f32 %v778_v56, %v781_v35  ;;  %v785_v2 = vsub.f32 %v779_v57, %v782_v61  ;;  %v786_v8 = vsub.f32 %v780_v7, %v783_v42 }
 0x488   : > { %989 = vmax.xlane.f32.xlu1 %v988_v63  ;;  %v787_v0 = vsub.f32 0.0, %v784_v62  ;;  %v788_v6 = vsub.f32 0.0, %v785_v2  ;;  %v789_v11 = vsub.f32 0.0, %v786_v8 }
 0x48a   : > { %v4373_v4 = vadd.f32 %v787_v0, %v4351_v47  ;;  %v4380_v5 = vadd.f32 %v788_v6, %v4351_v47  ;;  %v4385_v13 = vadd.f32 %v789_v11, %v4351_v47 }
 0x48c   : > { %v794_v17 = vsel %vm793_vm15, %v4373_v4, -inf  ;;  %v797_v10 = vsel %vm793_vm15, %v4380_v5, -inf  ;;  %v800_v21 = vsel %vm793_vm15, %v4385_v13, -inf }
 0x48d   : > { %795 = vmax.xlane.f32.xlu2 %v794_v17 }
 0x495   : > { %798 = vmax.xlane.f32.xlu2 %v797_v10 }
 0x49b   : > { %v1139_v58 = vpop.trf.xlu0 }
 0x49c   : > { %v1155_v15 = vperm.slane %v1139_v58, 0 }
 0x49d   : > { %801 = vmax.xlane.f32.xlu2 %v800_v21 }
 0x49e   : > { %v1157_v23 = vadd.f32 %v1155_v15, %v1063_v19  ;;  %v1158_v24 = vadd.f32 %v1155_v15, %v1066_v40  ;;  %v1328_v19 = vpop.trf.xlu2  ;;  %v1156_v28 = vadd.f32 %v1155_v15, %v4342_v60  ;;  %v1350_v60 = vmul.f32 2.0, %v4332_v49 }
 0x49f   : > { %v1344_v38 = vperm.slane %v1328_v19, 0 }
 0x4a0   : > { %v1163_v27 = vsub.f32 %v1157_v23, %v1160_v12  ;;  %v1164_v32 = vsub.f32 %v1158_v24, %v1161_v25 }
 0x4a1   : > { %1397 = vrot.lane.b32.xlu1 %v4208_v3, %s5196_s11  ;;  %v1345_v40 = vadd.f32 %v1344_v38, %v4340_v59  ;;  %v1346_v46 = vadd.f32 %v1344_v38, %v4344_v16  ;;  %v1159_v59 = vmul.f32 2.0, %v4315_v31  ;;  %v1347_v55 = vadd.f32 %v1344_v38, %v4346_v20 }
 0x4a2   : > { %v1166_v29 = vsub.f32 0.0, %v1163_v27  ;;  %v1167_v37 = vsub.f32 0.0, %v1164_v32 }
 0x4a3   : > { %v1351_v45 = vsub.f32 %v1345_v40, %v1348_v44  ;;  %v1352_v52 = vsub.f32 %v1346_v46, %v1349_v50  ;;  %v1162_v16 = vsub.f32 %v1156_v28, %v1159_v59  ;;  %v1353_v57 = vsub.f32 %v1347_v55, %v1350_v60 }
 0x4a4   : > { %v4394_v33 = vadd.f32 %v1166_v29, %v4351_v47  ;;  %v4399_v36 = vadd.f32 %v1167_v37, %v4351_v47 }
 0x4a5   : > { %v1354_v48 = vsub.f32 0.0, %v1351_v45  ;;  %v1355_v54 = vsub.f32 0.0, %v1352_v52  ;;  %v1165_v35 = vsub.f32 0.0, %v1162_v16  ;;  %v1356_v61 = vsub.f32 0.0, %v1353_v57 }
 0x4a6   : > { %v1174_v34 = vsel %vm793_vm15, %v4394_v33, -inf  ;;  %v1177_v41 = vsel %vm793_vm15, %v4399_v36, -inf }
 0x4a7   : > { %1175 = vmax.xlane.f32.xlu0 %v1174_v34  ;;  %v4410_v51 = vadd.f32 %v1354_v48, %v4351_v47  ;;  %v4417_v39 = vadd.f32 %v1355_v54, %v4351_v47  ;;  %v4424_v56 = vadd.f32 %v1165_v35, %v4351_v47  ;;  %v4429_v62 = vadd.f32 %v1356_v61, %v4351_v47 }
 0x4a9   : > { %v1360_v53 = vsel %vm793_vm15, %v4410_v51, -inf  ;;  %v1363_v43 = vsel %vm793_vm15, %v4417_v39, -inf  ;;  %v1171_v31 = vsel %vm793_vm15, %v4424_v56, -inf  ;;  %v1366_v20 = vsel %vm793_vm15, %v4429_v62, -inf }
 0x4af   : > { %1178 = vmax.xlane.f32.xlu0 %v1177_v41 }
 0x4b5   : > { %1017 = vrot.lane.b32.xlu2 %v4206_v1, %s5194_s30 }
 0x4cb   : > { %1361 = vmax.xlane.f32.xlu1 %v1360_v53 }
 0x4d3   : > { %1364 = vmax.xlane.f32.xlu1 %v1363_v43 }
 0x4db   : > { %1172 = vmax.xlane.f32.xlu1 %v1171_v31 }
 0x4e3   : > { %1367 = vmax.xlane.f32.xlu1 %v1366_v20 }
 0x4f3   : > { %v984_v63 = vpop.xlane.xlu2 %983  ;;  %v987_v0 = vpop.xlane.xlu1 %986 }
 0x4f4   : > { %v991_v49 = vsub.f32 %v4357_v18, %v984_v63  ;;  %v992_v7 = vsub.f32 %v4354_v9, %v987_v0 }
 0x4f6   : > { %v994_v2 = vmul.f32 1.442695, %v991_v49  ;;  %v996_v17 = vmul.f32 1.442695, %v992_v7 }
 0x4f8   : > { %3746 = vpow2.f32 %v994_v2 }
 0x4f9   : > { %3748 = vpow2.f32 %v996_v17 }
 0x4fb   : > { %v990_v58 = vpop.xlane.xlu1 %989 }
 0x4fc   : > { %v993_v18 = vsub.f32 %v4364_v30, %v990_v58 }
 0x4fe   : > { %v4435_v6 = vpop.eup %3746  ;;  %v998_v23 = vmul.f32 1.442695, %v993_v18 }
 0x4ff   : > { %v1000_v42 = vsel %vm793_vm15, %v4435_v6, 0.0  ;;  %v4440_v15 = vpop.eup %3748 }
 0x500   : > { %v796_v8 = vpop.xlane.xlu2 %795  ;;  %1001 = vadd.xlane.f32.xlu1 %v1000_v42  ;;  %v1003_v9 = vsel %vm793_vm15, %v4440_v15, 0.0 }
 0x501   : > { %v803_v10 = vsub.f32 %v4373_v4, %v796_v8 }
 0x503   : > { %v806_v11 = vmul.f32 1.442695, %v803_v10 }
 0x505   : > { %3750 = vpow2.f32 %v806_v11 }
 0x508   : > { %v799_v21 = vpop.xlane.xlu2 %798  ;;  %1004 = vadd.xlane.f32.xlu1 %v1003_v9 }
 0x509   : > { %v804_v12 = vsub.f32 %v4380_v5, %v799_v21 }
 0x50b   : > { %v808_v24 = vmul.f32 1.442695, %v804_v12  ;;  %v4446_v25 = vpop.eup %3750 }
 0x50c   : > { %v812_v4 = vsel %vm793_vm15, %v4446_v25, 0.0 }
 0x50d   : > { %3752 = vpow2.f32 %v808_v24 }
 0x50e   : > { %3754 = vpow2.f32 %v998_v23 }
 0x510   : > { %v802_v27 = vpop.xlane.xlu2 %801  ;;  %813 = vadd.xlane.f32.xlu1 %v812_v4 }
 0x511   : > { %v805_v30 = vsub.f32 %v4385_v13, %v802_v27 }
 0x513   : > { %v4451_v29 = vpop.eup %3752  ;;  %v810_v32 = vmul.f32 1.442695, %v805_v30  ;;  %v1398_v37 = vpop.permute.xlu1 %1397 }
 0x514   : > { %v815_v34 = vsel %vm793_vm15, %v4451_v29, 0.0  ;;  %v4455_v5 = vpop.eup %3754  ;;  %v1407_v38 = vsel %vm835_vm12, %v1398_v37, 0 }
 0x515   : > { %816 = vadd.xlane.f32.xlu2 %v815_v34  ;;  %3756 = vpow2.f32 %v810_v32  ;;  %v1006_v41 = vsel %vm793_vm15, %v4455_v5, 0.0 }
 0x518   : > { %v1018_v19 = vpop.permute.xlu2 %1017  ;;  %1007 = vadd.xlane.f32.xlu1 %v1006_v41 }
 0x519   : > { %1038 = vmatpush.bf16.msrb.mxu3 %v1018_v19 }
 0x51a   : > { %v1176_v54 = vpop.xlane.xlu0 %1175 }
 0x51b   : > { %v4460_v13 = vpop.eup %3756 }
 0x51c   : > { %v818_v40 = vsel %vm793_vm15, %v4460_v13, 0.0 }
 0x51d   : > { %1415 = vmatpush.bf16.msra.mxu3 %v1407_v38 }
 0x520   : > { %819 = vadd.xlane.f32.xlu1 %v818_v40 }
 0x53e   : > { %v1362_v44 = vpop.xlane.xlu1 %1361 }
 0x53f   : > { %v1369_v45 = vsub.f32 %v4410_v51, %v1362_v44  ;;  %v1181_v51 = vsub.f32 %v4394_v33, %v1176_v54 }
 0x541   : > { %v1372_v46 = vmul.f32 1.442695, %v1369_v45  ;;  %v1185_v35 = vmul.f32 1.442695, %v1181_v51 }
 0x543   : > { %3758 = vpow2.f32 %v1372_v46 }
 0x546   : > { %v1365_v48 = vpop.xlane.xlu1 %1364 }
 0x547   : > { %v1370_v50 = vsub.f32 %v4417_v39, %v1365_v48 }
 0x549   : > { %v4466_v52 = vpop.eup %3758  ;;  %v1374_v28 = vmul.f32 1.442695, %v1370_v50 }
 0x54a   : > { %v1378_v53 = vsel %vm793_vm15, %v4466_v52, 0.0 }
 0x54b   : > { %3760 = vpow2.f32 %v1374_v28  ;;  %1379 = vadd.xlane.f32.xlu2 %v1378_v53 }
 0x54e   : > { %v1173_v59 = vpop.xlane.xlu1 %1172 }
 0x54f   : > { %v1180_v16 = vsub.f32 %v4424_v56, %v1173_v59 }
 0x551   : > { %v4471_v55 = vpop.eup %3760  ;;  %v1183_v43 = vmul.f32 1.442695, %v1180_v16 }
 0x552   : > { %v1381_v39 = vsel %vm793_vm15, %v4471_v55, 0.0 }
 0x553   : > { %3762 = vpow2.f32 %v1183_v43  ;;  %1382 = vadd.xlane.f32.xlu1 %v1381_v39 }
 0x554   : > { %3764 = vpow2.f32 %v1185_v35 }
 0x556   : > { %v1368_v33 = vpop.xlane.xlu1 %1367 }
 0x557   : > { %v1371_v49 = vsub.f32 %v4429_v62, %v1368_v33 }
 0x559   : > { %v4476_v60 = vpop.eup %3762  ;;  %v1376_v8 = vmul.f32 1.442695, %v1371_v49 }
 0x55a   : > { %v1189_v57 = vsel %vm793_vm15, %v4476_v60, 0.0  ;;  %v4480_v31 = vpop.eup %3764 }
 0x55b   : > { %1190 = vadd.xlane.f32.xlu0 %v1189_v57  ;;  %v1192_v56 = vsel %vm793_vm15, %v4480_v31, 0.0 }
 0x563   : > { %1206 = vrot.lane.b32.xlu2 %v4206_v1, %s5192_s12  ;;  %1193 = vadd.xlane.f32.xlu0 %v1192_v56 }
 0x56c   : > { %1395 = vrot.lane.b32.xlu1 %v4206_v1, %s5196_s11  ;;  %s5216_s11 = smov 96  }
 0x573   : > { %v1002_v61 = vpop.xlane.xlu1 %1001 }
 0x574   : > { %3766 = vrcp.f32 %v1002_v61 }
 0x577   : > { %1208 = vrot.lane.b32.xlu0 %v4208_v3, %s5192_s12  ;;  %v1179_v3 = vpop.xlane.xlu0 %1178  ;;  %s350_s12 = sand.u32 1, %s3931_s14  }
 0x578   : > { %v1182_v62 = vsub.f32 %v4399_v36, %v1179_v3  ;;  %s3209_s20 = scalar_lea.sflag [#allocation3], %s350_s12 }
 0x57a   : > { %v3767_v63 = vpop.eup %3766  ;;  %v1187_v12 = vmul.f32 1.442695, %v1182_v62 }
 0x57b   : > { %v1005_v20 = vpop.xlane.xlu1 %1004  ;;  %v1012_v2 = vmul.f32 %v3767_v63, %v4435_v6 }
 0x57c   : > { %3768 = vrcp.f32 %v1005_v20 }
 0x582   : > { %v3769_v0 = vpop.eup %3768 }
 0x583   : > { %v1013_v7 = vmul.f32 %v3769_v0, %v4440_v15  ;;  %v814_v17 = vpop.xlane.xlu1 %813 }
 0x584   : > { %3770 = vrcp.f32 %v814_v17 }
 0x585   : > { %v1015_v42 = vpack.c.bf16 %v1013_v7, %v1012_v2 }
 0x587   : > { %3355 = vmatmul.msk.bf16.vlgmr.msrb.gmra.mxu3 %vm793_vm15, %v1015_v42 }
 0x588   : > { %v817_v1 = vpop.xlane.xlu2 %816 }
 0x589   : > { %3772 = vrcp.f32 %v817_v1 }
 0x58a   : > { %3774 = vpow2.f32 %v1376_v8  ;;  %v3771_v11 = vpop.eup %3770 }
 0x58b   : > { %v1008_v10 = vpop.xlane.xlu1 %1007  ;;  %v824_v6 = vmul.f32 %v3771_v11, %v4446_v25 }
 0x58c   : > { %3776 = vrcp.f32 %v1008_v10  ;;  %v3622_v10 = vld [vmem:[%s5185_s4 + $0x18] sm:$0xff] }
 0x58d   : > { %1517 = vmatpush.bf16.msrb.mxu0 %v3622_v10  ;;  %v3626_v10 = vld [vmem:[%s5186_s5 + $0x18] sm:$0xff] }
 0x58f   : > { %v3773_v58 = vpop.eup %3772 }
 0x590   : > { %v825_v15 = vmul.f32 %v3773_v58, %v4451_v29  ;;  %v3775_v18 = vpop.eup %3774 }
 0x591   : > { %v1384_v4 = vsel %vm793_vm15, %v3775_v18, 0.0 }
 0x592   : > { %v827_v9 = vpack.c.bf16 %v825_v15, %v824_v6  ;;  %v3777_v21 = vpop.eup %3776  ;;  %v3621_v15 = vld [vmem:[%s5185_s4 + $0x10] sm:$0xff] }
 0x593   : > { %v820_v23 = vpop.xlane.xlu1 %819  ;;  %v1014_v24 = vmul.f32 %v3777_v21, %v4455_v5  ;;  %1518 = vmatpush.bf16.msrb.mxu0 %v3621_v15  ;;  %v3623_v15 = vld [vmem:[%s5186_s5] sm:$0xff] }
 0x594   : > { %3351 = vmatmul.msk.bf16.vlgmr.msrb.gmra.mxu1 %vm793_vm15, %v827_v9  ;;  %3778 = vrcp.f32 %v820_v23  ;;  %v3619_v9 = vld [vmem:[%s5185_s4] sm:$0xff] }
 0x595   : > { %v1016_v27 = vpack.c.bf16 %v1014_v24, %v1014_v24  ;;  %3780 = vpow2.f32 %v1187_v12 }
 0x596   : > { %1385 = vadd.xlane.f32.xlu1 %v1384_v4 }
 0x597   : > { %3356 = vmatmul.msk.bf16.gmra.mxu3 %vm793_vm15, %v1016_v27 }
 0x59a   : > { %v3779_v36 = vpop.eup %3778 }
 0x59b   : > { %v3781_v25 = vpop.eup %3780  ;;  %v826_v30 = vmul.f32 %v3779_v36, %v4460_v13 }
 0x59c   : > { %v1195_v29 = vsel %vm793_vm15, %v3781_v25, 0.0 }
 0x59d   : > { %v828_v32 = vpack.c.bf16 %v826_v30, %v826_v30 }
 0x5a1   : > { %1196 = vadd.xlane.f32.xlu0 %v1195_v29 }
 0x5a4   : > { %3352 = vmatmul.msk.bf16.gmra.mxu1 %vm793_vm15, %v828_v32 }
 0x5be   : > { %v1380_v5 = vpop.xlane.xlu2 %1379 }
 0x5c6   : > { %v1383_v34 = vpop.xlane.xlu1 %1382  ;;  %v1207_v54 = vpop.permute.xlu2 %1206 }
 0x5c7   : > { %3782 = vrcp.f32 %v1383_v34 }
 0x5c8   : > { %3784 = vrcp.f32 %v1380_v5 }
 0x5cd   : > { %v3783_v41 = vpop.eup %3782 }
 0x5ce   : > { %v1191_v37 = vpop.xlane.xlu0 %1190  ;;  %v3785_v19 = vpop.eup %3784  ;;  %v1391_v38 = vmul.f32 %v3783_v41, %v4471_v55 }
 0x5cf   : > { %v1390_v40 = vmul.f32 %v3785_v19, %v4466_v52 }
 0x5d1   : > { %v1393_v13 = vpack.c.bf16 %v1391_v38, %v1390_v40 }
 0x5d6   : > { %v1194_v45 = vpop.xlane.xlu0 %1193 }
 0x5d7   : > { %3786 = vrcp.f32 %v1194_v45 }
 0x5d8   : > { %3788 = vrcp.f32 %v1191_v37 }
 0x5dd   : > { %v3787_v46 = vpop.eup %3786 }
 0x5de   : > { %v1396_v44 = vpop.permute.xlu1 %1395  ;;  %v3789_v28 = vpop.eup %3788  ;;  %v1202_v53 = vmul.f32 %v3787_v46, %v4480_v31 }
 0x5df   : > { %1416 = vmatpush.bf16.msra.mxu3 %v1396_v44  ;;  %v1201_v59 = vmul.f32 %v3789_v28, %v4476_v60 }
 0x5e1   : > { %v1204_v52 = vpack.c.bf16 %v1202_v53, %v1201_v59 }
 0x5e2   : > { %3363 = vmatmul.msk.bf16.vlgmr.msra.gmra.mxu3 %vm793_vm15, %v1393_v13 }
 0x5e9   : > { %v1209_v48 = vpop.permute.xlu0 %1208 }
 0x5ea   : > { %v1218_v50 = vsel %vm835_vm12, %v1209_v48, 0 }
 0x5eb   : > { %1226 = vmatpush.bf16.msra.mxu1 %v1218_v50  ;;  %v4545_v50 = vld [vmem:[%s5188_s7] sm:$0xff] }
 0x5ec   : > { %v1534_v28 = vperm.slane %v4545_v50, 4 }
 0x5ef   : > { %1227 = vmatpush.bf16.msra.mxu1 %v1207_v54 }
 0x5f2   : > { %3359 = vmatmul.msk.bf16.vlgmr.msra.gmra.mxu1 %vm793_vm15, %v1204_v52 }
 0x5f3   : > { %1656 = vmatpush.bf16.msrb.mxu1 %v3626_v10 }
 0x609   : > { %v1386_v16 = vpop.xlane.xlu1 %1385 }
 0x60a   : > { %3790 = vrcp.f32 %v1386_v16  ;;  %v1040_v55 = vpop.f32.mrf.mxu3 }
 0x610   : > { %v3791_v51 = vpop.eup %3790 }
 0x611   : > { %v848_v43 = vpop.f32.mrf.mxu1  ;;  %v1392_v39 = vmul.f32 %v3791_v51, %v3775_v18  ;;  %v3620_v18 = vld [vmem:[%s5185_s4 + $0x8] sm:$0xff] }
 0x612   : > { %v1042_v35 = vpop.f32.mrf.mxu3  ;;  %1519 = vmatpush.bf16.msrb.mxu0 %v3620_v18 }
 0x613   : > { %v1394_v57 = vpack.c.bf16 %v1392_v39, %v1392_v39  ;;  %v3708_v56 = vpack.i.bf16 %v1042_v35, %v1040_v55 }
 0x614   : > { %v1197_v33 = vpop.xlane.xlu0 %1196 }
 0x615   : > { %3792 = vrcp.f32 %v1197_v33  ;;  %3364 = vmatmul.msk.bf16.gmra.mxu3 %vm793_vm15, %v1394_v57  ;;  %3709 = vrot.lane.b32.xlu2 %v3708_v56, %s5200_s29 }
 0x616   : > { %1520 = vmatpush.bf16.msrb.mxu0 %v3619_v9 }
 0x619   : > { %v850_v60 = vpop.f32.mrf.mxu1 }
 0x61a   : > { %v1045_v61 = vpop.f32.mrf.mxu3 }
 0x61b   : > { %v3793_v31 = vpop.eup %3792  ;;  %1434 = vrot.lane.b32.xlu1 %v1045_v61, %s5200_s29  ;;  %s5212_s29 = smov 16  }
 0x61c   : > { %v1203_v20 = vmul.f32 %v3793_v31, %v3781_v25 }
 0x61e   : > { %v1205_v63 = vpack.c.bf16 %v1203_v20, %v1203_v20 }
 0x620   : > { %3360 = vmatmul.msk.bf16.gmra.mxu1 %vm793_vm15, %v1205_v63 }
 0x621   : > { %v853_v0 = vpop.f32.mrf.mxu1 }
 0x622   : > { %v1047_v49 = vpop.f32.mrf.mxu3 }
 0x629   : > { %v855_v2 = vpop.f32.mrf.mxu1 }
 0x665   : > { %v1418_v17 = vpop.f32.mrf.mxu3 }
 0x66d   : > { %v1420_v1 = vpop.f32.mrf.mxu3 }
 0x66e   : > { %v3718_v3 = vpack.i.bf16 %v1420_v1, %v1418_v17 }
 0x66f   : > { %v1229_v7 = vpop.f32.mrf.mxu1  ;;  %v3710_v21 = vpop.permute.xlu2 %3709 }
 0x670   : > { %v3712_v23 = vunpack.i.h.bf16 %v3710_v21  ;;  %v3711_v24 = vunpack.i.l.bf16 %v3710_v21 }
 0x672   : > { %v1463_v25 = vsel %vm653_vm13, %v848_v43, %v3711_v24  ;;  %v1464_v30 = vsel %vm653_vm13, %v850_v60, %v3712_v23 }
 0x677   : > { %v1231_v42 = vpop.f32.mrf.mxu1 }
 0x678   : > { %v3713_v8 = vpack.i.bf16 %v1231_v42, %v1229_v7 }
 0x67a   : > { %3714 = vrot.lane.b32.xlu2 %v3713_v8, %s5198_s28 }
 0x682   : > { %3719 = vrot.lane.b32.xlu2 %v3718_v3, %s5202_s27 }
 0x68d   : > { %v1435_v38 = vpop.permute.xlu1 %1434 }
 0x68e   : > { %v1465_v44 = vsel %vm653_vm13, %v853_v0, %v1435_v38 }
 0x698   : > { %v1423_v11 = vpop.f32.mrf.mxu3 }
 0x699   : > { %1458 = vrot.lane.b32.xlu0 %v1423_v11, %s5202_s27  ;;  %v3625_v11 = vld [vmem:[%s5186_s5 + $0x10] sm:$0xff]  ;;  %s5210_s27 = smov 64  }
 0x69a   : > { %1657 = vmatpush.bf16.msrb.mxu1 %v3625_v11 }
 0x69d   : > { %v1234_v58 = vpop.f32.mrf.mxu1 }
 0x69e   : > { %1446 = vrot.lane.b32.xlu2 %v1234_v58, %s5198_s28  ;;  %v3624_v58 = vld [vmem:[%s5186_s5 + $0x8] sm:$0xff]  ;;  %s5215_s28 = smov 112  }
 0x69f   : > { %1658 = vmatpush.bf16.msrb.mxu1 %v3624_v58  ;;  %v3630_v58 = vld [vmem:[%s5187_s6 + $0x18] sm:$0xff] }
 0x6a0   : > { %v1425_v62 = vpop.f32.mrf.mxu3  ;;  %1759 = vmatpush.bf16.msrb.mxu2 %v3630_v58 }
 0x6a3   : > { %1659 = vmatpush.bf16.msrb.mxu1 %v3623_v15  ;;  %v3627_v15 = vld [vmem:[%s5187_s6] sm:$0xff] }
 0x6a5   : > { %v1236_v6 = vpop.f32.mrf.mxu1 }
 0x6d4   : > { %v3715_v12 = vpop.permute.xlu2 %3714 }
 0x6d5   : > { %v3717_v4 = vunpack.i.h.bf16 %v3715_v12  ;;  %v3716_v27 = vunpack.i.l.bf16 %v3715_v12 }
 0x6d7   : > { %v1468_v34 = vsel %vm1466_vm2, %v1464_v30, %v3717_v4  ;;  %v1467_v5 = vsel %vm1466_vm2, %v1463_v25, %v3716_v27 }
 0x6dc   : > { %v3720_v36 = vpop.permute.xlu2 %3719 }
 0x6dd   : > { %v3722_v29 = vunpack.i.h.bf16 %v3720_v36  ;;  %v3721_v32 = vunpack.i.l.bf16 %v3720_v36 }
 0x6df   : > { %v1470_v37 = vsel %vm385_vm1, %v1467_v5, %v3721_v32  ;;  %v1471_v41 = vsel %vm385_vm1, %v1468_v34, %v3722_v29 }
 0x6e0   : > { %v1473_v19 = vpack.c.bf16 %v1471_v41, %v1470_v37  ;;  %v1604_v41 = vperm.slane %v4545_v50, 2 }
 0x6e2   : > { %3381 = vmatmul.msk.bf16.vlgmr.msrb.gmra.mxu0 %vm414_vm0, %v1473_v19 }
 0x6f8   : > { %v1447_v40 = vpop.permute.xlu2 %1446 }
 0x6f9   : > { %v1469_v13 = vsel %vm1466_vm2, %v1465_v44, %v1447_v40 }
 0x70b   : > { %v1459_v45 = vpop.permute.xlu0 %1458 }
 0x70c   : > { %v1472_v46 = vsel %vm385_vm1, %v1469_v13, %v1459_v45  ;;  %v1608_v45 = vperm.slane %v4545_v50, 3 }
 0x70d   : > { %v1474_v48 = vpack.c.bf16 %v1472_v46, %v1472_v46 }
 0x70f   : > { %3382 = vmatmul.msk.bf16.gmra.mxu0 %vm414_vm0, %v1474_v48 }
 0x75f   : > { %v1522_v53 = vpop.f32.mrf.mxu0 }
 0x760   : > { %v1531_v54 = vadd.f32 %v1522_v53, %v4083_v22  ;;  %v3875_v22 = vld [vmem:[%s5182_s1 + $0x10] sm:$0xff] }
 0x762   : > { %v4549_v59 = vadd.f32 %v1534_v28, %v1531_v54 }
 0x764   : > { %v1538_v52 = vsel %vm414_vm0, %v4549_v59, 0.0 }
 0x765   : > { %1539 = vadd.xlane.f32.xlu2 %v1538_v52 }
 0x767   : > { %v1524_v16 = vpop.f32.mrf.mxu0 }
 0x768   : > { %v1532_v55 = vadd.f32 %v1524_v16, %v4090_v26 }
 0x76a   : > { %v4554_v51 = vadd.f32 %v1534_v28, %v1532_v55 }
 0x76c   : > { %v1541_v43 = vsel %vm414_vm0, %v4554_v51, 0.0 }
 0x76d   : > { %1542 = vadd.xlane.f32.xlu1 %v1541_v43 }
 0x78c   : > { %v1527_v39 = vpop.f32.mrf.mxu0 }
 0x78d   : > { %v1533_v35 = vadd.f32 %v3875_v22, %v1527_v39 }
 0x78f   : > { %v4561_v57 = vadd.f32 %v1534_v28, %v1533_v35 }
 0x791   : > { %v1544_v56 = vsel %vm414_vm0, %v4561_v57, 0.0 }
 0x792   : > { %1545 = vadd.xlane.f32.xlu0 %v1544_v56 }
 0x794   : > { %v1529_v33 = vpop.f32.mrf.mxu0 }
 0x7d8   : > { %v1540_v26 = vpop.xlane.xlu2 %1539 }
 0x7d9   : > { %v1547_v60 = vmul.f32 %v1540_v26, %v4072_v14 }
 0x7db   : > { %v1550_v31 = vsub.f32 %v4549_v59, %v1547_v60 }
 0x7dd   : > { %v1553_v61 = vmul.f32 %v1550_v31, %v1550_v31 }
 0x7df   : > { %v1556_v20 = vsel %vm414_vm0, %v1553_v61, 0.0 }
 0x7e0   : > { %v1543_v63 = vpop.xlane.xlu1 %1542  ;;  %1557 = vadd.xlane.f32.xlu2 %v1556_v20 }
 0x7e1   : > { %v1548_v0 = vmul.f32 %v1543_v63, %v4072_v14 }
 0x7e3   : > { %v1551_v49 = vsub.f32 %v4554_v51, %v1548_v0 }
 0x7e5   : > { %v1554_v2 = vmul.f32 %v1551_v49, %v1551_v49 }
 0x7e7   : > { %v1559_v7 = vsel %vm414_vm0, %v1554_v2, 0.0 }
 0x7e8   : > { %1560 = vadd.xlane.f32.xlu2 %v1559_v7 }
 0x805   : > { %v1546_v17 = vpop.xlane.xlu0 %1545 }
 0x806   : > { %v1549_v42 = vmul.f32 %v1546_v17, %v4072_v14 }
 0x808   : > { %v4573_v8 = vsub.f32 %v4561_v57, %v1549_v42 }
 0x80a   : > { %v1555_v1 = vmul.f32 %v4573_v8, %v4573_v8 }
 0x80c   : > { %v1562_v3 = vsel %vm414_vm0, %v1555_v1, 0.0 }
 0x80d   : > { %1563 = vadd.xlane.f32.xlu2 %v1562_v3 }
 0x853   : > { %v1558_v62 = vpop.xlane.xlu2 %1557 }
 0x854   : > { %v1565_v6 = vmul.f32 %v1558_v62, %v4072_v14  ;;  %v3629_v62 = vld [vmem:[%s5187_s6 + $0x10] sm:$0xff] }
 0x855   : > { %1760 = vmatpush.bf16.msrb.mxu2 %v3629_v62  ;;  %v3476_v62 = vld [vmem:[%s5184_s3 + $0xb4] sm:$0xf0] }
 0x856   : > { %v1568_v18 = vadd.f32 1e-05, %v1565_v6  ;;  %v3628_v6 = vld [vmem:[%s5187_s6 + $0x8] sm:$0xff] }
 0x858   : > { %3794 = vrsqrt.f32 %v1568_v18  ;;  %vm1577_vm4 = vweird.f32 %v1568_v18 }
 0x859   : > { %1761 = vmatpush.bf16.msrb.mxu2 %v3628_v6  ;;  %v3482_v6 = vld [vmem:[%s5184_s3 + $0xb0] sm:$0xf] }
 0x85b   : > { %v1561_v9 = vpop.xlane.xlu2 %1560 }
 0x85c   : > { %v1566_v21 = vmul.f32 %v1561_v9, %v4072_v14 }
 0x85d   : > { %1762 = vmatpush.bf16.msrb.mxu2 %v3627_v15  ;;  %v3642_v15 = vld [vmem:[%s5184_s3 + $0xb8] sm:$0xf0] }
 0x85e   : > { %v3795_v12 = vpop.eup %3794  ;;  %v1569_v23 = vadd.f32 1e-05, %v1566_v21  ;;  %v1704_v21 = vsub.f32 0.0, %v4545_v50 }
 0x85f   : > { %v1572_v24 = vmul.f32 %v3795_v12, %v1568_v18  ;;  %vm1578_vm3 = vweird.f32 %v3795_v12  ;;  %v1682_v18 = vperm.slane %v4545_v50, 7 }
 0x860   : > { %3796 = vrsqrt.f32 %v1569_v23  ;;  %vm1579_vm5 = vmor %vm1577_vm4, %vm1578_vm3  ;;  %vm1587_vm7 = vweird.f32 %v1569_v23 }
 0x861   : > { %v1573_v4 = vmul.f32 %v3795_v12, %v1572_v24  ;;  %v1705_v24 = vperm.slane %v1704_v21, 6  ;;  %v3462_v21 = vld [vmem:[%s5184_s3 + $0x90] sm:$0xf] }
 0x863   : > { %v1574_v27 = vmul.f32 0.5, %v1573_v4 }
 0x865   : > { %v1575_v36 = vsub.f32 1.5, %v1574_v27 }
 0x866   : > { %v3797_v25 = vpop.eup %3796 }
 0x867   : > { %v1576_v30 = vmul.f32 %v3795_v12, %v1575_v36  ;;  %v1582_v29 = vmul.f32 %v3797_v25, %v1569_v23  ;;  %vm1588_vm6 = vweird.f32 %v3797_v25 }
 0x868   : > { %vm1589_vm8 = vmor %vm1587_vm7, %vm1588_vm6 }
 0x869   : > { %v1583_v32 = vmul.f32 %v3797_v25, %v1582_v29  ;;  %v1580_v34 = vsel %vm1579_vm5, %v3795_v12, %v1576_v30 }
 0x86a   : > { %v1601_v19 = vmul.f32 %v1580_v34, %v1550_v31 }
 0x86b   : > { %v1584_v5 = vmul.f32 0.5, %v1583_v32 }
 0x86c   : > { %v1605_v44 = vmul.f32 %v1604_v41, %v1601_v19 }
 0x86d   : > { %v1585_v37 = vsub.f32 1.5, %v1584_v5 }
 0x86e   : > { %v1609_v48 = vadd.f32 %v1608_v45, %v1605_v44 }
 0x86f   : > { %v1586_v38 = vmul.f32 %v3797_v25, %v1585_v37 }
 0x871   : > { %v1590_v40 = vsel %vm1589_vm8, %v3797_v25, %v1586_v38 }
 0x872   : > { %v1602_v13 = vmul.f32 %v1590_v40, %v1551_v49 }
 0x874   : > { %v1606_v46 = vmul.f32 %v1604_v41, %v1602_v13 }
 0x876   : > { %v1610_v28 = vadd.f32 %v1608_v45, %v1606_v46 }
 0x878   : > { %v1612_v53 = vpack.c.bf16 %v1610_v28, %v1609_v48 }
 0x87a   : > { %3399 = vmatmul.msk.bf16.vlgmr.msrb.gmra.mxu1 %vm414_vm0, %v1612_v53  ;;  %v1776_v53 = vperm.slane %v4545_v50, 5 }
 0x880   : > { %v1564_v54 = vpop.xlane.xlu2 %1563 }
 0x881   : > { %v1567_v52 = vmul.f32 %v1564_v54, %v4072_v14 }
 0x883   : > { %v1570_v16 = vadd.f32 1e-05, %v1567_v52 }
 0x885   : > { %3798 = vrsqrt.f32 %v1570_v16  ;;  %vm1597_vm10 = vweird.f32 %v1570_v16 }
 0x88b   : > { %v3799_v55 = vpop.eup %3798 }
 0x88c   : > { %v1592_v43 = vmul.f32 %v3799_v55, %v1570_v16  ;;  %vm1598_vm9 = vweird.f32 %v3799_v55 }
 0x88d   : > { %vm1599_vm11 = vmor %vm1597_vm10, %vm1598_vm9 }
 0x88e   : > { %v1593_v39 = vmul.f32 %v3799_v55, %v1592_v43 }
 0x890   : > { %v1594_v22 = vmul.f32 0.5, %v1593_v39 }
 0x892   : > { %v1595_v35 = vsub.f32 1.5, %v1594_v22 }
 0x894   : > { %v1596_v56 = vmul.f32 %v3799_v55, %v1595_v35 }
 0x896   : > { %v1600_v33 = vsel %vm1599_vm11, %v3799_v55, %v1596_v56 }
 0x897   : > { %v1603_v26 = vmul.f32 %v1600_v33, %v4573_v8 }
 0x899   : > { %v1607_v60 = vmul.f32 %v1604_v41, %v1603_v26 }
 0x89b   : > { %v1611_v31 = vadd.f32 %v1608_v45, %v1607_v60 }
 0x89d   : > { %v1613_v61 = vpack.c.bf16 %v1611_v31, %v1611_v31 }
 0x89f   : > { %3400 = vmatmul.msk.bf16.gmra.mxu1 %vm414_vm0, %v1613_v61 }
 0x8f7   : > { %v1661_v20 = vpop.f32.mrf.mxu1 }
 0x8f8   : > { %v1670_v63 = vmul.f32 %v1661_v20, %v1609_v48  ;;  %v1686_v0 = vmul.f32 2.0, %v1661_v20 }
 0x8fa   : > { %1692 = vrot.lane.b32.xlu2 %v1686_v0, %s5204_s26  ;;  %v1673_v49 = vsel %vm414_vm0, %v1670_v63, 0.0 }
 0x8fb   : > { %1674 = vadd.xlane.f32.xlu1 %v1673_v49 }
 0x8ff   : > { %v1663_v2 = vpop.f32.mrf.mxu1 }
 0x900   : > { %v1671_v7 = vmul.f32 %v1663_v2, %v1610_v28  ;;  %v1687_v42 = vmul.f32 2.0, %v1663_v2 }
 0x902   : > { %v1676_v17 = vsel %vm414_vm0, %v1671_v7, 0.0 }
 0x903   : > { %1677 = vadd.xlane.f32.xlu0 %v1676_v17 }
 0x914   : > { %1694 = vrot.lane.b32.xlu1 %v1687_v42, %s5204_s26 }
 0x91c   : > { %v1666_v8 = vpop.f32.mrf.mxu1 }
 0x91d   : > { %v1672_v1 = vmul.f32 %v1666_v8, %v1611_v31  ;;  %v1688_v11 = vmul.f32 2.0, %v1666_v8 }
 0x91f   : > { %v1679_v3 = vsel %vm414_vm0, %v1672_v1, 0.0 }
 0x920   : > { %1680 = vadd.xlane.f32.xlu0 %v1679_v3  ;;  %v3474_v3 = vld [vmem:[%s5184_s3 + $0xa8] sm:$0xf] }
 0x924   : > { %v1668_v10 = vpop.f32.mrf.mxu1 }
 0x925   : > { %v3641_v10 = vld [vmem:[%s5184_s3 + $0xb0] sm:$0xf0] }
 0x926   : > { %v3475_v58 = vor.u32 %v3641_v10, %v3474_v3 }
 0x928   : > { %1949 = vmatpush.bf16.msrb.mxu3 %v3475_v58 }
 0x934   : > { %1696 = vrot.lane.b32.xlu0 %v1688_v11, %s5204_s26  ;;  %v3640_v11 = vld [vmem:[%s5184_s3 + $0xac] sm:$0xf]  ;;  %s5211_s26 = smov 48  }
 0x954   : > { %v1693_v23 = vpop.permute.xlu2 %1692 }
 0x96e   : > { %v1675_v9 = vpop.xlane.xlu1 %1674 }
 0x96f   : > { %v1683_v12 = vadd.f32 %v1682_v18, %v1675_v9  ;;  %v3483_v9 = vor.u32 %v3642_v15, %v3482_v6 }
 0x971   : > { %v1701_v4 = vsub.f32 %v1683_v12, %v1693_v23  ;;  %1985 = vmatpush.bf16.msra.mxu1 %v3483_v9  ;;  %v3638_v12 = vld [vmem:[%s5184_s3 + $0x98] sm:$0xf0]  ;;  %v3637_v23 = vld [vmem:[%s5184_s3 + $0x94] sm:$0xf] }
 0x973   : > { %v1706_v36 = vmul.f32 %v1705_v24, %v1701_v4  ;;  %v3464_v4 = vld [vmem:[%s5184_s3 + $0x9c] sm:$0xf0] }
 0x975   : > { %v1709_v32 = vmul.f32 1.442695, %v1706_v36  ;;  %v3639_v36 = vld [vmem:[%s5184_s3 + $0xa0] sm:$0xf0] }
 0x976   : > { %v1678_v27 = vpop.xlane.xlu0 %1677 }
 0x977   : > { %v1684_v25 = vadd.f32 %v1682_v18, %v1678_v27  ;;  %3800 = vpow2.f32 %v1709_v32  ;;  %v3470_v27 = vld [vmem:[%s5184_s3 + $0x98] sm:$0xf]  ;;  %v3635_v32 = vld [vmem:[%s5184_s3 + $0x80] sm:$0xf0] }
 0x97d   : > { %v3801_v37 = vpop.eup %3800 }
 0x986   : > { %v1695_v30 = vpop.permute.xlu1 %1694 }
 0x987   : > { %v1702_v29 = vsub.f32 %v1684_v25, %v1695_v30  ;;  %v3467_v25 = vor.u32 %v3637_v23, %v3464_v4  ;;  %v3471_v30 = vor.u32 %v3639_v36, %v3470_v27 }
 0x989   : > { %v1707_v34 = vmul.f32 %v1705_v24, %v1702_v29  ;;  %1986 = vmatpush.bf16.msra.mxu1 %v3471_v30  ;;  %v3450_v29 = vld [vmem:[%s5184_s3 + $0x78] sm:$0xf] }
 0x98b   : > { %v1711_v5 = vmul.f32 1.442695, %v1707_v34  ;;  %v3634_v34 = vld [vmem:[%s5184_s3 + $0x7c] sm:$0xf] }
 0x98d   : > { %3802 = vpow2.f32 %v1711_v5  ;;  %v3451_v5 = vor.u32 %v3635_v32, %v3450_v29 }
 0x993   : > { %v3803_v41 = vpop.eup %3802  ;;  %v1681_v38 = vpop.xlane.xlu0 %1680 }
 0x994   : > { %v1715_v19 = vpack.c.bf16 %v3803_v41, %v3801_v37  ;;  %v1685_v40 = vadd.f32 %v1682_v18, %v1681_v38  ;;  %v3479_v18 = vor.u32 %v3640_v11, %v3476_v62  ;;  %v3452_v37 = vld [vmem:[%s5184_s3 + $0x84] sm:$0xf0]  ;;  %v3458_v41 = vld [vmem:[%s5184_s3 + $0x80] sm:$0xf] }
 0x996   : > { %3417 = vmatmul.msk.bf16.vlgmr.msrb.gmra.mxu2 %vm414_vm0, %v1715_v19  ;;  %1967 = vmatpush.bf16.msra.mxu0 %v3479_v18  ;;  %v3636_v19 = vld [vmem:[%s5184_s3 + $0x88] sm:$0xf0] }
 0x99a   : > { %1968 = vmatpush.bf16.msra.mxu0 %v3467_v25 }
 0x9a6   : > { %v1697_v44 = vpop.permute.xlu0 %1696 }
 0x9a7   : > { %v1703_v13 = vsub.f32 %v1685_v40, %v1697_v44  ;;  %v3455_v40 = vor.u32 %v3634_v34, %v3452_v37  ;;  %v3459_v44 = vor.u32 %v3636_v19, %v3458_v41 }
 0x9a9   : > { %v1708_v45 = vmul.f32 %v1705_v24, %v1703_v13  ;;  %v3463_v24 = vor.u32 %v3638_v12, %v3462_v21  ;;  %1969 = vmatpush.bf16.msra.mxu0 %v3455_v40  ;;  %1987 = vmatpush.bf16.msra.mxu1 %v3459_v44 }
 0x9ab   : > { %v1713_v46 = vmul.f32 1.442695, %v1708_v45  ;;  %1950 = vmatpush.bf16.msrb.mxu3 %v3463_v24  ;;  %v3438_v45 = vld [vmem:[%s5184_s3 + $0x60] sm:$0xf] }
 0x9ad   : > { %3804 = vpow2.f32 %v1713_v46  ;;  %v3632_v46 = vld [vmem:[%s5184_s3 + $0x68] sm:$0xf0] }
 0x9af   : > { %1951 = vmatpush.bf16.msrb.mxu3 %v3451_v5 }
 0x9b3   : > { %v3805_v48 = vpop.eup %3804 }
 0x9b4   : > { %v1716_v28 = vpack.c.bf16 %v3805_v48, %v3805_v48  ;;  %v3631_v48 = vld [vmem:[%s5184_s3 + $0x64] sm:$0xf] }
 0x9b6   : > { %3418 = vmatmul.msk.bf16.gmra.mxu2 %vm414_vm0, %v1716_v28 }
 0xa19   : > { %v1764_v54 = vpop.f32.mrf.mxu2 }
 0xa1a   : > { %v1773_v52 = vadd.f32 %v1764_v54, %v4549_v59  ;;  %v3440_v54 = vld [vmem:[%s5184_s3 + $0x6c] sm:$0xf0] }
 0xa1c   : > { %v4622_v16 = vadd.f32 %v1776_v53, %v1773_v52  ;;  %v3446_v52 = vld [vmem:[%s5184_s3 + $0x68] sm:$0xf] }
 0xa1e   : > { %v1782_v55 = vsel %vm414_vm0, %v4622_v16, 0.0 }
 0xa1f   : > { %1783 = vadd.xlane.f32.xlu2 %v1782_v55  ;;  %v3443_v55 = vor.u32 %v3631_v48, %v3440_v54 }
 0xa21   : > { %v1766_v43 = vpop.f32.mrf.mxu2  ;;  %1970 = vmatpush.bf16.msra.mxu0 %v3443_v55 }
 0xa22   : > { %v1774_v39 = vadd.f32 %v1766_v43, %v4554_v51  ;;  %v3633_v43 = vld [vmem:[%s5184_s3 + $0x70] sm:$0xf0] }
 0xa24   : > { %v4627_v22 = vadd.f32 %v1776_v53, %v1774_v39  ;;  %v3447_v39 = vor.u32 %v3633_v43, %v3446_v52 }
 0xa26   : > { %v1785_v35 = vsel %vm414_vm0, %v4627_v22, 0.0  ;;  %1988 = vmatpush.bf16.msra.mxu1 %v3447_v39 }
 0xa27   : > { %1786 = vadd.xlane.f32.xlu1 %v1785_v35 }
 0xa39   : > { %v1769_v56 = vpop.f32.mrf.mxu2 }
 0xa3a   : > { %v1775_v50 = vadd.f32 %v1769_v56, %v4561_v57 }
 0xa3c   : > { %v4632_v33 = vadd.f32 %v1776_v53, %v1775_v50  ;;  %v3439_v53 = vor.u32 %v3632_v46, %v3438_v45 }
 0xa3e   : > { %v1788_v59 = vsel %vm414_vm0, %v4632_v33, 0.0  ;;  %1952 = vmatpush.bf16.msrb.mxu3 %v3439_v53 }
 0xa3f   : > { %1789 = vadd.xlane.f32.xlu0 %v1788_v59 }
 0xa41   : > { %v1771_v26 = vpop.f32.mrf.mxu2 }
 0xa92   : > { %v1784_v60 = vpop.xlane.xlu2 %1783 }
 0xa93   : > { %v1791_v31 = vmul.f32 %v1784_v60, %v4072_v14 }
 0xa95   : > { %v4638_v51 = vsub.f32 %v4622_v16, %v1791_v31 }
 0xa97   : > { %v1797_v61 = vmul.f32 %v4638_v51, %v4638_v51 }
 0xa99   : > { %v1800_v20 = vsel %vm414_vm0, %v1797_v61, 0.0 }
 0xa9a   : > { %1801 = vadd.xlane.f32.xlu2 %v1800_v20  ;;  %v1787_v57 = vpop.xlane.xlu1 %1786 }
 0xa9b   : > { %v1792_v63 = vmul.f32 %v1787_v57, %v4072_v14 }
 0xa9d   : > { %v4645_v0 = vsub.f32 %v4627_v22, %v1792_v63 }
 0xa9f   : > { %v1798_v49 = vmul.f32 %v4645_v0, %v4645_v0 }
 0xaa1   : > { %v1803_v2 = vsel %vm414_vm0, %v1798_v49, 0.0 }
 0xaa2   : > { %1804 = vadd.xlane.f32.xlu1 %v1803_v2  ;;  %v3419_v2 = vld [vmem:[%s5188_s7 + $0x8] sm:$0xff] }
 0xaa3   : > { %v1852_v58 = vperm.slane %v3419_v2, 1 }
 0xab2   : > { %v1790_v7 = vpop.xlane.xlu0 %1789 }
 0xab3   : > { %v1793_v17 = vmul.f32 %v1790_v7, %v4072_v14 }
 0xab5   : > { %v4652_v42 = vsub.f32 %v4632_v33, %v1793_v17 }
 0xab7   : > { %v1799_v8 = vmul.f32 %v4652_v42, %v4652_v42 }
 0xab9   : > { %v1806_v1 = vsel %vm414_vm0, %v1799_v8, 0.0 }
 0xaba   : > { %1807 = vadd.xlane.f32.xlu0 %v1806_v1  ;;  %v1848_v1 = vperm.slane %v3419_v2, 0 }
 0xb0d   : > { %v1802_v38 = vpop.xlane.xlu2 %1801 }
 0xb0e   : > { %v1809_v13 = vmul.f32 %v1802_v38, %v4072_v14 }
 0xb10   : > { %v1812_v28 = vadd.f32 1e-05, %v1809_v13 }
 0xb12   : > { %3806 = vrsqrt.f32 %v1812_v28  ;;  %vm1821_vm3 = vweird.f32 %v1812_v28 }
 0xb15   : > { %v1805_v35 = vpop.xlane.xlu1 %1804 }
 0xb16   : > { %v1810_v56 = vmul.f32 %v1805_v35, %v4072_v14 }
 0xb18   : > { %v3807_v50 = vpop.eup %3806  ;;  %v1813_v59 = vadd.f32 1e-05, %v1810_v56 }
 0xb19   : > { %v1816_v26 = vmul.f32 %v3807_v50, %v1812_v28  ;;  %vm1822_vm14 = vweird.f32 %v3807_v50 }
 0xb1a   : > { %3808 = vrsqrt.f32 %v1813_v59  ;;  %vm1823_vm4 = vmor %vm1821_vm3, %vm1822_vm14  ;;  %vm1831_vm6 = vweird.f32 %v1813_v59 }
 0xb1b   : > { %v1817_v60 = vmul.f32 %v3807_v50, %v1816_v26 }
 0xb1d   : > { %v1818_v31 = vmul.f32 0.5, %v1817_v60 }
 0xb1f   : > { %v1819_v61 = vsub.f32 1.5, %v1818_v31 }
 0xb20   : > { %v3809_v20 = vpop.eup %3808 }
 0xb21   : > { %v1820_v57 = vmul.f32 %v3807_v50, %v1819_v61  ;;  %v1826_v63 = vmul.f32 %v3809_v20, %v1813_v59  ;;  %vm1832_vm5 = vweird.f32 %v3809_v20 }
 0xb22   : > { %vm1833_vm7 = vmor %vm1831_vm6, %vm1832_vm5  ;;  %vm3134_vm5 = vcmask 516096  }
 0xb23   : > { %v1827_v49 = vmul.f32 %v3809_v20, %v1826_v63  ;;  %v1824_v7 = vsel %vm1823_vm4, %v3807_v50, %v1820_v57 }
 0xb24   : > { %v1845_v3 = vmul.f32 %v1824_v7, %v4638_v51 }
 0xb25   : > { %v1828_v17 = vmul.f32 0.5, %v1827_v49 }
 0xb26   : > { %v1849_v62 = vmul.f32 %v1848_v1, %v1845_v3 }
 0xb27   : > { %v1829_v8 = vsub.f32 1.5, %v1828_v17 }
 0xb28   : > { %v1853_v21 = vadd.f32 %v1852_v58, %v1849_v62 }
 0xb29   : > { %v1830_v10 = vmul.f32 %v3809_v20, %v1829_v8 }
 0xb2b   : > { %v1834_v11 = vsel %vm1833_vm7, %v3809_v20, %v1830_v10 }
 0xb2c   : > { %v1846_v6 = vmul.f32 %v1834_v11, %v4645_v0 }
 0xb2d   : > { %v1808_v15 = vpop.xlane.xlu0 %1807 }
 0xb2e   : > { %v1850_v18 = vmul.f32 %v1848_v1, %v1846_v6  ;;  %v1811_v9 = vmul.f32 %v1808_v15, %v4072_v14 }
 0xb30   : > { %v1854_v12 = vadd.f32 %v1852_v58, %v1850_v18  ;;  %v1814_v23 = vadd.f32 1e-05, %v1811_v9 }
 0xb32   : > { %3810 = vrsqrt.f32 %v1814_v23  ;;  %v1856_v24 = vpack.c.bf16 %v1854_v12, %v1853_v21  ;;  %vm1841_vm9 = vweird.f32 %v1814_v23 }
 0xb34   : > { %3484 = vmatmul.msk.bf16.vlgmr.msrb.gmra.mxu3 %vm414_vm0, %v1856_v24  ;;  %3486 = vmatmul.msk.bf16.vlgmr.msra.gmra.mxu0 %vm414_vm0, %v1856_v24 }
 0xb35   : > { %3488 = vmatmul.msk.bf16.vlgmr.msra.gmra.mxu1 %vm414_vm0, %v1856_v24 }
 0xb38   : > { %v3811_v51 = vpop.eup %3810 }
 0xb39   : > { %v1836_v4 = vmul.f32 %v3811_v51, %v1814_v23  ;;  %vm1842_vm8 = vweird.f32 %v3811_v51 }
 0xb3a   : > { %vm1843_vm10 = vmor %vm1841_vm9, %vm1842_vm8 }
 0xb3b   : > { %v1837_v27 = vmul.f32 %v3811_v51, %v1836_v4 }
 0xb3d   : > { %v1838_v36 = vmul.f32 0.5, %v1837_v27 }
 0xb3f   : > { %v1839_v0 = vsub.f32 1.5, %v1838_v36 }
 0xb41   : > { %v1840_v25 = vmul.f32 %v3811_v51, %v1839_v0 }
 0xb43   : > { %v1844_v30 = vsel %vm1843_vm10, %v3811_v51, %v1840_v25 }
 0xb44   : > { %v1847_v29 = vmul.f32 %v1844_v30, %v4652_v42 }
 0xb46   : > { %v1851_v32 = vmul.f32 %v1848_v1, %v1847_v29 }
 0xb48   : > { %v1855_v34 = vadd.f32 %v1852_v58, %v1851_v32 }
 0xb4a   : > { %v1857_v5 = vpack.c.bf16 %v1855_v34, %v1855_v34 }
 0xb4c   : > { %3485 = vmatmul.msk.bf16.gmra.mxu3 %vm414_vm0, %v1857_v5  ;;  %3487 = vmatmul.msk.bf16.gmra.mxu0 %vm414_vm0, %v1857_v5 }
 0xb4d   : > { %3489 = vmatmul.msk.bf16.gmra.mxu1 %vm414_vm0, %v1857_v5 }
 0xbb1   : > { %v1972_v37 = vpop.f32.mrf.mxu0 }
 0xbb2   : > { %v1990_v41 = vpop.f32.mrf.mxu1  ;;  %2002 = vrot.lane.b32.xlu1 %v1972_v37, %s5210_s27 }
 0xbb3   : > { %2026 = vrot.lane.b32.xlu2 %v1990_v41, %s5210_s27 }
 0xbb7   : > { %v1954_v42 = vpop.f32.mrf.mxu3 }
 0xbb9   : > { %v1974_v19 = vpop.f32.mrf.mxu0 }
 0xbba   : > { %v4746_v38 = vpack.c.bf16 %v1974_v19, %v1972_v37  ;;  %v1992_v40 = vpop.f32.mrf.mxu1 }
 0xbbb   : > { %2004 = vrot.lane.b32.xlu2 %v1974_v19, %s5210_s27  ;;  %2028 = vrot.lane.b32.xlu0 %v1992_v40, %s5210_s27 }
 0xbbc   : > { %2254 = vrot.lane.b32.xlu1 %v4746_v38, %s5211_s26 }
 0xbbf   : > { %v1956_v44 = vpop.f32.mrf.mxu3 }
 0xbc0   : > { %v2061_v13 = vpack.c.bf16 %v1956_v44, %v1954_v42 }
 0xbc3   : > { %2065 = vrot.lane.b32.xlu2 %v4746_v38, %s5210_s27  ;;  %2632 = vrot.lane.b32.xlu0 %v4746_v38, %s5212_s29 }
 0xbc4   : > { %2443 = vrot.lane.b32.xlu1 %v4746_v38, %s5213_s21 }
 0xbc9   : > { %v1977_v45 = vpop.f32.mrf.mxu0 }
 0xbca   : > { %v4758_v46 = vpack.c.bf16 %v1977_v45, %v1977_v45  ;;  %v1995_v48 = vpop.f32.mrf.mxu1 }
 0xbcb   : > { %2258 = vrot.lane.b32.xlu0 %v2061_v13, %s5211_s26  ;;  %2030 = vrot.lane.b32.xlu2 %v1995_v48, %s5210_s27 }
 0xbcc   : > { %2071 = vrot.lane.b32.xlu1 %v2061_v13, %s5210_s27  ;;  %v2195_v28 = vsel %vm835_vm12, %v4758_v46, 0 }
 0xbcd   : > { %2203 = vmatpush.bf16.msra.mxu3 %v2195_v28 }
 0xbcf   : > { %v4765_v53 = vpop.f32.mrf.mxu3 }
 0xbd0   : > { %v2062_v43 = vpack.c.bf16 %v4765_v53, %v4765_v53 }
 0xbd1   : > { %v1979_v54 = vpop.f32.mrf.mxu0  ;;  %2204 = vmatpush.bf16.msra.mxu3 %v4746_v38 }
 0xbd2   : > { %v1997_v52 = vpop.f32.mrf.mxu1 }
 0xbd3   : > { %2006 = vrot.lane.b32.xlu0 %v1977_v45, %s5210_s27  ;;  %2067 = vrot.lane.b32.xlu2 %v4758_v46, %s5210_s27 }
 0xbd4   : > { %2447 = vrot.lane.b32.xlu1 %v2061_v13, %s5213_s21 }
 0xbd7   : > { %v1961_v55 = vpop.f32.mrf.mxu3 }
 0xbdb   : > { %2260 = vrot.lane.b32.xlu0 %v2062_v43, %s5211_s26  ;;  %2256 = vrot.lane.b32.xlu2 %v4758_v46, %s5211_s26 }
 0xbdc   : > { %2636 = vrot.lane.b32.xlu1 %v2061_v13, %s5212_s29 }
 0xbe3   : > { %2449 = vrot.lane.b32.xlu0 %v2062_v43, %s5213_s21  ;;  %2445 = vrot.lane.b32.xlu2 %v4758_v46, %s5213_s21 }
 0xbeb   : > { %2638 = vrot.lane.b32.xlu0 %v2062_v43, %s5212_s29  ;;  %2634 = vrot.lane.b32.xlu2 %v4758_v46, %s5212_s29 }
 0xbf3   : > { %2073 = vrot.lane.b32.xlu2 %v2062_v43, %s5210_s27 }
 0xc0d   : > { %v2027_v39 = vpop.permute.xlu2 %2026 }
 0xc0e   : > { %v2035_v35 = vmul.f32 %v2027_v39, %v1954_v42 }
 0xc10   : > { %2041 = vrot.lane.b32.xlu0 %v2035_v35, %s5210_s27  ;;  %2236 = vrot.lane.b32.xlu2 %v2035_v35, %s5211_s26 }
 0xc15   : > { %v2005_v56 = vpop.permute.xlu2 %2004 }
 0xc16   : > { %v2012_v49 = vmul.f32 %v2005_v56, %v1956_v44 }
 0xc18   : > { %2425 = vrot.lane.b32.xlu2 %v2035_v35, %s5213_s21  ;;  %v2017_v18 = vsel %vm653_vm13, %v2012_v49, 0.0 }
 0xc1d   : > { %v2066_v50 = vpop.permute.xlu2 %2065 }
 0xc20   : > { %2614 = vrot.lane.b32.xlu2 %v2035_v35, %s5212_s29 }
 0xc24   : > { %v2003_v59 = vpop.permute.xlu1 %2002 }
 0xc25   : > { %v2011_v26 = vmul.f32 %v2003_v59, %v1954_v42  ;;  %v2031_v60 = vpop.permute.xlu2 %2030 }
 0xc26   : > { %v2037_v10 = vmul.f32 %v2031_v60, %v4765_v53 }
 0xc27   : > { %2596 = vrot.lane.b32.xlu1 %v2011_v26, %s5214_s25  ;;  %2218 = vrot.lane.b32.xlu0 %v2011_v26, %s5215_s28  ;;  %v2014_v9 = vsel %vm653_vm13, %v2011_v26, 0.0 }
 0xc28   : > { %2407 = vrot.lane.b32.xlu2 %v2011_v26, %s5216_s11 }
 0xc2d   : > { %v2029_v31 = vpop.permute.xlu0 %2028  ;;  %v2068_v61 = vpop.permute.xlu2 %2067 }
 0xc2e   : > { %v2036_v20 = vmul.f32 %v2029_v31, %v1956_v44  ;;  %v2255_v2 = vpop.permute.xlu1 %2254 }
 0xc30   : > { %2043 = vrot.lane.b32.xlu1 %v2036_v20, %s5210_s27 }
 0xc35   : > { %v2633_v57 = vpop.permute.xlu0 %2632  ;;  %v2257_v63 = vpop.permute.xlu2 %2256 }
 0xc36   : > { %v2444_v8 = vpop.permute.xlu1 %2443 }
 0xc38   : > { %2220 = vrot.lane.b32.xlu1 %v2012_v49, %s5215_s28 }
 0xc3d   : > { %v2259_v7 = vpop.permute.xlu0 %2258  ;;  %v2446_v17 = vpop.permute.xlu2 %2445 }
 0xc3e   : > { %v2072_v15 = vpop.permute.xlu1 %2071  ;;  %v2269_v12 = vsel %vm653_vm13, %v2259_v7, 0 }
 0xc3f   : > { %v2082_v23 = vsel %vm653_vm13, %v2072_v15, 0 }
 0xc40   : > { %2616 = vrot.lane.b32.xlu1 %v2036_v20, %s5212_s29 }
 0xc45   : > { %v2007_v1 = vpop.permute.xlu0 %2006  ;;  %v2635_v3 = vpop.permute.xlu2 %2634 }
 0xc46   : > { %v2448_v51 = vpop.permute.xlu1 %2447  ;;  %v2013_v25 = vmul.f32 %v2007_v1, %v4765_v53 }
 0xc47   : > { %v2458_v36 = vsel %vm653_vm13, %v2448_v51, 0 }
 0xc48   : > { %2045 = vrot.lane.b32.xlu1 %v2037_v10, %s5210_s27  ;;  %v2020_v52 = vsel %vm653_vm13, %v2013_v25, 0.0 }
 0xc4d   : > { %v2261_v11 = vpop.permute.xlu0 %2260  ;;  %v2074_v58 = vpop.permute.xlu2 %2073 }
 0xc4e   : > { %v2272_v62 = vsel %vm653_vm13, %v2261_v11, 0  ;;  %v2085_v6 = vsel %vm653_vm13, %v2074_v58, 0  ;;  %v2637_v0 = vpop.permute.xlu1 %2636 }
 0xc4f   : > { %2093 = vmatpush.bf16.xpose.msra.mxu2 %v2085_v6  ;;  %2280 = vmatpush.bf16.xpose.msrb.mxu0 %v2272_v62  ;;  %v2647_v30 = vsel %vm653_vm13, %v2637_v0, 0 }
 0xc50   : > { %2240 = vrot.lane.b32.xlu1 %v2037_v10, %s5211_s26 }
 0xc51   : > { %2018 = vadd.xlane.f32.xlu2 %v2017_v18  ;;  %2015 = vadd.xlane.f32.xlu0 %v2014_v9 }
 0xc55   : > { %v2450_v21 = vpop.permute.xlu0 %2449 }
 0xc56   : > { %v2461_v24 = vsel %vm653_vm13, %v2450_v21, 0 }
 0xc57   : > { %2094 = vmatpush.bf16.xpose.msra.mxu2 %v2082_v23  ;;  %2281 = vmatpush.bf16.xpose.msrb.mxu0 %v2269_v12 }
 0xc58   : > { %2429 = vrot.lane.b32.xlu1 %v2037_v10, %s5213_s21 }
 0xc5d   : > { %v2639_v4 = vpop.permute.xlu0 %2638 }
 0xc5e   : > { %v2650_v27 = vsel %vm653_vm13, %v2639_v4, 0  ;;  %3490 = vmatmul.msk.bf16.vlgmr.msra.gmra.mxu2 %vm653_vm13, %v2066_v50  ;;  %3494 = vmatmul.msk.bf16.vlgmr.msrb.gmra.mxu0 %vm653_vm13, %v2255_v2 }
 0xc5f   : > { %2469 = vmatpush.bf16.xpose.msrb.mxu2 %v2461_v24  ;;  %2658 = vmatpush.bf16.xpose.msra.mxu0 %v2650_v27 }
 0xc60   : > { %2618 = vrot.lane.b32.xlu1 %v2037_v10, %s5212_s29 }
 0xc65   : > { %2238 = vrot.lane.b32.xlu0 %v2036_v20, %s5211_s26 }
 0xc67   : > { %2470 = vmatpush.bf16.xpose.msrb.mxu2 %v2458_v36  ;;  %2659 = vmatpush.bf16.xpose.msra.mxu0 %v2647_v30 }
 0xc68   : > { %2411 = vrot.lane.b32.xlu1 %v2013_v25, %s5216_s11 }
 0xc69   : > { %2600 = vrot.lane.b32.xlu2 %v2013_v25, %s5214_s25 }
 0xc6a   : > { %v2237_v29 = vpop.permute.xlu2 %2236 }
 0xc6b   : > { %v2245_v34 = vsel %vm653_vm13, %v2237_v29, 0.0 }
 0xc6d   : > { %2427 = vrot.lane.b32.xlu0 %v2036_v20, %s5213_s21 }
 0xc6e   : > { %3491 = vmatmul.msk.bf16.gmra.mxu2 %vm653_vm13, %v2068_v61  ;;  %3495 = vmatmul.msk.bf16.gmra.mxu0 %vm653_vm13, %v2257_v63 }
 0xc72   : > { %v2426_v32 = vpop.permute.xlu2 %2425 }
 0xc73   : > { %v2434_v41 = vsel %vm653_vm13, %v2426_v32, 0.0 }
 0xc75   : > { %2409 = vrot.lane.b32.xlu0 %v2012_v49, %s5216_s11 }
 0xc7a   : > { %v2615_v37 = vpop.permute.xlu2 %2614 }
 0xc7b   : > { %v2623_v13 = vsel %vm653_vm13, %v2615_v37, 0.0 }
 0xc7d   : > { %2598 = vrot.lane.b32.xlu0 %v2012_v49, %s5214_s25 }
 0xc7e   : > { %3498 = vmatmul.msk.bf16.vlgmr.msrb.gmra.mxu2 %vm653_vm13, %v2444_v8  ;;  %3502 = vmatmul.msk.bf16.vlgmr.msra.gmra.mxu0 %vm653_vm13, %v2633_v57 }
 0xc82   : > { %v2042_v5 = vpop.permute.xlu0 %2041  ;;  %v2408_v44 = vpop.permute.xlu2 %2407 }
 0xc83   : > { %v2416_v45 = vsel %vm653_vm13, %v2408_v44, 0.0  ;;  %v2050_v39 = vsel %vm653_vm13, %v2042_v5, 0.0 }
 0xc85   : > { %2222 = vrot.lane.b32.xlu0 %v2013_v25, %s5215_s28 }
 0xc8e   : > { %3499 = vmatmul.msk.bf16.gmra.mxu2 %vm653_vm13, %v2446_v17  ;;  %3503 = vmatmul.msk.bf16.gmra.mxu0 %vm653_vm13, %v2635_v3 }
 0xc92   : > { %2246 = vadd.xlane.f32.xlu2 %v2245_v34 }
 0xc99   : > { %v2597_v19 = vpop.permute.xlu1 %2596  ;;  %v2219_v40 = vpop.permute.xlu0 %2218 }
 0xc9a   : > { %v2227_v42 = vsel %vm653_vm13, %v2219_v40, 0.0  ;;  %2435 = vadd.xlane.f32.xlu2 %v2434_v41  ;;  %v2605_v53 = vsel %vm653_vm13, %v2597_v19, 0.0 }
 0xc9b   : > { %2228 = vadd.xlane.f32.xlu1 %v2227_v42 }
 0xca2   : > { %v2044_v48 = vpop.permute.xlu1 %2043  ;;  %2624 = vadd.xlane.f32.xlu2 %v2623_v13 }
 0xca3   : > { %2417 = vadd.xlane.f32.xlu1 %v2416_v45  ;;  %v2053_v28 = vsel %vm653_vm13, %v2044_v48, 0.0 }
 0xcaa   : > { %v2221_v54 = vpop.permute.xlu1 %2220  ;;  %2054 = vadd.xlane.f32.xlu2 %v2053_v28 }
 0xcab   : > { %2606 = vadd.xlane.f32.xlu1 %v2605_v53  ;;  %v2230_v35 = vsel %vm653_vm13, %v2221_v54, 0.0 }
 0xcaf   : > { %2021 = vadd.xlane.f32.xlu0 %v2020_v52 }
 0xcb2   : > { %v2617_v55 = vpop.permute.xlu1 %2616 }
 0xcb3   : > { %v2626_v43 = vsel %vm653_vm13, %v2617_v55, 0.0 }
 0xcb4   : > { %2627 = vadd.xlane.f32.xlu1 %v2626_v43 }
 0xcb7   : > { %2051 = vadd.xlane.f32.xlu0 %v2050_v39 }
 0xcba   : > { %v2046_v56 = vpop.permute.xlu1 %2045 }
 0xcbb   : > { %v2056_v15 = vsel %vm653_vm13, %v2046_v56, 0.0 }
 0xcbf   : > { %2231 = vadd.xlane.f32.xlu0 %v2230_v35 }
 0xcc2   : > { %v2241_v50 = vpop.permute.xlu1 %2240 }
 0xcc3   : > { %v2251_v21 = vsel %vm653_vm13, %v2241_v50, 0.0 }
 0xcc4   : > { %v4837_v59 = vpop.xlane.xlu0 %2015  ;;  %v4852_v6 = vpop.xlane.xlu2 %2018 }
 0xcca   : > { %v2430_v26 = vpop.permute.xlu1 %2429 }
 0xccb   : > { %v2440_v51 = vsel %vm653_vm13, %v2430_v26, 0.0 }
 0xccc   : > { %v4858_v12 = vpop.permute.xlu2 %2600 }
 0xcd2   : > { %v2619_v20 = vpop.permute.xlu1 %2618 }
 0xcd3   : > { %v2629_v63 = vsel %vm653_vm13, %v2619_v20, 0.0 }
 0xcd7   : > { %v2239_v60 = vpop.permute.xlu0 %2238 }
 0xcd8   : > { %v2248_v31 = vsel %vm653_vm13, %v2239_v60, 0.0 }
 0xcd9   : > { %2249 = vadd.xlane.f32.xlu2 %v2248_v31 }
 0xcda   : > { %v2412_v40 = vpop.permute.xlu1 %2411 }
 0xcdb   : > { %v4840_v61 = vpop.f32.mrf.mxu0 }
 0xcdc   : > { %v2328_v26 = vmul.f32 2.0, %v4840_v61 }
 0xcdf   : > { %v2428_v57 = vpop.permute.xlu0 %2427 }
 0xce0   : > { %v2437_v49 = vsel %vm653_vm13, %v2428_v57, 0.0 }
 0xce1   : > { %v4844_v2 = vpop.f32.mrf.mxu2  ;;  %2438 = vadd.xlane.f32.xlu0 %v2437_v49  ;;  %2630 = vadd.xlane.f32.xlu2 %v2629_v63 }
 0xce3   : > { %v2285_v7 = vpop.f32.mrf.mxu0 }
 0xce4   : > { %v2329_v60 = vmul.f32 2.0, %v2285_v7 }
 0xce7   : > { %v2410_v17 = vpop.permute.xlu0 %2409 }
 0xce8   : > { %v2419_v8 = vsel %vm653_vm13, %v2410_v17, 0.0 }
 0xce9   : > { %v4847_v1 = vpop.f32.mrf.mxu2  ;;  %2420 = vadd.xlane.f32.xlu0 %v2419_v8 }
 0xceb   : > { %v2288_v3 = vpop.f32.mrf.mxu0 }
 0xcec   : > { %v2330_v20 = vmul.f32 2.0, %v2288_v3  ;;  %v2142_v3 = vmul.f32 2.0, %v4847_v1 }
 0xcef   : > { %v2599_v10 = vpop.permute.xlu0 %2598 }
 0xcf0   : > { %v2608_v11 = vsel %vm653_vm13, %v2599_v10, 0.0  ;;  %v2141_v10 = vmul.f32 2.0, %v4844_v2 }
 0xcf1   : > { %v4850_v58 = vpop.f32.mrf.mxu2  ;;  %2609 = vadd.xlane.f32.xlu1 %v2608_v11 }
 0xcf3   : > { %v2290_v62 = vpop.f32.mrf.mxu0 }
 0xcf7   : > { %v2223_v0 = vpop.permute.xlu0 %2222 }
 0xcf8   : > { %v2233_v25 = vsel %vm653_vm13, %v2223_v0, 0.0 }
 0xcf9   : > { %v2103_v18 = vpop.f32.mrf.mxu2  ;;  %2057 = vadd.xlane.f32.xlu1 %v2056_v15 }
 0xcfa   : > { %v2143_v18 = vmul.f32 2.0, %v4850_v58 }
 0xcfb   : > { %v4855_v9 = vpop.f32.mrf.mxu0 }
 0xd01   : > { %v4860_v23 = vpop.f32.mrf.mxu2  ;;  %2252 = vadd.xlane.f32.xlu1 %v2251_v21 }
 0xd03   : > { %v4862_v24 = vpop.f32.mrf.mxu0 }
 0xd05   : > { %v2247_v4 = vpop.xlane.xlu2 %2246 }
 0xd09   : > { %v4865_v27 = vpop.f32.mrf.mxu2  ;;  %2441 = vadd.xlane.f32.xlu1 %v2440_v51 }
 0xd0a   : > { %2292 = vxpose.xlu2.b32.start [1/3] (short) (narrow) %v2247_v4, 8 }
 0xd0b   : > { %v4867_v36 = vpop.f32.mrf.mxu0 }
 0xd0d   : > { %v2436_v34 = vpop.xlane.xlu2 %2435 }
 0xd0e   : > { %v2229_v42 = vpop.xlane.xlu1 %2228 }
 0xd11   : > { %v4870_v30 = vpop.f32.mrf.mxu2  ;;  %2234 = vadd.xlane.f32.xlu1 %v2233_v25 }
 0xd13   : > { %v2668_v29 = vpop.f32.mrf.mxu0 }
 0xd15   : > { %v4872_v37 = vpop.xlane.xlu2 %2624 }
 0xd16   : > { %v4874_v44 = vpop.xlane.xlu1 %2417 }
 0xd19   : > { %v2479_v32 = vpop.f32.mrf.mxu2 }
 0xd1d   : > { %v2055_v19 = vpop.xlane.xlu2 %2054 }
 0xd1e   : > { %v4876_v48 = vpop.xlane.xlu1 %2606 }
 0xd22   : > { %v2022_v5 = vpop.xlane.xlu0 %2021 }
 0xd27   : > { %v2628_v53 = vpop.xlane.xlu1 %2627 }
 0xd2a   : > { %v2052_v41 = vpop.xlane.xlu0 %2051 }
 0xd2b   : > { %2105 = vxpose.xlu0.b32.start [1/3] (short) (narrow) %v2052_v41, 8 }
 0xd32   : > { %v2232_v13 = vpop.xlane.xlu0 %2231 }
 0xd33   : > { %2106 = vxpose.xlu0.b32.cont [2/3] (short) (narrow) %v2055_v19, 8  ;;  %v2422_v19 = vsel %vm653_vm13, %v2412_v40, 0.0 }
 0xd4b   : > { %2481 = vxpose.xlu1.b32.start [1/3] (short) (narrow) %v2436_v34, 8 }
 0xd4c   : > { %v2250_v45 = vpop.xlane.xlu2 %2249 }
 0xd4d   : > { %2293 = vxpose.xlu2.b32.cont [2/3] (short) (narrow) %v2250_v45, 8  ;;  %v2518_v45 = vmul.f32 2.0, %v4865_v27 }
 0xd54   : > { %v2439_v28 = vpop.xlane.xlu0 %2438  ;;  %v2631_v39 = vpop.xlane.xlu2 %2630 }
 0xd55   : > { %2482 = vxpose.xlu1.b32.cont [2/3] (short) (narrow) %v2439_v28, 8 }
 0xd5c   : > { %v2421_v35 = vpop.xlane.xlu0 %2420 }
 0xd64   : > { %v4878_v54 = vpop.xlane.xlu1 %2609 }
 0xd6c   : > { %v2058_v52 = vpop.xlane.xlu1 %2057 }
 0xd6d   : > { %2107 = vxpose.xlu0.b32.end [3/3] (short) (narrow) %v2058_v52, 8 }
 0xd74   : > { %v2253_v55 = vpop.xlane.xlu1 %2252 }
 0xd75   : > { %2294 = vxpose.xlu2.b32.end [3/3] (short) (narrow) %v2253_v55, 8 }
 0xd7c   : > { %v2442_v43 = vpop.xlane.xlu1 %2441 }
 0xd7d   : > { %2483 = vxpose.xlu1.b32.end [3/3] (short) (narrow) %v2442_v43, 8  ;;  %v2611_v43 = vsel %vm653_vm13, %v4858_v12, 0.0  ;;  %v2517_v12 = vmul.f32 2.0, %v4860_v23 }
 0xd84   : > { %v2235_v31 = vpop.xlane.xlu1 %2234 }
 0xdfe   : > { %v2308_v56 = vpop.trf.xlu2 }
 0xdff   : > { %v2324_v50 = vperm.slane %v2308_v56, 0 }
 0xe01   : > { %v2325_v57 = vadd.f32 %v2324_v50, %v2229_v42  ;;  %v2326_v63 = vadd.f32 %v2324_v50, %v2232_v13  ;;  %v2327_v49 = vadd.f32 %v2324_v50, %v2235_v31  ;;  %v2121_v17 = vpop.trf.xlu0 }
 0xe02   : > { %v2137_v8 = vperm.slane %v2121_v17, 0 }
 0xe03   : > { %v2332_v11 = vsub.f32 %v2326_v63, %v2329_v60  ;;  %v2331_v62 = vsub.f32 %v2325_v57, %v2328_v26  ;;  %v2333_v15 = vsub.f32 %v2327_v49, %v2330_v20  ;;  %v2519_v57 = vmul.f32 2.0, %v4870_v30 }
 0xe04   : > { %v2138_v21 = vadd.f32 %v2137_v8, %v4837_v59  ;;  %v2139_v51 = vadd.f32 %v2137_v8, %v4852_v6  ;;  %v2140_v61 = vadd.f32 %v2137_v8, %v2022_v5 }
 0xe05   : > { %v2335_v7 = vsub.f32 0.0, %v2332_v11  ;;  %v2334_v4 = vsub.f32 0.0, %v2331_v62 }
 0xe06   : > { %v2144_v0 = vsub.f32 %v2138_v21, %v2141_v10  ;;  %v2146_v25 = vsub.f32 %v2140_v61, %v2143_v18  ;;  %v2145_v34 = vsub.f32 %v2139_v51, %v2142_v3 }
 0xe07   : > { %v4887_v29 = vadd.f32 %v2335_v7, %v4351_v47  ;;  %v4890_v2 = vadd.f32 %v2334_v4, %v4351_v47 }
 0xe08   : > { %v2147_v32 = vsub.f32 0.0, %v2144_v0  ;;  %v2148_v5 = vsub.f32 0.0, %v2145_v34  ;;  %v2149_v27 = vsub.f32 0.0, %v2146_v25  ;;  %v2706_v34 = vmul.f32 2.0, %v4855_v9 }
 0xe09   : > { %v2343_v59 = vsel %vm793_vm15, %v4887_v29, -inf  ;;  %v2340_v58 = vsel %vm793_vm15, %v4890_v2, -inf }
 0xe0a   : > { %2344 = vmax.xlane.f32.xlu0 %v2343_v59  ;;  %2341 = vmax.xlane.f32.xlu2 %v2340_v58  ;;  %v4897_v1 = vadd.f32 %v2147_v32, %v4351_v47  ;;  %v4902_v41 = vadd.f32 %v2148_v5, %v4351_v47  ;;  %v4917_v56 = vadd.f32 %v2149_v27, %v4351_v47  ;;  %v2708_v58 = vmul.f32 2.0, %v4867_v36 }
 0xe0c   : > { %v2153_v6 = vsel %vm793_vm15, %v4897_v1, -inf  ;;  %v2156_v52 = vsel %vm793_vm15, %v4902_v41, -inf  ;;  %v2159_v60 = vsel %vm793_vm15, %v4917_v56, -inf }
 0xe0d   : > { %2154 = vmax.xlane.f32.xlu1 %v2153_v6 }
 0xe11   : > { %v2497_v42 = vpop.trf.xlu1 }
 0xe12   : > { %v2513_v13 = vperm.slane %v2497_v42, 0  ;;  %2423 = vadd.xlane.f32.xlu2 %v2422_v19 }
 0xe14   : > { %v2515_v28 = vadd.f32 %v2513_v13, %v2421_v35  ;;  %v2514_v40 = vadd.f32 %v2513_v13, %v4874_v44  ;;  %v2336_v35 = vsub.f32 0.0, %v2333_v15 }
 0xe15   : > { %2157 = vmax.xlane.f32.xlu1 %v2156_v52 }
 0xe16   : > { %v2521_v55 = vsub.f32 %v2515_v28, %v2518_v45  ;;  %v4921_v50 = vadd.f32 %v2336_v35, %v4351_v47  ;;  %v2520_v26 = vsub.f32 %v2514_v40, %v2517_v12 }
 0xe18   : > { %v2524_v51 = vsub.f32 0.0, %v2521_v55 }
 0xe1a   : > { %2612 = vadd.xlane.f32.xlu2 %v2611_v43  ;;  %v4941_v30 = vadd.f32 %v2524_v51, %v4351_v47 }
 0xe1c   : > { %v2532_v61 = vsel %vm793_vm15, %v4941_v30, -inf }
 0xe2e   : > { %2377 = vrot.lane.b32.xlu1 %v4758_v46, %s5215_s28 }
 0xe32   : > { %2375 = vrot.lane.b32.xlu2 %v4746_v38, %s5215_s28  ;;  %s3217_s28 = scalar_lea.hbm %s5191_s10, %s4026_s17 }
 0xe33   : > { %2670 = vxpose.xlu0.b32.start [1/3] (short) (narrow) %v4872_v37, 8  ;;  %v2346_v37 = vsel %vm793_vm15, %v4921_v50, -inf  ;;  %s3221_s18 = sshll.u32 %s3217_s28, 4  ;;  %s3222_s18 = int_to_ptr.hbm [resolvable:$true] %s3221_s18 }
 0xe34   : > { %s3891_s30 = sshra.s32 %s3222_s18, 4  ;;  %s3892_s30 = int_to_ptr.hbm [resolvable:$true] %s3891_s30 }
 0xe35   : > { %s3893_s0 = scalar_lea.hbm %s3892_s30, 1  ;;  %p3898_p0 = scmp.lt.s32.totalorder %s3892_s30, %s5191_s10 }
 0xe36   : > { %p3894_p11 = scmp.ne.s32.totalorder %s3892_s30, %s3893_s0 }
 0xe38   : > { %p3895_p12 = pnand %p3894_p11, %p4043_p5 }
 0xe3a   : > { %p3896_p13 = pneg %p3895_p12 }
 0xe3b   : > { %2671 = vxpose.xlu0.b32.cont [2/3] (short) (narrow) %v2628_v53, 8  ;;  %v2523_v53 = vsub.f32 0.0, %v2520_v26 }
 0xe3d   : > { %v2526_v44 = vadd.f32 %v2523_v53, %v4351_v47 }
 0xe43   : > { %2672 = vxpose.xlu0.b32.end [3/3] (short) (narrow) %v2631_v39, 8  ;;  %v2529_v39 = vsel %vm793_vm15, %v2526_v44, -inf }
 0xe58   : > { %2160 = vmax.xlane.f32.xlu1 %v2159_v60 }
 0xe5b   : > { %2347 = vmax.xlane.f32.xlu2 %v2346_v37 }
 0xe63   : > { %2530 = vmax.xlane.f32.xlu2 %v2529_v39 }
 0xe71   : > { %2566 = vrot.lane.b32.xlu1 %v4758_v46, %s5216_s11 }
 0xe7d   : > { %v4931_v23 = vpop.xlane.xlu2 %2341  ;;  %v2345_v4 = vpop.xlane.xlu0 %2344 }
 0xe80   : > { %v2155_v63 = vpop.xlane.xlu1 %2154 }
 0xe85   : > { %v2424_v31 = vpop.xlane.xlu2 %2423 }
 0xe86   : > { %v2516_v20 = vadd.f32 %v2513_v13, %v2424_v31  ;;  %v2707_v13 = vmul.f32 2.0, %v4862_v24  ;;  %v2349_v31 = vsub.f32 %v4890_v2, %v4931_v23 }
 0xe88   : > { %v2522_v49 = vsub.f32 %v2516_v20, %v2519_v57  ;;  %v2158_v10 = vpop.xlane.xlu1 %2157  ;;  %v2352_v57 = vmul.f32 1.442695, %v2349_v31 }
 0xe89   : > { %v2163_v37 = vsub.f32 %v4902_v41, %v2158_v10 }
 0xe8a   : > { %v2525_v17 = vsub.f32 0.0, %v2522_v49 }
 0xe8c   : > { %v4935_v8 = vadd.f32 %v2525_v17, %v4351_v47 }
 0xe8d   : > { %v2613_v62 = vpop.xlane.xlu2 %2612 }
 0xe8e   : > { %v2535_v11 = vsel %vm793_vm15, %v4935_v8, -inf }
 0xe95   : > { %v2376_v21 = vpop.permute.xlu2 %2375 }
 0xe9b   : > { %2536 = vmax.xlane.f32.xlu1 %v2535_v11 }
 0xea0   : > { %v2378_v15 = vpop.permute.xlu1 %2377 }
 0xea1   : > { %v2387_v18 = vsel %vm835_vm12, %v2378_v15, 0 }
 0xea2   : > { %2395 = vmatpush.bf16.msrb.mxu1 %v2387_v18 }
 0xea6   : > { %2396 = vmatpush.bf16.msrb.mxu1 %v2376_v21 }
 0xeb4   : > { %2533 = vmax.xlane.f32.xlu0 %v2532_v61 }
 0xecb   : > { %v2161_v42 = vpop.xlane.xlu1 %2160 }
 0xecc   : > { %v2164_v2 = vsub.f32 %v4917_v56, %v2161_v42 }
 0xece   : > { %v4945_v7 = vpop.xlane.xlu2 %2347  ;;  %v2169_v10 = vmul.f32 1.442695, %v2164_v2 }
 0xed6   : > { %v2531_v3 = vpop.xlane.xlu2 %2530 }
 0xed7   : > { %v2538_v0 = vsub.f32 %v2526_v44, %v2531_v3  ;;  %v2686_v25 = vpop.trf.xlu0  ;;  %v2167_v44 = vmul.f32 1.442695, %v2163_v37 }
 0xed8   : > { %v2702_v32 = vperm.slane %v2686_v25, 0 }
 0xed9   : > { %v2541_v59 = vmul.f32 1.442695, %v2538_v0 }
 0xeda   : > { %v2703_v6 = vadd.f32 %v2702_v32, %v4876_v48  ;;  %v2704_v5 = vadd.f32 %v2702_v32, %v4878_v54  ;;  %v2705_v19 = vadd.f32 %v2702_v32, %v2613_v62  ;;  %v2162_v48 = vsub.f32 %v4897_v1, %v2155_v63 }
 0xedb   : > { %3812 = vpow2.f32 %v2541_v59 }
 0xedc   : > { %v2709_v45 = vsub.f32 %v2703_v6, %v2706_v34  ;;  %v2711_v28 = vsub.f32 %v2705_v19, %v2708_v58  ;;  %v2710_v43 = vsub.f32 %v2704_v5, %v2707_v13  ;;  %v2165_v60 = vmul.f32 1.442695, %v2162_v48 }
 0xede   : > { %v2712_v52 = vsub.f32 0.0, %v2709_v45  ;;  %v2714_v55 = vsub.f32 0.0, %v2711_v28  ;;  %v2713_v35 = vsub.f32 0.0, %v2710_v43  ;;  %3814 = vpow2.f32 %v2165_v60 }
 0xedf   : > { %3816 = vpow2.f32 %v2167_v44 }
 0xee0   : > { %v4953_v27 = vadd.f32 %v2712_v52, %v4351_v47  ;;  %v4956_v9 = vadd.f32 %v2714_v55, %v4351_v47  ;;  %v2716_v1 = vadd.f32 %v2713_v35, %v4351_v47  ;;  %v2350_v47 = vsub.f32 %v4887_v29, %v2345_v4 }
 0xee1   : > { %v4958_v36 = vpop.eup %3812  ;;  %3818 = vpow2.f32 %v2352_v57  ;;  %v2351_v29 = vsub.f32 %v4921_v50, %v4945_v7 }
 0xee2   : > { %v2718_v54 = vsel %vm793_vm15, %v4953_v27, -inf  ;;  %v2724_v24 = vsel %vm793_vm15, %v4956_v9, -inf  ;;  %v2547_v40 = vsel %vm793_vm15, %v4958_v36, 0.0  ;;  %v2721_v53 = vsel %vm793_vm15, %v2716_v1, -inf }
 0xee3   : > { %v2567_v12 = vpop.permute.xlu1 %2566  ;;  %2719 = vmax.xlane.f32.xlu2 %v2718_v54  ;;  %2725 = vmax.xlane.f32.xlu0 %v2724_v24  ;;  %v2354_v49 = vmul.f32 1.442695, %v2350_v47  ;;  %v2356_v15 = vmul.f32 1.442695, %v2351_v29 }
 0xee4   : > { %v2576_v26 = vsel %vm835_vm12, %v2567_v12, 0  ;;  %2548 = vadd.xlane.f32.xlu1 %v2547_v40  ;;  %v4971_v39 = vpop.eup %3814 }
 0xee5   : > { %2584 = vmatpush.bf16.msrb.mxu3 %v2576_v26  ;;  %v2171_v20 = vsel %vm793_vm15, %v4971_v39, 0.0  ;;  %v3817_v63 = vpop.eup %3816  ;;  %3820 = vpow2.f32 %v2354_v49 }
 0xee6   : > { %v2174_v41 = vsel %vm793_vm15, %v3817_v63, 0.0  ;;  %3822 = vpow2.f32 %v2169_v10 }
 0xee7   : > { %v4981_v17 = vpop.eup %3818  ;;  %3824 = vpow2.f32 %v2356_v15 }
 0xee8   : > { %v2358_v23 = vsel %vm793_vm15, %v4981_v17, 0.0 }
 0xeeb   : > { %2722 = vmax.xlane.f32.xlu2 %v2721_v53  ;;  %v3821_v11 = vpop.eup %3820 }
 0xeec   : > { %v2361_v62 = vsel %vm793_vm15, %v3821_v11, 0.0  ;;  %v3823_v18 = vpop.eup %3822 }
 0xeed   : > { %v2177_v51 = vsel %vm793_vm15, %v3823_v18, 0.0  ;;  %v3825_v61 = vpop.eup %3824 }
 0xeee   : > { %v2364_v3 = vsel %vm793_vm15, %v3825_v61, 0.0 }
 0xef3   : > { %2172 = vadd.xlane.f32.xlu2 %v2171_v20 }
 0xefb   : > { %2175 = vadd.xlane.f32.xlu2 %v2174_v41 }
 0xefd   : > { %2753 = vrot.lane.b32.xlu1 %v4746_v38, %s5214_s25 }
 0xf03   : > { %2359 = vadd.xlane.f32.xlu2 %v2358_v23 }
 0xf0b   : > { %2362 = vadd.xlane.f32.xlu2 %v2361_v62 }
 0xf0e   : > { %v2537_v21 = vpop.xlane.xlu1 %2536 }
 0xf0f   : > { %v2540_v56 = vsub.f32 %v4935_v8, %v2537_v21 }
 0xf11   : > { %v2545_v4 = vmul.f32 1.442695, %v2540_v56 }
 0xf13   : > { %2178 = vadd.xlane.f32.xlu2 %v2177_v51  ;;  %3826 = vpow2.f32 %v2545_v4 }
 0xf19   : > { %v4992_v0 = vpop.eup %3826 }
 0xf1a   : > { %v2553_v50 = vsel %vm793_vm15, %v4992_v0, 0.0 }
 0xf1b   : > { %2365 = vadd.xlane.f32.xlu2 %v2364_v3 }
 0xf27   : > { %2554 = vadd.xlane.f32.xlu1 %v2553_v50  ;;  %v2534_v7 = vpop.xlane.xlu0 %2533 }
 0xf28   : > { %v2539_v25 = vsub.f32 %v4941_v30, %v2534_v7 }
 0xf2a   : > { %v2543_v32 = vmul.f32 1.442695, %v2539_v25 }
 0xf2c   : > { %3828 = vpow2.f32 %v2543_v32 }
 0xf32   : > { %v4997_v34 = vpop.eup %3828 }
 0xf33   : > { %v2550_v8 = vsel %vm793_vm15, %v4997_v34, 0.0 }
 0xf34   : > { %2551 = vadd.xlane.f32.xlu0 %v2550_v8 }
 0xf56   : > { %v2720_v59 = vpop.xlane.xlu2 %2719  ;;  %v2726_v20 = vpop.xlane.xlu0 %2725 }
 0xf57   : > { %v2727_v58 = vsub.f32 %v4953_v27, %v2720_v59  ;;  %v2549_v2 = vpop.xlane.xlu1 %2548 }
 0xf59   : > { %v2730_v6 = vmul.f32 1.442695, %v2727_v58 }
 0xf5b   : > { %3830 = vpow2.f32 %v2730_v6 }
 0xf5e   : > { %v2723_v5 = vpop.xlane.xlu2 %2722 }
 0xf5f   : > { %v2728_v19 = vsub.f32 %v2716_v1, %v2723_v5 }
 0xf61   : > { %v2732_v42 = vmul.f32 1.442695, %v2728_v19  ;;  %v5002_v13 = vpop.eup %3830 }
 0xf62   : > { %v2736_v30 = vsel %vm793_vm15, %v5002_v13, 0.0 }
 0xf63   : > { %3832 = vpow2.f32 %v2732_v42  ;;  %2737 = vadd.xlane.f32.xlu2 %v2736_v30 }
 0xf66   : > { %v2173_v45 = vpop.xlane.xlu2 %2172 }
 0xf67   : > { %3834 = vrcp.f32 %v2173_v45 }
 0xf69   : > { %v5006_v28 = vpop.eup %3832 }
 0xf6a   : > { %v2739_v52 = vsel %vm793_vm15, %v5006_v28, 0.0 }
 0xf6b   : > { %2740 = vadd.xlane.f32.xlu0 %v2739_v52 }
 0xf6d   : > { %v3835_v43 = vpop.eup %3834 }
 0xf6e   : > { %v2176_v55 = vpop.xlane.xlu2 %2175  ;;  %v2183_v48 = vmul.f32 %v3835_v43, %v4971_v39 }
 0xf6f   : > { %3836 = vrcp.f32 %v2176_v55 }
 0xf75   : > { %v3837_v27 = vpop.eup %3836 }
 0xf76   : > { %v2184_v54 = vmul.f32 %v3837_v27, %v3817_v63  ;;  %v2360_v24 = vpop.xlane.xlu2 %2359  ;;  %v2729_v63 = vsub.f32 %v4956_v9, %v2726_v20 }
 0xf77   : > { %3838 = vrcp.f32 %v2360_v24 }
 0xf78   : > { %v2186_v40 = vpack.c.bf16 %v2184_v54, %v2183_v48  ;;  %v2734_v41 = vmul.f32 1.442695, %v2729_v63 }
 0xf7a   : > { %3492 = vmatmul.msk.bf16.vlgmr.msra.gmra.mxu3 %vm793_vm15, %v2186_v40 }
 0xf7b   : > { %2564 = vrot.lane.b32.xlu2 %v4746_v38, %s5216_s11 }
 0xf7d   : > { %v3839_v12 = vpop.eup %3838 }
 0xf7e   : > { %v2363_v35 = vpop.xlane.xlu2 %2362  ;;  %v2370_v60 = vmul.f32 %v3839_v12, %v4981_v17 }
 0xf7f   : > { %3840 = vrcp.f32 %v2363_v35  ;;  %2755 = vrot.lane.b32.xlu0 %v4758_v46, %s5214_s25  ;;  %s3897_s25 = scalar_lea.hbm %s5191_s10, 2 }
 0xf80   : > { %p3899_p1 = scmp.lt.s32.totalorder %s3897_s25, %s3893_s0 }
 0xf82   : > { %p3900_p2 = por %p3899_p1, %p3898_p0 }
 0xf84   : > { %p3901_p3 = pnand %p3900_p2, %p3896_p13 }
 0xf85   : > { %v3841_v26 = vpop.eup %3840 }
 0xf86   : > { %v2371_v1 = vmul.f32 %v3841_v26, %v3821_v11  ;;  %v2179_v37 = vpop.xlane.xlu2 %2178  ;;  %v2754_v11 = vpop.permute.xlu1 %2753 }
 0xf87   : > { %3842 = vrcp.f32 %v2179_v37  ;;  %v3645_v37 = vld [vmem:[%s5185_s4 + $0x30] sm:$0xff] }
 0xf88   : > { %v2373_v53 = vpack.c.bf16 %v2371_v1, %v2370_v60  ;;  %v3646_v1 = vld [vmem:[%s5185_s4 + $0x38] sm:$0xff] }
 0xf89   : > { %2875 = vmatpush.bf16.msra.mxu2 %v3646_v1  ;;  %v3647_v1 = vld [vmem:[%s5186_s5 + $0x20] sm:$0xff] }
 0xf8a   : > { %3496 = vmatmul.msk.bf16.vlgmr.msrb.gmra.mxu1 %vm793_vm15, %v2373_v53  ;;  %v3644_v53 = vld [vmem:[%s5185_s4 + $0x28] sm:$0xff] }
 0xf8d   : > { %v3843_v44 = vpop.eup %3842  ;;  %2876 = vmatpush.bf16.msra.mxu2 %v3645_v37 }
 0xf8e   : > { %v2366_v39 = vpop.xlane.xlu2 %2365  ;;  %v2185_v31 = vmul.f32 %v3843_v44, %v3823_v18  ;;  %v3643_v44 = vld [vmem:[%s5185_s4 + $0x20] sm:$0xff] }
 0xf8f   : > { %3844 = vrcp.f32 %v2366_v39 }
 0xf90   : > { %v2187_v38 = vpack.c.bf16 %v2185_v31, %v2185_v31  ;;  %3846 = vpow2.f32 %v2734_v41 }
 0xf91   : > { %2877 = vmatpush.bf16.msra.mxu2 %v3644_v53 }
 0xf92   : > { %3493 = vmatmul.msk.bf16.gmra.mxu3 %vm793_vm15, %v2187_v38 }
 0xf95   : > { %v3845_v57 = vpop.eup %3844  ;;  %2878 = vmatpush.bf16.msra.mxu2 %v3643_v44 }
 0xf96   : > { %v2372_v46 = vmul.f32 %v3845_v57, %v3825_v61  ;;  %v3847_v49 = vpop.eup %3846 }
 0xf97   : > { %v2742_v17 = vsel %vm793_vm15, %v3847_v49, 0.0 }
 0xf98   : > { %v2374_v47 = vpack.c.bf16 %v2372_v46, %v2372_v46 }
 0xf9a   : > { %3497 = vmatmul.msk.bf16.gmra.mxu1 %vm793_vm15, %v2374_v47  ;;  %v2555_v21 = vpop.xlane.xlu1 %2554 }
 0xfa7   : > { %v2552_v23 = vpop.xlane.xlu0 %2551 }
 0xfa8   : > { %3848 = vrcp.f32 %v2552_v23 }
 0xfa9   : > { %2743 = vadd.xlane.f32.xlu0 %v2742_v17  ;;  %3850 = vrcp.f32 %v2549_v2 }
 0xfaa   : > { %3852 = vrcp.f32 %v2555_v21 }
 0xfae   : > { %v3849_v29 = vpop.eup %3848 }
 0xfaf   : > { %v3851_v62 = vpop.eup %3850  ;;  %v2560_v15 = vmul.f32 %v3849_v29, %v4997_v34 }
 0xfb0   : > { %v2559_v9 = vmul.f32 %v3851_v62, %v4958_v36  ;;  %v3853_v61 = vpop.eup %3852 }
 0xfb1   : > { %v2561_v4 = vmul.f32 %v3853_v61, %v4992_v0  ;;  %v5064_v61 = vld [vmem:[%s5188_s7 + $0x8] sm:$0xff] }
 0xfb2   : > { %v2562_v51 = vpack.c.bf16 %v2560_v15, %v2559_v9 }
 0xfb3   : > { %v2563_v7 = vpack.c.bf16 %v2561_v4, %v2561_v4  ;;  %v2892_v4 = vperm.slane %v5064_v61, 4 }
 0xfd6   : > { %v2738_v10 = vpop.xlane.xlu2 %2737 }
 0xfde   : > { %v2565_v18 = vpop.permute.xlu2 %2564  ;;  %v2741_v56 = vpop.xlane.xlu0 %2740 }
 0xfdf   : > { %2585 = vmatpush.bf16.msrb.mxu3 %v2565_v18  ;;  %3854 = vrcp.f32 %v2741_v56 }
 0xfe0   : > { %3856 = vrcp.f32 %v2738_v10 }
 0xfe2   : > { %3500 = vmatmul.msk.bf16.vlgmr.msrb.gmra.mxu3 %vm793_vm15, %v2562_v51 }
 0xfe5   : > { %v3855_v3 = vpop.eup %3854 }
 0xfe6   : > { %v3857_v32 = vpop.eup %3856  ;;  %v2749_v36 = vmul.f32 %v3855_v3, %v5006_v28 }
 0xfe7   : > { %v2748_v34 = vmul.f32 %v3857_v32, %v5002_v13 }
 0xfe9   : > { %v2751_v8 = vpack.c.bf16 %v2749_v36, %v2748_v34 }
 0xff1   : > { %v2756_v50 = vpop.permute.xlu0 %2755 }
 0xff2   : > { %v2765_v25 = vsel %vm835_vm12, %v2756_v50, 0  ;;  %3501 = vmatmul.msk.bf16.gmra.mxu3 %vm793_vm15, %v2563_v7 }
 0xff3   : > { %2773 = vmatpush.bf16.msra.mxu1 %v2765_v25 }
 0xff7   : > { %2774 = vmatpush.bf16.msra.mxu1 %v2754_v11 }
 0xffa   : > { %3504 = vmatmul.msk.bf16.vlgmr.msra.gmra.mxu1 %vm793_vm15, %v2751_v8 }
 0xffd   : > { %v2206_v59 = vpop.f32.mrf.mxu3 }
0x1005   : > { %v2208_v0 = vpop.f32.mrf.mxu3 }
0x1007   : > { %v2398_v58 = vpop.f32.mrf.mxu1 }
0x100f   : > { %v2400_v6 = vpop.f32.mrf.mxu1 }
0x1010   : > { %v3723_v5 = vpack.i.bf16 %v2400_v6, %v2398_v58 }
0x1012   : > { %3724 = vrot.lane.b32.xlu2 %v3723_v5, %s5212_s29 }
0x1015   : > { %v2211_v19 = vpop.f32.mrf.mxu3 }
0x1017   : > { %v2403_v42 = vpop.f32.mrf.mxu1 }
0x101c   : > { %v2744_v30 = vpop.xlane.xlu0 %2743 }
0x101d   : > { %3858 = vrcp.f32 %v2744_v30  ;;  %v2213_v45 = vpop.f32.mrf.mxu3 }
0x101f   : > { %v2405_v52 = vpop.f32.mrf.mxu1 }
0x1023   : > { %v3859_v28 = vpop.eup %3858 }
0x1024   : > { %v2750_v55 = vmul.f32 %v3859_v28, %v3847_v49 }
0x1026   : > { %v2752_v13 = vpack.c.bf16 %v2750_v55, %v2750_v55 }
0x1028   : > { %3505 = vmatmul.msk.bf16.gmra.mxu1 %vm793_vm15, %v2752_v13 }
0x1065   : > { %v2587_v43 = vpop.f32.mrf.mxu3 }
0x106c   : > { %v3725_v39 = vpop.permute.xlu2 %3724 }
0x106d   : > { %v2589_v27 = vpop.f32.mrf.mxu3  ;;  %v3727_v38 = vunpack.i.h.bf16 %v3725_v39  ;;  %v3726_v20 = vunpack.i.l.bf16 %v3725_v39 }
0x106e   : > { %v3728_v48 = vpack.i.bf16 %v2589_v27, %v2587_v43 }
0x106f   : > { %v2822_v47 = vsel %vm653_vm13, %v2208_v0, %v3727_v38  ;;  %v2821_v41 = vsel %vm653_vm13, %v2206_v59, %v3726_v20 }
0x1070   : > { %3729 = vrot.lane.b32.xlu2 %v3728_v48, %s5213_s21 }
0x1075   : > { %v2592_v54 = vpop.f32.mrf.mxu3 }
0x1077   : > { %v2776_v24 = vpop.f32.mrf.mxu1 }
0x107d   : > { %v2594_v40 = vpop.f32.mrf.mxu3 }
0x107e   : > { %v3649_v40 = vld [vmem:[%s5186_s5 + $0x30] sm:$0xff] }
0x107f   : > { %v2778_v35 = vpop.f32.mrf.mxu1 }
0x1080   : > { %v3733_v12 = vpack.i.bf16 %v2778_v35, %v2776_v24  ;;  %v3650_v24 = vld [vmem:[%s5186_s5 + $0x38] sm:$0xff]  ;;  %v3648_v35 = vld [vmem:[%s5186_s5 + $0x28] sm:$0xff] }
0x1081   : > { %3015 = vmatpush.bf16.msra.mxu3 %v3650_v24  ;;  %v3653_v24 = vld [vmem:[%s5187_s6 + $0x30] sm:$0xff] }
0x1082   : > { %3734 = vrot.lane.b32.xlu2 %v3733_v12, %s5211_s26 }
0x1085   : > { %3016 = vmatpush.bf16.msra.mxu3 %v3649_v40  ;;  %v3652_v40 = vld [vmem:[%s5187_s6 + $0x28] sm:$0xff] }
0x1089   : > { %3017 = vmatpush.bf16.msra.mxu3 %v3648_v35  ;;  %v3651_v35 = vld [vmem:[%s5187_s6 + $0x20] sm:$0xff] }
0x108a   : > { %2792 = vrot.lane.b32.xlu2 %v2403_v42, %s5212_s29 }
0x108d   : > { %3018 = vmatpush.bf16.msra.mxu3 %v3647_v1 }
0x1092   : > { %2804 = vrot.lane.b32.xlu2 %v2592_v54, %s5213_s21 }
0x10a5   : > { %v2781_v26 = vpop.f32.mrf.mxu1 }
0x10a6   : > { %2816 = vrot.lane.b32.xlu1 %v2781_v26, %s5211_s26  ;;  %s351_s26 = scalar_lea.vmem [#allocation2], %s350_s12 }
0x10a7   : > { %s3219_s11 = sshll.u32 %s351_s26, 4  ;;  %s3220_s11 = int_to_ptr.vmem [resolvable:$true] %s3219_s11 }
0x10ad   : > { %v2783_v60 = vpop.f32.mrf.mxu1 }
0x10ca   : > { %v3730_v31 = vpop.permute.xlu2 %3729 }
0x10cb   : > { %v3732_v57 = vunpack.i.h.bf16 %v3730_v31  ;;  %v3731_v46 = vunpack.i.l.bf16 %v3730_v31 }
0x10cd   : > { %v2824_v2 = vsel %vm1466_vm2, %v2821_v41, %v3731_v46  ;;  %v2825_v23 = vsel %vm1466_vm2, %v2822_v47, %v3732_v57 }
0x10dc   : > { %v3735_v63 = vpop.permute.xlu2 %3734 }
0x10dd   : > { %v3737_v49 = vunpack.i.h.bf16 %v3735_v63  ;;  %v3736_v17 = vunpack.i.l.bf16 %v3735_v63 }
0x10df   : > { %v2828_v10 = vsel %vm385_vm1, %v2825_v23, %v3737_v49  ;;  %v2827_v11 = vsel %vm385_vm1, %v2824_v2, %v3736_v17  ;;  %v2962_v23 = vperm.slane %v5064_v61, 2 }
0x10e0   : > { %v2830_v29 = vpack.c.bf16 %v2828_v10, %v2827_v11 }
0x10e2   : > { %3530 = vmatmul.msk.bf16.vlgmr.msra.gmra.mxu2 %vm414_vm0, %v2830_v29 }
0x10e4   : > { %v2793_v62 = vpop.permute.xlu2 %2792 }
0x10e5   : > { %v2823_v9 = vsel %vm653_vm13, %v2211_v19, %v2793_v62  ;;  %v2966_v62 = vperm.slane %v5064_v61, 3 }
0x10ec   : > { %v2805_v15 = vpop.permute.xlu2 %2804 }
0x10ed   : > { %v2826_v18 = vsel %vm1466_vm2, %v2823_v9, %v2805_v15 }
0x1118   : > { %v2817_v21 = vpop.permute.xlu1 %2816 }
0x1119   : > { %v2829_v51 = vsel %vm385_vm1, %v2826_v18, %v2817_v21 }
0x111a   : > { %v2831_v56 = vpack.c.bf16 %v2829_v51, %v2829_v51 }
0x111c   : > { %3531 = vmatmul.msk.bf16.gmra.mxu2 %vm414_vm0, %v2831_v56 }
0x1165   : > { %v2880_v3 = vpop.f32.mrf.mxu2 }
0x1166   : > { %v2889_v50 = vadd.f32 %v2880_v3, %v4622_v16 }
0x1168   : > { %v2893_v7 = vadd.f32 %v2892_v4, %v2889_v50 }
0x116a   : > { %v2896_v25 = vsel %vm414_vm0, %v2893_v7, 0.0 }
0x116b   : > { %2897 = vadd.xlane.f32.xlu0 %v2896_v25 }
0x116d   : > { %v2882_v32 = vpop.f32.mrf.mxu2 }
0x116e   : > { %v2890_v36 = vadd.f32 %v2882_v32, %v4627_v22 }
0x1170   : > { %v2894_v34 = vadd.f32 %v2892_v4, %v2890_v36 }
0x1172   : > { %v2899_v8 = vsel %vm414_vm0, %v2894_v34, 0.0 }
0x1173   : > { %2900 = vadd.xlane.f32.xlu2 %v2899_v8 }
0x119f   : > { %v2885_v59 = vpop.f32.mrf.mxu2 }
0x11a0   : > { %v2891_v58 = vadd.f32 %v2885_v59, %v4632_v33 }
0x11a2   : > { %v5072_v0 = vadd.f32 %v2892_v4, %v2891_v58 }
0x11a4   : > { %v2902_v6 = vsel %vm414_vm0, %v5072_v0, 0.0 }
0x11a5   : > { %2903 = vadd.xlane.f32.xlu0 %v2902_v6 }
0x11a7   : > { %v2887_v16 = vpop.f32.mrf.mxu2 }
0x11de   : > { %v2898_v5 = vpop.xlane.xlu0 %2897 }
0x11df   : > { %v2905_v19 = vmul.f32 %v2898_v5, %v4072_v14 }
0x11e1   : > { %v2908_v42 = vsub.f32 %v2893_v7, %v2905_v19 }
0x11e3   : > { %v2911_v30 = vmul.f32 %v2908_v42, %v2908_v42 }
0x11e5   : > { %v2914_v22 = vsel %vm414_vm0, %v2911_v30, 0.0 }
0x11e6   : > { %v2901_v45 = vpop.xlane.xlu2 %2900  ;;  %2915 = vadd.xlane.f32.xlu0 %v2914_v22 }
0x11e7   : > { %v2906_v52 = vmul.f32 %v2901_v45, %v4072_v14 }
0x11e9   : > { %v2909_v28 = vsub.f32 %v2894_v34, %v2906_v52 }
0x11eb   : > { %v2912_v33 = vmul.f32 %v2909_v28, %v2909_v28 }
0x11ed   : > { %v2917_v55 = vsel %vm414_vm0, %v2912_v33, 0.0 }
0x11ee   : > { %2918 = vadd.xlane.f32.xlu0 %v2917_v55 }
0x1218   : > { %v2904_v13 = vpop.xlane.xlu0 %2903 }
0x1219   : > { %v2907_v43 = vmul.f32 %v2904_v13, %v4072_v14 }
0x121b   : > { %v5082_v27 = vsub.f32 %v5072_v0, %v2907_v43 }
0x121d   : > { %v2913_v48 = vmul.f32 %v5082_v27, %v5082_v27 }
0x121f   : > { %v2920_v54 = vsel %vm414_vm0, %v2913_v48, 0.0 }
0x1220   : > { %2921 = vadd.xlane.f32.xlu1 %v2920_v54  ;;  %v3654_v54 = vld [vmem:[%s5187_s6 + $0x38] sm:$0xff] }
0x1221   : > { %3119 = vmatpush.bf16.msrb.mxu0 %v3654_v54 }
0x1225   : > { %3120 = vmatpush.bf16.msrb.mxu0 %v3653_v24 }
0x1229   : > { %3121 = vmatpush.bf16.msrb.mxu0 %v3652_v40 }
0x122d   : > { %3122 = vmatpush.bf16.msrb.mxu0 %v3651_v35 }
0x1259   : > { %v2916_v12 = vpop.xlane.xlu0 %2915 }
0x125a   : > { %v2923_v26 = vmul.f32 %v2916_v12, %v4072_v14 }
0x125c   : > { %v2926_v60 = vadd.f32 1e-05, %v2923_v26  ;;  %v3041_v26 = vperm.slane %v5064_v61, 7 }
0x125e   : > { %3860 = vrsqrt.f32 %v2926_v60  ;;  %vm2935_vm12 = vweird.f32 %v2926_v60 }
0x1261   : > { %v2919_v37 = vpop.xlane.xlu0 %2918 }
0x1262   : > { %v2924_v53 = vmul.f32 %v2919_v37, %v4072_v14 }
0x1264   : > { %v3861_v44 = vpop.eup %3860  ;;  %v2927_v39 = vadd.f32 1e-05, %v2924_v53 }
0x1265   : > { %v2930_v31 = vmul.f32 %v3861_v44, %v2926_v60  ;;  %vm2936_vm1 = vweird.f32 %v3861_v44  ;;  %v3063_v60 = vsub.f32 0.0, %v5064_v61 }
0x1266   : > { %3862 = vrsqrt.f32 %v2927_v39  ;;  %vm2937_vm13 = vmor %vm2935_vm12, %vm2936_vm1  ;;  %vm2945_vm2 = vweird.f32 %v2927_v39 }
0x1267   : > { %v2931_v38 = vmul.f32 %v3861_v44, %v2930_v31 }
0x1269   : > { %v2932_v20 = vmul.f32 0.5, %v2931_v38 }
0x126b   : > { %v2933_v57 = vsub.f32 1.5, %v2932_v20 }
0x126c   : > { %v3863_v46 = vpop.eup %3862 }
0x126d   : > { %v2934_v63 = vmul.f32 %v3861_v44, %v2933_v57  ;;  %v2940_v47 = vmul.f32 %v3863_v46, %v2927_v39  ;;  %vm2946_vm15 = vweird.f32 %v3863_v46 }
0x126e   : > { %vm2947_vm11 = vmor %vm2945_vm2, %vm2946_vm15 }
0x126f   : > { %v2941_v41 = vmul.f32 %v3863_v46, %v2940_v47  ;;  %v2938_v49 = vsel %vm2937_vm13, %v3861_v44, %v2934_v63  ;;  %v3064_v44 = vperm.slane %v3063_v60, 6 }
0x1270   : > { %v2959_v10 = vmul.f32 %v2938_v49, %v2908_v42 }
0x1271   : > { %v2942_v17 = vmul.f32 0.5, %v2941_v41 }
0x1272   : > { %v2963_v15 = vmul.f32 %v2962_v23, %v2959_v10 }
0x1273   : > { %v2943_v2 = vsub.f32 1.5, %v2942_v17 }
0x1274   : > { %v2967_v21 = vadd.f32 %v2966_v62, %v2963_v15 }
0x1275   : > { %v2944_v11 = vmul.f32 %v3863_v46, %v2943_v2 }
0x1277   : > { %v2948_v29 = vsel %vm2947_vm11, %v3863_v46, %v2944_v11 }
0x1278   : > { %v2960_v9 = vmul.f32 %v2948_v29, %v2909_v28 }
0x127a   : > { %v2964_v18 = vmul.f32 %v2962_v23, %v2960_v9 }
0x127c   : > { %v2968_v51 = vadd.f32 %v2966_v62, %v2964_v18 }
0x127e   : > { %v2970_v56 = vpack.c.bf16 %v2968_v51, %v2967_v21 }
0x1280   : > { %3556 = vmatmul.msk.bf16.vlgmr.msra.gmra.mxu3 %vm414_vm0, %v2970_v56 }
0x1293   : > { %v2922_v4 = vpop.xlane.xlu1 %2921 }
0x1294   : > { %v2925_v3 = vmul.f32 %v2922_v4, %v4072_v14 }
0x1296   : > { %v2928_v50 = vadd.f32 1e-05, %v2925_v3 }
0x1298   : > { %3864 = vrsqrt.f32 %v2928_v50  ;;  %vm2955_vm3 = vweird.f32 %v2928_v50 }
0x129e   : > { %v3865_v7 = vpop.eup %3864 }
0x129f   : > { %v2950_v25 = vmul.f32 %v3865_v7, %v2928_v50  ;;  %vm2956_vm14 = vweird.f32 %v3865_v7 }
0x12a0   : > { %vm2957_vm4 = vmor %vm2955_vm3, %vm2956_vm14 }
0x12a1   : > { %v2951_v32 = vmul.f32 %v3865_v7, %v2950_v25 }
0x12a3   : > { %v2952_v36 = vmul.f32 0.5, %v2951_v32 }
0x12a5   : > { %v2953_v34 = vsub.f32 1.5, %v2952_v36 }
0x12a7   : > { %v2954_v8 = vmul.f32 %v3865_v7, %v2953_v34 }
0x12a9   : > { %v2958_v59 = vsel %vm2957_vm4, %v3865_v7, %v2954_v8 }
0x12aa   : > { %v2961_v58 = vmul.f32 %v2958_v59, %v5082_v27  ;;  %v3658_v59 = vld [vmem:[%s5189_s8 + $0x18] sm:$0xff] }
0x12ab   : > { %3198 = vmatpush.bf16.msrb.mxu1 %v3658_v59 }
0x12ac   : > { %v2965_v6 = vmul.f32 %v2962_v23, %v2961_v58  ;;  %v3655_v58 = vld [vmem:[%s5189_s8] sm:$0xff] }
0x12ae   : > { %v2969_v16 = vadd.f32 %v2966_v62, %v2965_v6 }
0x12b0   : > { %v2971_v5 = vpack.c.bf16 %v2969_v16, %v2969_v16 }
0x12b2   : > { %3557 = vmatmul.msk.bf16.gmra.mxu3 %vm414_vm0, %v2971_v5 }
0x1303   : > { %v3020_v19 = vpop.f32.mrf.mxu3 }
0x1304   : > { %v3029_v42 = vmul.f32 %v3020_v19, %v2967_v21  ;;  %v3045_v30 = vmul.f32 2.0, %v3020_v19 }
0x1306   : > { %3051 = vrot.lane.b32.xlu2 %v3045_v30, %s5210_s27  ;;  %v3032_v22 = vsel %vm414_vm0, %v3029_v42, 0.0 }
0x1307   : > { %3033 = vadd.xlane.f32.xlu0 %v3032_v22 }
0x130b   : > { %v3022_v45 = vpop.f32.mrf.mxu3 }
0x130c   : > { %v3030_v52 = vmul.f32 %v3022_v45, %v2968_v51  ;;  %v3046_v33 = vmul.f32 2.0, %v3022_v45  ;;  %v3132_v51 = vperm.slane %v5064_v61, 5  ;;  %v3657_v61 = vld [vmem:[%s5189_s8 + $0x10] sm:$0xff] }
0x130d   : > { %3199 = vmatpush.bf16.msrb.mxu1 %v3657_v61 }
0x130e   : > { %v3035_v28 = vsel %vm414_vm0, %v3030_v52, 0.0 }
0x130f   : > { %3036 = vadd.xlane.f32.xlu0 %v3035_v28 }
0x1323   : > { %3053 = vrot.lane.b32.xlu0 %v3046_v33, %s5210_s27 }
0x1335   : > { %v3025_v55 = vpop.f32.mrf.mxu3 }
0x1336   : > { %v3031_v13 = vmul.f32 %v3025_v55, %v2969_v16  ;;  %v3047_v43 = vmul.f32 2.0, %v3025_v55 }
0x1338   : > { %3055 = vrot.lane.b32.xlu1 %v3047_v43, %s5210_s27  ;;  %v3038_v27 = vsel %vm414_vm0, %v3031_v13, 0.0 }
0x1339   : > { %3039 = vadd.xlane.f32.xlu2 %v3038_v27 }
0x133d   : > { %v3027_v48 = vpop.f32.mrf.mxu3 }
0x1360   : > { %v3052_v53 = vpop.permute.xlu2 %3051 }
0x137a   : > { %v3034_v12 = vpop.xlane.xlu0 %3033 }
0x137b   : > { %v3042_v1 = vadd.f32 %v3041_v26, %v3034_v12 }
0x137d   : > { %v3060_v39 = vsub.f32 %v3042_v1, %v3052_v53 }
0x137f   : > { %v3065_v31 = vmul.f32 %v3064_v44, %v3060_v39 }
0x1381   : > { %v3068_v46 = vmul.f32 1.442695, %v3065_v31 }
0x1382   : > { %v3037_v37 = vpop.xlane.xlu0 %3036 }
0x1383   : > { %v3043_v38 = vadd.f32 %v3041_v26, %v3037_v37  ;;  %3866 = vpow2.f32 %v3068_v46 }
0x1389   : > { %v3867_v41 = vpop.eup %3866 }
0x1395   : > { %v3054_v20 = vpop.permute.xlu0 %3053 }
0x1396   : > { %v3061_v57 = vsub.f32 %v3043_v38, %v3054_v20 }
0x1398   : > { %v3066_v63 = vmul.f32 %v3064_v44, %v3061_v57 }
0x139a   : > { %v3070_v47 = vmul.f32 1.442695, %v3066_v63 }
0x139c   : > { %3868 = vpow2.f32 %v3070_v47 }
0x13a2   : > { %v3869_v49 = vpop.eup %3868 }
0x13a3   : > { %v3074_v17 = vpack.c.bf16 %v3869_v49, %v3867_v41 }
0x13a5   : > { %3582 = vmatmul.msk.bf16.vlgmr.msrb.gmra.mxu0 %vm414_vm0, %v3074_v17 }
0x13aa   : > { %v3056_v10 = vpop.permute.xlu1 %3055 }
0x13ac   : > { %v3040_v2 = vpop.xlane.xlu2 %3039 }
0x13ad   : > { %v3044_v23 = vadd.f32 %v3041_v26, %v3040_v2 }
0x13af   : > { %v3062_v11 = vsub.f32 %v3044_v23, %v3056_v10 }
0x13b1   : > { %v3067_v29 = vmul.f32 %v3064_v44, %v3062_v11 }
0x13b3   : > { %v3072_v62 = vmul.f32 1.442695, %v3067_v29 }
0x13b5   : > { %3870 = vpow2.f32 %v3072_v62 }
0x13bb   : > { %v3871_v15 = vpop.eup %3870 }
0x13bc   : > { %v3075_v9 = vpack.c.bf16 %v3871_v15, %v3871_v15 }
0x13be   : > { %3583 = vmatmul.msk.bf16.gmra.mxu0 %vm414_vm0, %v3075_v9 }
0x1422   : > { %v3124_v18 = vpop.f32.mrf.mxu0 }
0x142a   : > { %v3125_v21 = vpop.f32.mrf.mxu0 }
0x143b   : > { %v3127_v56 = vpop.f32.mrf.mxu0 }
0x143c   : > { %v3131_v4 = vadd.f32 %v3127_v56, %v5072_v0  ;;  %v3656_v0 = vld [vmem:[%s5189_s8 + $0x8] sm:$0xff] }
0x143d   : > { %3200 = vmatpush.bf16.msrb.mxu1 %v3656_v0 }
0x143e   : > { %v3133_v3 = vadd.f32 %v3132_v51, %v3131_v4 }
0x1440   : > { %v3135_v50 = vsel %vm3134_vm5, %v3133_v3, 0.0 }
0x1441   : > { %3136 = vadd.xlane.f32.xlu0 %v3135_v50  ;;  %3201 = vmatpush.bf16.msrb.mxu1 %v3655_v58 }
0x1443   : > { %v3129_v7 = vpop.f32.mrf.mxu0 }
0x14b4   : > { %v3137_v25 = vpop.xlane.xlu0 %3136 }
0x14b5   : > { %v3138_v32 = vmul.f32 %v3137_v25, %v4072_v14 }
0x14b7   : > { %v3139_v36 = vsub.f32 %v3133_v3, %v3138_v32 }
0x14b9   : > { %v3140_v34 = vmul.f32 %v3139_v36, %v3139_v36 }
0x14bb   : > { %v3141_v8 = vsel %vm3134_vm5, %v3140_v34, 0.0 }
0x14bc   : > { %3142 = vadd.xlane.f32.xlu1 %v3141_v8 }
0x152f   : > { %v3143_v6 = vpop.xlane.xlu1 %3142 }
0x1530   : > { %v3144_v16 = vmul.f32 %v3143_v6, %v4072_v14  ;;  %v3166_v14 = vld [vmem:[%s5190_s9] sm:$0x1] }
0x1532   : > { %v3145_v5 = vadd.f32 1e-05, %v3144_v16 }
0x1534   : > { %3872 = vrsqrt.f32 %v3145_v5  ;;  %vm3152_vm7 = vweird.f32 %v3145_v5 }
0x153a   : > { %v3873_v19 = vpop.eup %3872 }
0x153b   : > { %v3147_v42 = vmul.f32 %v3873_v19, %v3145_v5  ;;  %vm3153_vm6 = vweird.f32 %v3873_v19 }
0x153c   : > { %vm3154_vm8 = vmor %vm3152_vm7, %vm3153_vm6 }
0x153d   : > { %v3148_v30 = vmul.f32 %v3873_v19, %v3147_v42 }
0x153f   : > { %v3149_v22 = vmul.f32 0.5, %v3148_v30 }
0x1541   : > { %v3150_v45 = vsub.f32 1.5, %v3149_v22 }
0x1543   : > { %v3151_v52 = vmul.f32 %v3873_v19, %v3150_v45 }
0x1545   : > { %v3155_v28 = vsel %vm3154_vm8, %v3873_v19, %v3151_v52 }
0x1546   : > { %v3156_v33 = vmul.f32 %v3155_v28, %v3139_v36 }
0x1548   : > { %v3157_v55 = vpack.c.bf16 %v3156_v33, %v3156_v33 }
0x154a   : > { %3600 = vmatmul.msk.bf16.vlgmr.msrb.gmra.mxu1 %vm414_vm0, %v3157_v55 }
0x15c7   : > { %v3203_v13 = vpop.f32.mrf.mxu1 }
0x15c8   : > { %v3204_v43 = vadd.f32 %v3203_v13, %v3166_v14 }
0x15ca   : > { %3207 = vst [vmem:[%s351_s26] sm:$0x1] %v3204_v43 }
0x15cb   : > { %3904 = shalt.err (!%p3901_p3)
}
0x15cc   : > { %3659 = dma.vmem_to_hbm [thread:$0]  (%p4043_p5), %s3220_s11, 16, %s3222_s18, %s3209_s20  }
0x15cf   : > { %v3205_v27 = vpop.f32.mrf.mxu1 }
0x15d0 PF: > { %p3665_p4 = scmp.ge.s32.totalorder %s3939_s16, 2  ;;  %s3233_s12 = sand.u32 1, %s3927_s13  }
0x15d1   : > { %s3234_s28 = scalar_lea.sflag [#allocation3], %s3233_s12 }
0x15d2   : > { %p3662_p7 = pnand %p3665_p4, %p4047_p6 }
0x15d4   : > { %p3663_p8 = pneg %p3662_p7 }
0x15d6   : > { %3922 = dma.done.wait (%p3663_p8), %s3234_s28, 16  }
0x15d7   : > { %3924 = vsyncadd (%p3663_p8), %s3234_s28, 4294967280  ;;  %p20_p9 = scmp.ge.s32.totalorder %s4030_s19, 4   ;;  %s5217_s13 = smov %s3931_s14 }
0x15d8   : > { %s5218_s14 = smov %s3935_s15  ;;  %s5219_s15 = smov %s4041_s22 }
0x15d9   : > { %s5220_s16 = smov %s4030_s19  ;;  %22 = sbr.rel (!%p20_p9) target bundleno = 5 (0x5), region = 100 }
0x15de   :  { %3239 = vsyncpa [#allocation3], 1 }
0x15df   :  { %3241 = vsyncpa [#allocation3 + $0x1], 1 }

</bundles_post_ra>
